<compile_context>
chip_gen: v7x
topology: tpu7x:2x2x1
jax: 0.10.0
libtpu: 0.0.40
codegen_flags: <defaults>
</compile_context>

<pallas_src>
import math
import functools

import jax
import jax.numpy as jnp
from jax.experimental import pallas as pl
from jax.experimental.pallas import tpu as pltpu


# ----------------------------- small helpers ----------------------------------


def _layer_norm(v, g, b, eps=1e-5):
    mu = jnp.mean(v, axis=-1, keepdims=True)
    var = jnp.mean((v - mu) ** 2, axis=-1, keepdims=True)
    return (v - mu) * jax.lax.rsqrt(var + eps) * g + b


def _pick_groups(b3):
    """Batch-group grid size: one group per TensorCore.

    v5e/v6e have a single TC (a batch split is just a serial loop that shrinks
    the MXU M-fill and adds per-step overhead) -> groups=1.
    v7x has 2 TCs -> split the batch into 2 equal halves (never 3)."""
    try:
        kind = jax.devices()[0].device_kind.lower()
    except Exception:
        kind = ""
    two_tc = ("v7" in kind) or ("7x" in kind)
    if two_tc and b3 % 2 == 0:
        return 2
    return 1


def _pick_tile(n, candidates=(512, 256, 128)):
    """Largest lane-dense tile (multiple of 128) dividing n, else the full dim."""
    for c in candidates:
        if n % c == 0:
            return c
    return n


def _vmem_limit_bytes(budget):
    """Explicit scoped-VMEM limit: ~2x the estimated footprint + headroom for
    compiler temporaries, never below the 32 MiB scoped default and never above
    ~90% of physical VMEM (64 MiB on v7x, 128 MiB on v5e/v6e)."""
    try:
        cap = int(pltpu.get_tpu_info().vmem_capacity_bytes)
    except Exception:
        cap = 64 * 1024 * 1024  # conservative (v7x physical)
    lim = 2 * int(budget) + (8 << 20)
    lim = max(lim, 32 << 20)
    lim = min(lim, int(cap * 0.9))
    return int(lim)


# ------------------------- fused transformer-blocks kernel --------------------


def fused_blocks_kernel(x_ref,
                        ln1_g_ref, ln1_b_ref, wqkv_ref, bqkv_ref,
                        wo_ref, bo_ref, ln2_g_ref, ln2_b_ref,
                        w1_ref, b1_ref, w2_ref, b2_ref,
                        lnf_g_ref, lnf_b_ref,
                        hf_ref, xf_ref, *, num_heads, mxu_dtype):
    """One transformer block (layer = pl.program_id(1)) for one batch group.

    The residual stream lives in the VMEM scratch `xf_ref` and persists across
    the layer grid axis; the final LayerNorm output is emitted on the last layer
    (the vocab head is a separate, V-tiled pallas_call)."""
    l = pl.program_id(1)
    n_layers = pl.num_programs(1)
    BG, T, D = x_ref.shape
    H = num_heads
    hd = D // H
    M = BG * T

    # Initialize the residual stream from the embedded tokens at layer 0.
    @pl.when(l == 0)
    def _():
        xf_ref[...] = x_ref[...].reshape(M, D)

    # Causal additive bias (cheap iota + select; rebuilt once per layer step).
    row = jax.lax.broadcasted_iota(jnp.int32, (T, T), 0)
    col = jax.lax.broadcasted_iota(jnp.int32, (T, T), 1)
    causal_bias = jnp.where(col <= row, 0.0, -1e30).astype(jnp.float32)

    xf = xf_ref[...]                                       # (M, D) f32 residual

    # ---- causal multi-head self-attention (layer-l weights, streamed) ----
    h = _layer_norm(xf, ln1_g_ref[0], ln1_b_ref[0])
    qkv = jnp.dot(h.astype(mxu_dtype), wqkv_ref[0],
                  preferred_element_type=jnp.float32) + bqkv_ref[0]   # (M, 3D)

    def split_heads(t):                                    # (M, D) -> (BG*H, T, hd)
        return t.reshape(BG, T, H, hd).transpose(0, 2, 1, 3).reshape(BG * H, T, hd)

    # TODO(synk): packed [q|k|v] column order + head split assume the PyTorch
    # module's qkv layout (view(B,T,H,hd).transpose(1,2)); cross-check when
    # loading real checkpoints.
    q = split_heads(qkv[:, :D]).astype(mxu_dtype)
    k = split_heads(qkv[:, D:2 * D]).astype(mxu_dtype)
    v = split_heads(qkv[:, 2 * D:]).astype(mxu_dtype)

    # TODO(synk): at production T, retile attention flash-style ((128,128) q/k
    # blocks, head-batch packed into lanes for the softmax) so the score/PV
    # matmuls are MXU-shaped and the head-split relayouts disappear; at the tiny
    # test T this path is correct but layout-bound.
    s = jnp.einsum('bqd,bkd->bqk', q, k,
                   preferred_element_type=jnp.float32)     # (BG*H, T, T)
    s = s * (1.0 / math.sqrt(hd)) + causal_bias            # scale in f32 (parity)
    s = s - jnp.max(s, axis=-1, keepdims=True)
    p = jnp.exp(s)
    # TODO(synk): approx reciprocal (EUP slot) -> ~1e-3 rel. error vs exact divide.
    p = p * pl.reciprocal(jnp.sum(p, axis=-1, keepdims=True), approx=True)

    ctx = jnp.einsum('bqk,bkd->bqd', p.astype(mxu_dtype), v,
                     preferred_element_type=jnp.float32)   # (BG*H, T, hd)
    ctx = ctx.reshape(BG, H, T, hd).transpose(0, 2, 1, 3).reshape(M, D)

    attn = jnp.dot(ctx.astype(mxu_dtype), wo_ref[0],
                   preferred_element_type=jnp.float32) + bo_ref[0]
    xf = xf + attn

    # ---- MLP ----
    h2 = _layer_norm(xf, ln2_g_ref[0], ln2_b_ref[0])
    m = jnp.dot(h2.astype(mxu_dtype), w1_ref[0],
                preferred_element_type=jnp.float32) + b1_ref[0]
    # TODO(synk): PyTorch nn.GELU default is the exact erf form; tanh approx kept
    # for a Mosaic-safe lowering (small numeric delta).
    m = jax.nn.gelu(m, approximate=True)
    m = jnp.dot(m.astype(mxu_dtype), w2_ref[0],
                preferred_element_type=jnp.float32) + b2_ref[0]
    xf = xf + m

    xf_ref[...] = xf

    # ---- final LayerNorm on the last layer ----
    @pl.when(l == n_layers - 1)
    def _():
        hf = _layer_norm(xf, lnf_g_ref[...], lnf_b_ref[...])
        hf_ref[...] = hf.reshape(BG, T, D)


def fused_blocks_call(x, params, *, n_heads, mxu_dtype):
    B3, T, D = x.shape
    blk = params["blocks"]
    n_layers = blk["wqkv"].shape[0]

    groups = _pick_groups(B3)
    BG = B3 // groups

    def layer_spec(arr):            # (L, a, b) -> stream layer-l block (1, a, b)
        blk_shape = (1,) + arr.shape[1:]
        return pl.BlockSpec(blk_shape, lambda g, l: (l, 0, 0))

    def invariant_spec(arr):        # grid-invariant tiny operands (final-LN vecs)
        nd = arr.ndim
        return pl.BlockSpec(arr.shape, lambda g, l, _nd=nd: (0,) * _nd)

    layer_weights = (blk["ln1_g"], blk["ln1_b"], blk["wqkv"], blk["bqkv"],
                     blk["wo"], blk["bo"], blk["ln2_g"], blk["ln2_b"],
                     blk["w1"], blk["b1"], blk["w2"], blk["b2"])
    final_ln = (params["lnf_g"], params["lnf_b"])

    in_specs = [pl.BlockSpec((BG, T, D), lambda g, l: (g, 0, 0))]
    in_specs += [layer_spec(w) for w in layer_weights]
    in_specs += [invariant_spec(w) for w in final_ln]

    # VMEM budget: one layer's weights (double-buffered by the pipeline),
    # activation blocks in/out (double-buffered), f32 residual scratch, and the
    # in-kernel f32 temporaries (qkv + MLP hidden).
    per_layer_w_bytes = sum(int(w.size) * w.dtype.itemsize
                            for w in layer_weights) // n_layers
    act_bytes = BG * T * D * 4
    tmp_bytes = BG * T * (3 * D + 4 * D) * 4
    budget = 2 * per_layer_w_bytes + 5 * act_bytes + tmp_bytes

    kernel = functools.partial(fused_blocks_kernel, num_heads=n_heads,
                               mxu_dtype=mxu_dtype)

    return pl.pallas_call(
        kernel,
        out_shape=jax.ShapeDtypeStruct((B3, T, D), jnp.float32),
        grid=(groups, n_layers),
        in_specs=in_specs,
        out_specs=pl.BlockSpec((BG, T, D), lambda g, l: (g, 0, 0)),
        scratch_shapes=[pltpu.VMEM((BG * T, D), jnp.float32)],
        compiler_params=pltpu.CompilerParams(
            dimension_semantics=("parallel", "arbitrary"),
            vmem_limit_bytes=_vmem_limit_bytes(budget)),
    )(x, *layer_weights, *final_ln)


# ------------------------------ vocab head kernel ------------------------------


def head_kernel(hf_ref, wh_ref, bh_ref, o_ref, *, mxu_dtype):
    logits = jnp.dot(hf_ref[...].astype(mxu_dtype), wh_ref[...],
                     preferred_element_type=jnp.float32) + bh_ref[...]
    # Logits kept f32 for parity with the PyTorch head (feeds CrossEntropyLoss);
    # emit bf16 here to halve HBM writeback if bit-parity is not required.
    o_ref[...] = logits


def head_call(hf2, w_head, b_head, *, mxu_dtype):
    M, D = hf2.shape
    V = w_head.shape[1]
    tm = _pick_tile(M)
    tv = _pick_tile(V)

    budget = 2 * (D * tv * w_head.dtype.itemsize + tm * D * 4
                  + tm * tv * 4 + tv * 4)

    return pl.pallas_call(
        functools.partial(head_kernel, mxu_dtype=mxu_dtype),
        out_shape=jax.ShapeDtypeStruct((M, V), jnp.float32),
        grid=(M // tm, V // tv),
        in_specs=[pl.BlockSpec((tm, D), lambda m, v: (m, 0)),
                  pl.BlockSpec((D, tv), lambda m, v: (0, v)),
                  pl.BlockSpec((1, tv), lambda m, v: (0, v))],
        out_specs=pl.BlockSpec((tm, tv), lambda m, v: (m, v)),
        compiler_params=pltpu.CompilerParams(
            dimension_semantics=("parallel", "parallel"),
            vmem_limit_bytes=_vmem_limit_bytes(budget)),
    )(hf2, w_head, b_head)


# ------------------------------ model (glue + params) -------------------------


def init_params(key, *, vocab, d_model, n_heads, n_layers, max_seq,
                mxu_dtype=jnp.bfloat16):
    ks = jax.random.split(key, 8)
    std = 0.02

    def nrm(k, shape):
        return std * jax.random.normal(k, shape, jnp.float32)

    params = {
        "tok_emb": nrm(ks[0], (vocab, d_model)),
        "pos_emb": nrm(ks[1], (max_seq, d_model)),
        "plane_emb": nrm(ks[2], (3, d_model)),
        "lnf_g": jnp.ones((1, d_model), jnp.float32),
        "lnf_b": jnp.zeros((1, d_model), jnp.float32),
        "w_head": nrm(ks[3], (d_model, vocab)).astype(mxu_dtype),
        "b_head": jnp.zeros((1, vocab), jnp.float32),
        "blocks": {
            "ln1_g": jnp.ones((n_layers, 1, d_model), jnp.float32),
            "ln1_b": jnp.zeros((n_layers, 1, d_model), jnp.float32),
            "wqkv": nrm(ks[4], (n_layers, d_model, 3 * d_model)).astype(mxu_dtype),
            "bqkv": jnp.zeros((n_layers, 1, 3 * d_model), jnp.float32),
            "wo": nrm(ks[5], (n_layers, d_model, d_model)).astype(mxu_dtype),
            "bo": jnp.zeros((n_layers, 1, d_model), jnp.float32),
            "ln2_g": jnp.ones((n_layers, 1, d_model), jnp.float32),
            "ln2_b": jnp.zeros((n_layers, 1, d_model), jnp.float32),
            "w1": nrm(ks[6], (n_layers, d_model, 4 * d_model)).astype(mxu_dtype),
            "b1": jnp.zeros((n_layers, 1, 4 * d_model), jnp.float32),
            "w2": nrm(ks[7], (n_layers, 4 * d_model, d_model)).astype(mxu_dtype),
            "b2": jnp.zeros((n_layers, 1, d_model), jnp.float32),
        },
    }
    return params


def fast_transformer_single_forward(params, idx_xz, idx_xy, idx_yz, *,
                                    n_heads, mxu_dtype=jnp.bfloat16):
    """Equivalent of transformer_model_single(xz, xy, yz) -> logits (3B, T, vocab)."""
    B, T = idx_xz.shape
    D = params["tok_emb"].shape[1]
    V = params["w_head"].shape[1]

    idx = jnp.concatenate([idx_xz, idx_xy, idx_yz], axis=0)          # (3B, T)
    # token + positional + plane-type embeddings (glue: gathers in plain JAX)
    x = jnp.take(params["tok_emb"], idx, axis=0)                     # (3B, T, D)
    x = x + params["pos_emb"][:T][None, :, :]
    plane_ids = jnp.repeat(jnp.arange(3, dtype=jnp.int32), B)        # (3B,)
    x = x + jnp.take(params["plane_emb"], plane_ids, axis=0)[:, None, :]

    # fused kernel: all blocks + final LN with per-layer streamed weights
    hf = fused_blocks_call(x, params, n_heads=n_heads, mxu_dtype=mxu_dtype)
    # V-tiled vocab head
    logits = head_call(hf.reshape(3 * B * T, D), params["w_head"],
                       params["b_head"], mxu_dtype=mxu_dtype)
    return logits.reshape(3 * B, T, V)


# TODO(synk): the VQVAE stage-1 encoder/quantizer/decoder, checkpoint restore,
# Adam/CE-loss training utilities and the autoregressive top-k multinomial
# sampling loops are host-side / not part of the stage-2 transformer forward
# hot path and are omitted here.


# ------------------------------------ main ------------------------------------

if __name__ == "__main__":
    VOCAB = 512      # quantizer embedding_num
    D_MODEL = 128
    N_HEADS = 4
    N_LAYERS = 2
    SEQ = 8          # small test sequence length
    B = 2

    root = jax.random.PRNGKey(0)
    kp, kxz, kxy, kyz = jax.random.split(root, 4)

    params = init_params(kp, vocab=VOCAB, d_model=D_MODEL, n_heads=N_HEADS,
                         n_layers=N_LAYERS, max_seq=SEQ)

    idx_xz = jax.random.randint(kxz, (B, SEQ), 0, VOCAB, dtype=jnp.int32)
    idx_xy = jax.random.randint(kxy, (B, SEQ), 0, VOCAB, dtype=jnp.int32)
    idx_yz = jax.random.randint(kyz, (B, SEQ), 0, VOCAB, dtype=jnp.int32)

    logits = fast_transformer_single_forward(params, idx_xz, idx_xy, idx_yz,
                                             n_heads=N_HEADS)
    logits = jax.block_until_ready(logits)
    assert logits.shape == (3 * B, SEQ, VOCAB), logits.shape
    assert jnp.all(jnp.isfinite(logits))
    print("KERNEL_OK")
</pallas_src>

<mosaic_0001>
module attributes {stable_mosaic.version = 11 : i64} {
  func.func @fused_blocks_kernel(%arg0: i32, %arg1: i32, %arg2: memref<6x8x128xf32, #tpu.memory_space<vmem>>, %arg3: memref<1x1x128xf32, #tpu.memory_space<vmem>>, %arg4: memref<1x1x128xf32, #tpu.memory_space<vmem>>, %arg5: memref<1x128x384xbf16, #tpu.memory_space<vmem>>, %arg6: memref<1x1x384xf32, #tpu.memory_space<vmem>>, %arg7: memref<1x128x128xbf16, #tpu.memory_space<vmem>>, %arg8: memref<1x1x128xf32, #tpu.memory_space<vmem>>, %arg9: memref<1x1x128xf32, #tpu.memory_space<vmem>>, %arg10: memref<1x1x128xf32, #tpu.memory_space<vmem>>, %arg11: memref<1x128x512xbf16, #tpu.memory_space<vmem>>, %arg12: memref<1x1x512xf32, #tpu.memory_space<vmem>>, %arg13: memref<1x512x128xbf16, #tpu.memory_space<vmem>>, %arg14: memref<1x1x128xf32, #tpu.memory_space<vmem>>, %arg15: memref<1x128xf32, #tpu.memory_space<vmem>>, %arg16: memref<1x128xf32, #tpu.memory_space<vmem>>, %arg17: memref<6x8x128xf32, #tpu.memory_space<vmem>>, %arg18: memref<48x128xf32, #tpu.memory_space<vmem>>) attributes {dimension_semantics = [#tpu.dimension_semantics<parallel>, #tpu.dimension_semantics<arbitrary>], iteration_bounds = array<i64: 1, 2>, scalar_prefetch = 0 : i64, scratch_operands = 1 : i64, tpu.core_type = #tpu.core_type<tc>, window_params = [{transform_indices = @transform_0, window_bounds = array<i64: 6, 8, 128>}, {transform_indices = @transform_1, window_bounds = array<i64: 1, 1, 128>}, {transform_indices = @transform_2, window_bounds = array<i64: 1, 1, 128>}, {transform_indices = @transform_3, window_bounds = array<i64: 1, 128, 384>}, {transform_indices = @transform_4, window_bounds = array<i64: 1, 1, 384>}, {transform_indices = @transform_5, window_bounds = array<i64: 1, 128, 128>}, {transform_indices = @transform_6, window_bounds = array<i64: 1, 1, 128>}, {transform_indices = @transform_7, window_bounds = array<i64: 1, 1, 128>}, {transform_indices = @transform_8, window_bounds = array<i64: 1, 1, 128>}, {transform_indices = @transform_9, window_bounds = array<i64: 1, 128, 512>}, {transform_indices = @transform_10, window_bounds = array<i64: 1, 1, 512>}, {transform_indices = @transform_11, window_bounds = array<i64: 1, 512, 128>}, {transform_indices = @transform_12, window_bounds = array<i64: 1, 1, 128>}, {pipeline_mode = #tpu.pipeline_mode<synchronous>, transform_indices = @transform_13, window_bounds = array<i64: 1, 128>}, {pipeline_mode = #tpu.pipeline_mode<synchronous>, transform_indices = @transform_14, window_bounds = array<i64: 1, 128>}, {transform_indices = @transform_15, window_bounds = array<i64: 6, 8, 128>}]} {
    %c0_i32 = arith.constant 0 : i32
    %0 = arith.cmpi eq, %arg1, %c0_i32 : i32
    %1 = arith.extui %0 : i1 to i32
    %c0_i32_0 = arith.constant 0 : i32
    %2 = arith.cmpi ne, %1, %c0_i32_0 : i32
    scf.if %2 {
      %c0_65 = arith.constant 0 : index
      %c0_66 = arith.constant 0 : index
      %c0_67 = arith.constant 0 : index
      %149 = vector.load %arg2[%c0_65, %c0_66, %c0_67] : memref<6x8x128xf32, #tpu.memory_space<vmem>>, vector<6x8x128xf32>
      %150 = vector.shape_cast %149 : vector<6x8x128xf32> to vector<48x128xf32>
      %c0_68 = arith.constant 0 : index
      %c0_69 = arith.constant 0 : index
      %151 = vector.load %arg18[%c0_68, %c0_69] : memref<48x128xf32, #tpu.memory_space<vmem>>, vector<48x128xf32>
      tpu.vector_store %arg18[%c0_68, %c0_69], %150 {strides = array<i32>} : memref<48x128xf32, #tpu.memory_space<vmem>>, vector<48x128xf32>,
    } else {
    }
    %3 = tpu.iota {dimensions = array<i32: 0>} : vector<8x8xi32>
    %4 = tpu.iota {dimensions = array<i32: 1>} : vector<8x8xi32>
    %5 = arith.cmpi sle, %4, %3 : vector<8x8xi32>
    %cst = arith.constant 0.000000e+00 : f32
    %cst_1 = arith.constant -1.000000e+30 : f32
    %6 = vector.broadcast %cst : f32 to vector<8x8xf32>
    %7 = vector.broadcast %cst_1 : f32 to vector<8x8xf32>
    %8 = arith.select %5, %6, %7 : vector<8x8xi1>, vector<8x8xf32>
    %c0 = arith.constant 0 : index
    %c0_2 = arith.constant 0 : index
    %9 = vector.load %arg18[%c0, %c0_2] : memref<48x128xf32, #tpu.memory_space<vmem>>, vector<48x128xf32>
    %c0_3 = arith.constant 0 : index
    %c0_4 = arith.constant 0 : index
    %c0_5 = arith.constant 0 : index
    %10 = vector.load %arg3[%c0_3, %c0_4, %c0_5] : memref<1x1x128xf32, #tpu.memory_space<vmem>>, vector<1x1x128xf32>
    %11 = vector.shape_cast %10 : vector<1x1x128xf32> to vector<1x128xf32>
    %c0_6 = arith.constant 0 : index
    %c0_7 = arith.constant 0 : index
    %c0_8 = arith.constant 0 : index
    %12 = vector.load %arg4[%c0_6, %c0_7, %c0_8] : memref<1x1x128xf32, #tpu.memory_space<vmem>>, vector<1x1x128xf32>
    %13 = vector.shape_cast %12 : vector<1x1x128xf32> to vector<1x128xf32>
    %cst_9 = arith.constant dense<0.000000e+00> : vector<48xf32>
    %14 = vector.multi_reduction <add>, %9, %cst_9 [1] : vector<48x128xf32> to vector<48xf32>
    %15 = vector.shape_cast %14 : vector<48xf32> to vector<48x1xf32>
    %cst_10 = arith.constant 1.280000e+02 : f32
    %16 = vector.broadcast %cst_10 : f32 to vector<48x1xf32>
    %17 = arith.divf %15, %16 : vector<48x1xf32>
    %18 = vector.broadcast %17 : vector<48x1xf32> to vector<48x128xf32>
    %19 = arith.subf %9, %18 : vector<48x128xf32>
    %20 = arith.mulf %19, %19 : vector<48x128xf32>
    %cst_11 = arith.constant dense<0.000000e+00> : vector<48xf32>
    %21 = vector.multi_reduction <add>, %20, %cst_11 [1] : vector<48x128xf32> to vector<48xf32>
    %22 = vector.shape_cast %21 : vector<48xf32> to vector<48x1xf32>
    %cst_12 = arith.constant 1.280000e+02 : f32
    %23 = vector.broadcast %cst_12 : f32 to vector<48x1xf32>
    %24 = arith.divf %22, %23 : vector<48x1xf32>
    %25 = vector.broadcast %17 : vector<48x1xf32> to vector<48x128xf32>
    %26 = arith.subf %9, %25 : vector<48x128xf32>
    %cst_13 = arith.constant 9.99999974E-6 : f32
    %27 = vector.broadcast %cst_13 : f32 to vector<48x1xf32>
    %28 = arith.addf %24, %27 : vector<48x1xf32>
    %29 = math.rsqrt %28 : vector<48x1xf32>
    %30 = vector.broadcast %29 : vector<48x1xf32> to vector<48x128xf32>
    %31 = arith.mulf %26, %30 : vector<48x128xf32>
    %32 = vector.broadcast %11 : vector<1x128xf32> to vector<48x128xf32>
    %33 = arith.mulf %31, %32 : vector<48x128xf32>
    %34 = vector.broadcast %13 : vector<1x128xf32> to vector<48x128xf32>
    %35 = arith.addf %33, %34 : vector<48x128xf32>
    %36 = arith.truncf %35 : vector<48x128xf32> to vector<48x128xbf16>
    %c0_14 = arith.constant 0 : index
    %c0_15 = arith.constant 0 : index
    %c0_16 = arith.constant 0 : index
    %37 = vector.load %arg5[%c0_14, %c0_15, %c0_16] : memref<1x128x384xbf16, #tpu.memory_space<vmem>>, vector<1x128x384xbf16>
    %38 = vector.shape_cast %37 : vector<1x128x384xbf16> to vector<128x384xbf16>
    %cst_17 = arith.constant dense<0.000000e+00> : vector<48x384xf32>
    %39 = tpu.matmul %36, %38, %cst_17 {dimension_numbers = #tpu.dot_dimension_numbers<[1], [0], [0], [1], [0, 0, 1, 1], [], []>} : vector<48x128xbf16>, vector<128x384xbf16>, vector<48x384xf32> -> vector<48x384xf32>
    %c0_18 = arith.constant 0 : index
    %c0_19 = arith.constant 0 : index
    %c0_20 = arith.constant 0 : index
    %40 = vector.load %arg6[%c0_18, %c0_19, %c0_20] : memref<1x1x384xf32, #tpu.memory_space<vmem>>, vector<1x1x384xf32>
    %41 = vector.shape_cast %40 : vector<1x1x384xf32> to vector<1x384xf32>
    %42 = vector.broadcast %41 : vector<1x384xf32> to vector<48x384xf32>
    %43 = arith.addf %39, %42 : vector<48x384xf32>
    %44 = vector.extract_strided_slice %43 {offsets = [0, 0], sizes = [48, 128], strides = [1, 1]} : vector<48x384xf32> to vector<48x128xf32>
    %45 = vector.shape_cast %44 : vector<48x128xf32> to vector<6x8x4x32xf32>
    %46 = tpu.transpose %45, [0, 2, 1, 3] : vector<6x8x4x32xf32> -> vector<6x4x8x32xf32>
    %47 = vector.shape_cast %46 : vector<6x4x8x32xf32> to vector<24x8x32xf32>
    %48 = arith.truncf %47 : vector<24x8x32xf32> to vector<24x8x32xbf16>
    %49 = vector.extract_strided_slice %43 {offsets = [0, 128], sizes = [48, 128], strides = [1, 1]} : vector<48x384xf32> to vector<48x128xf32>
    %50 = vector.shape_cast %49 : vector<48x128xf32> to vector<6x8x4x32xf32>
    %51 = tpu.transpose %50, [0, 2, 1, 3] : vector<6x8x4x32xf32> -> vector<6x4x8x32xf32>
    %52 = vector.shape_cast %51 : vector<6x4x8x32xf32> to vector<24x8x32xf32>
    %53 = arith.truncf %52 : vector<24x8x32xf32> to vector<24x8x32xbf16>
    %54 = vector.extract_strided_slice %43 {offsets = [0, 256], sizes = [48, 128], strides = [1, 1]} : vector<48x384xf32> to vector<48x128xf32>
    %55 = vector.shape_cast %54 : vector<48x128xf32> to vector<6x8x4x32xf32>
    %56 = tpu.transpose %55, [0, 2, 1, 3] : vector<6x8x4x32xf32> -> vector<6x4x8x32xf32>
    %57 = vector.shape_cast %56 : vector<6x4x8x32xf32> to vector<24x8x32xf32>
    %58 = arith.truncf %57 : vector<24x8x32xf32> to vector<24x8x32xbf16>
    "tpu.trace_start"() <{level = 10 : i32, message = "bqd,bkd->bqk"}> : () -> ()
    %cst_21 = arith.constant dense<0.000000e+00> : vector<24x8x8xf32>
    %59 = tpu.matmul %48, %53, %cst_21 {dimension_numbers = #tpu.dot_dimension_numbers<[2], [2], [1], [1], [0, 0, 0, 1, 1, 1], [0], [0]>} : vector<24x8x32xbf16>, vector<24x8x32xbf16>, vector<24x8x8xf32> -> vector<24x8x8xf32>
    "tpu.trace_stop"() : () -> ()
    %cst_22 = arith.constant 0.176776692 : f32
    %60 = vector.broadcast %cst_22 : f32 to vector<24x8x8xf32>
    %61 = arith.mulf %59, %60 : vector<24x8x8xf32>
    %62 = vector.shape_cast %8 : vector<8x8xf32> to vector<1x8x8xf32>
    %63 = vector.broadcast %62 : vector<1x8x8xf32> to vector<24x8x8xf32>
    %64 = arith.addf %61, %63 : vector<24x8x8xf32>
    %cst_23 = arith.constant dense<0xFF800000> : vector<24x8xf32>
    %65 = vector.multi_reduction <maximumf>, %64, %cst_23 [2] : vector<24x8x8xf32> to vector<24x8xf32>
    %66 = vector.shape_cast %65 : vector<24x8xf32> to vector<24x8x1xf32>
    %67 = vector.broadcast %66 : vector<24x8x1xf32> to vector<24x8x8xf32>
    %68 = arith.subf %64, %67 : vector<24x8x8xf32>
    %69 = math.exp %68 : vector<24x8x8xf32>
    %cst_24 = arith.constant dense<0.000000e+00> : vector<24x8xf32>
    %70 = vector.multi_reduction <add>, %69, %cst_24 [2] : vector<24x8x8xf32> to vector<24x8xf32>
    %71 = vector.shape_cast %70 : vector<24x8xf32> to vector<24x8x1xf32>
    %72 = tpu.reciprocal %71 {approx = true} : vector<24x8x1xf32> -> vector<24x8x1xf32>
    %73 = vector.broadcast %72 : vector<24x8x1xf32> to vector<24x8x8xf32>
    %74 = arith.mulf %69, %73 : vector<24x8x8xf32>
    %75 = arith.truncf %74 : vector<24x8x8xf32> to vector<24x8x8xbf16>
    "tpu.trace_start"() <{level = 10 : i32, message = "bqk,bkd->bqd"}> : () -> ()
    %cst_25 = arith.constant dense<0.000000e+00> : vector<24x8x32xf32>
    %76 = tpu.matmul %75, %58, %cst_25 {dimension_numbers = #tpu.dot_dimension_numbers<[2], [1], [1], [2], [0, 0, 0, 1, 1, 2], [0], [0]>} : vector<24x8x8xbf16>, vector<24x8x32xbf16>, vector<24x8x32xf32> -> vector<24x8x32xf32>
    "tpu.trace_stop"() : () -> ()
    %77 = vector.shape_cast %76 : vector<24x8x32xf32> to vector<6x4x8x32xf32>
    %78 = tpu.transpose %77, [0, 2, 1, 3] : vector<6x4x8x32xf32> -> vector<6x8x4x32xf32>
    %79 = vector.shape_cast %78 : vector<6x8x4x32xf32> to vector<48x128xf32>
    %80 = arith.truncf %79 : vector<48x128xf32> to vector<48x128xbf16>
    %c0_26 = arith.constant 0 : index
    %c0_27 = arith.constant 0 : index
    %c0_28 = arith.constant 0 : index
    %81 = vector.load %arg7[%c0_26, %c0_27, %c0_28] : memref<1x128x128xbf16, #tpu.memory_space<vmem>>, vector<1x128x128xbf16>
    %82 = vector.shape_cast %81 : vector<1x128x128xbf16> to vector<128x128xbf16>
    %cst_29 = arith.constant dense<0.000000e+00> : vector<48x128xf32>
    %83 = tpu.matmul %80, %82, %cst_29 {dimension_numbers = #tpu.dot_dimension_numbers<[1], [0], [0], [1], [0, 0, 1, 1], [], []>} : vector<48x128xbf16>, vector<128x128xbf16>, vector<48x128xf32> -> vector<48x128xf32>
    %c0_30 = arith.constant 0 : index
    %c0_31 = arith.constant 0 : index
    %c0_32 = arith.constant 0 : index
    %84 = vector.load %arg8[%c0_30, %c0_31, %c0_32] : memref<1x1x128xf32, #tpu.memory_space<vmem>>, vector<1x1x128xf32>
    %85 = vector.shape_cast %84 : vector<1x1x128xf32> to vector<1x128xf32>
    %86 = vector.broadcast %85 : vector<1x128xf32> to vector<48x128xf32>
    %87 = arith.addf %83, %86 : vector<48x128xf32>
    %88 = arith.addf %9, %87 : vector<48x128xf32>
    %c0_33 = arith.constant 0 : index
    %c0_34 = arith.constant 0 : index
    %c0_35 = arith.constant 0 : index
    %89 = vector.load %arg9[%c0_33, %c0_34, %c0_35] : memref<1x1x128xf32, #tpu.memory_space<vmem>>, vector<1x1x128xf32>
    %90 = vector.shape_cast %89 : vector<1x1x128xf32> to vector<1x128xf32>
    %c0_36 = arith.constant 0 : index
    %c0_37 = arith.constant 0 : index
    %c0_38 = arith.constant 0 : index
    %91 = vector.load %arg10[%c0_36, %c0_37, %c0_38] : memref<1x1x128xf32, #tpu.memory_space<vmem>>, vector<1x1x128xf32>
    %92 = vector.shape_cast %91 : vector<1x1x128xf32> to vector<1x128xf32>
    %cst_39 = arith.constant dense<0.000000e+00> : vector<48xf32>
    %93 = vector.multi_reduction <add>, %88, %cst_39 [1] : vector<48x128xf32> to vector<48xf32>
    %94 = vector.shape_cast %93 : vector<48xf32> to vector<48x1xf32>
    %cst_40 = arith.constant 1.280000e+02 : f32
    %95 = vector.broadcast %cst_40 : f32 to vector<48x1xf32>
    %96 = arith.divf %94, %95 : vector<48x1xf32>
    %97 = vector.broadcast %96 : vector<48x1xf32> to vector<48x128xf32>
    %98 = arith.subf %88, %97 : vector<48x128xf32>
    %99 = arith.mulf %98, %98 : vector<48x128xf32>
    %cst_41 = arith.constant dense<0.000000e+00> : vector<48xf32>
    %100 = vector.multi_reduction <add>, %99, %cst_41 [1] : vector<48x128xf32> to vector<48xf32>
    %101 = vector.shape_cast %100 : vector<48xf32> to vector<48x1xf32>
    %cst_42 = arith.constant 1.280000e+02 : f32
    %102 = vector.broadcast %cst_42 : f32 to vector<48x1xf32>
    %103 = arith.divf %101, %102 : vector<48x1xf32>
    %104 = vector.broadcast %96 : vector<48x1xf32> to vector<48x128xf32>
    %105 = arith.subf %88, %104 : vector<48x128xf32>
    %cst_43 = arith.constant 9.99999974E-6 : f32
    %106 = vector.broadcast %cst_43 : f32 to vector<48x1xf32>
    %107 = arith.addf %103, %106 : vector<48x1xf32>
    %108 = math.rsqrt %107 : vector<48x1xf32>
    %109 = vector.broadcast %108 : vector<48x1xf32> to vector<48x128xf32>
    %110 = arith.mulf %105, %109 : vector<48x128xf32>
    %111 = vector.broadcast %90 : vector<1x128xf32> to vector<48x128xf32>
    %112 = arith.mulf %110, %111 : vector<48x128xf32>
    %113 = vector.broadcast %92 : vector<1x128xf32> to vector<48x128xf32>
    %114 = arith.addf %112, %113 : vector<48x128xf32>
    %115 = arith.truncf %114 : vector<48x128xf32> to vector<48x128xbf16>
    %c0_44 = arith.constant 0 : index
    %c0_45 = arith.constant 0 : index
    %c0_46 = arith.constant 0 : index
    %116 = vector.load %arg11[%c0_44, %c0_45, %c0_46] : memref<1x128x512xbf16, #tpu.memory_space<vmem>>, vector<1x128x512xbf16>
    %117 = vector.shape_cast %116 : vector<1x128x512xbf16> to vector<128x512xbf16>
    %cst_47 = arith.constant dense<0.000000e+00> : vector<48x512xf32>
    %118 = tpu.matmul %115, %117, %cst_47 {dimension_numbers = #tpu.dot_dimension_numbers<[1], [0], [0], [1], [0, 0, 1, 1], [], []>} : vector<48x128xbf16>, vector<128x512xbf16>, vector<48x512xf32> -> vector<48x512xf32>
    %c0_48 = arith.constant 0 : index
    %c0_49 = arith.constant 0 : index
    %c0_50 = arith.constant 0 : index
    %119 = vector.load %arg12[%c0_48, %c0_49, %c0_50] : memref<1x1x512xf32, #tpu.memory_space<vmem>>, vector<1x1x512xf32>
    %120 = vector.shape_cast %119 : vector<1x1x512xf32> to vector<1x512xf32>
    %121 = vector.broadcast %120 : vector<1x512xf32> to vector<48x512xf32>
    %122 = arith.addf %118, %121 : vector<48x512xf32>
    %123 = arith.mulf %122, %122 : vector<48x512xf32>
    %124 = arith.mulf %122, %123 : vector<48x512xf32>
    %cst_51 = arith.constant 4.471500e-02 : f32
    %125 = vector.broadcast %cst_51 : f32 to vector<48x512xf32>
    %126 = arith.mulf %125, %124 : vector<48x512xf32>
    %127 = arith.addf %122, %126 : vector<48x512xf32>
    %cst_52 = arith.constant 0.797884583 : f32
    %128 = vector.broadcast %cst_52 : f32 to vector<48x512xf32>
    %129 = arith.mulf %128, %127 : vector<48x512xf32>
    %130 = math.tanh %129 : vector<48x512xf32>
    %cst_53 = arith.constant 1.000000e+00 : f32
    %131 = vector.broadcast %cst_53 : f32 to vector<48x512xf32>
    %132 = arith.addf %131, %130 : vector<48x512xf32>
    %cst_54 = arith.constant 5.000000e-01 : f32
    %133 = vector.broadcast %cst_54 : f32 to vector<48x512xf32>
    %134 = arith.mulf %133, %132 : vector<48x512xf32>
    %135 = arith.mulf %122, %134 : vector<48x512xf32>
    %136 = arith.truncf %135 : vector<48x512xf32> to vector<48x512xbf16>
    %c0_55 = arith.constant 0 : index
    %c0_56 = arith.constant 0 : index
    %c0_57 = arith.constant 0 : index
    %137 = vector.load %arg13[%c0_55, %c0_56, %c0_57] : memref<1x512x128xbf16, #tpu.memory_space<vmem>>, vector<1x512x128xbf16>
    %138 = vector.shape_cast %137 : vector<1x512x128xbf16> to vector<512x128xbf16>
    %cst_58 = arith.constant dense<0.000000e+00> : vector<48x128xf32>
    %139 = tpu.matmul %136, %138, %cst_58 {dimension_numbers = #tpu.dot_dimension_numbers<[1], [0], [0], [1], [0, 0, 1, 1], [], []>} : vector<48x512xbf16>, vector<512x128xbf16>, vector<48x128xf32> -> vector<48x128xf32>
    %c0_59 = arith.constant 0 : index
    %c0_60 = arith.constant 0 : index
    %c0_61 = arith.constant 0 : index
    %140 = vector.load %arg14[%c0_59, %c0_60, %c0_61] : memref<1x1x128xf32, #tpu.memory_space<vmem>>, vector<1x1x128xf32>
    %141 = vector.shape_cast %140 : vector<1x1x128xf32> to vector<1x128xf32>
    %142 = vector.broadcast %141 : vector<1x128xf32> to vector<48x128xf32>
    %143 = arith.addf %139, %142 : vector<48x128xf32>
    %144 = arith.addf %88, %143 : vector<48x128xf32>
    %c0_62 = arith.constant 0 : index
    %c0_63 = arith.constant 0 : index
    %145 = vector.load %arg18[%c0_62, %c0_63] : memref<48x128xf32, #tpu.memory_space<vmem>>, vector<48x128xf32>
    tpu.vector_store %arg18[%c0_62, %c0_63], %144 {strides = array<i32>} : memref<48x128xf32, #tpu.memory_space<vmem>>, vector<48x128xf32>,
    %c1_i32 = arith.constant 1 : i32
    %146 = arith.cmpi eq, %arg1, %c1_i32 : i32
    %147 = arith.extui %146 : i1 to i32
    %c0_i32_64 = arith.constant 0 : i32
    %148 = arith.cmpi ne, %147, %c0_i32_64 : i32
    scf.if %148 {
      %c0_65 = arith.constant 0 : index
      %c0_66 = arith.constant 0 : index
      %149 = vector.load %arg15[%c0_65, %c0_66] : memref<1x128xf32, #tpu.memory_space<vmem>>, vector<1x128xf32>
      %c0_67 = arith.constant 0 : index
      %c0_68 = arith.constant 0 : index
      %150 = vector.load %arg16[%c0_67, %c0_68] : memref<1x128xf32, #tpu.memory_space<vmem>>, vector<1x128xf32>
      %cst_69 = arith.constant dense<0.000000e+00> : vector<48xf32>
      %151 = vector.multi_reduction <add>, %144, %cst_69 [1] : vector<48x128xf32> to vector<48xf32>
      %152 = vector.shape_cast %151 : vector<48xf32> to vector<48x1xf32>
      %cst_70 = arith.constant 1.280000e+02 : f32
      %153 = vector.broadcast %cst_70 : f32 to vector<48x1xf32>
      %154 = arith.divf %152, %153 : vector<48x1xf32>
      %155 = vector.broadcast %154 : vector<48x1xf32> to vector<48x128xf32>
      %156 = arith.subf %144, %155 : vector<48x128xf32>
      %157 = arith.mulf %156, %156 : vector<48x128xf32>
      %cst_71 = arith.constant dense<0.000000e+00> : vector<48xf32>
      %158 = vector.multi_reduction <add>, %157, %cst_71 [1] : vector<48x128xf32> to vector<48xf32>
      %159 = vector.shape_cast %158 : vector<48xf32> to vector<48x1xf32>
      %cst_72 = arith.constant 1.280000e+02 : f32
      %160 = vector.broadcast %cst_72 : f32 to vector<48x1xf32>
      %161 = arith.divf %159, %160 : vector<48x1xf32>
      %162 = vector.broadcast %154 : vector<48x1xf32> to vector<48x128xf32>
      %163 = arith.subf %144, %162 : vector<48x128xf32>
      %cst_73 = arith.constant 9.99999974E-6 : f32
      %164 = vector.broadcast %cst_73 : f32 to vector<48x1xf32>
      %165 = arith.addf %161, %164 : vector<48x1xf32>
      %166 = math.rsqrt %165 : vector<48x1xf32>
      %167 = vector.broadcast %166 : vector<48x1xf32> to vector<48x128xf32>
      %168 = arith.mulf %163, %167 : vector<48x128xf32>
      %169 = vector.broadcast %149 : vector<1x128xf32> to vector<48x128xf32>
      %170 = arith.mulf %168, %169 : vector<48x128xf32>
      %171 = vector.broadcast %150 : vector<1x128xf32> to vector<48x128xf32>
      %172 = arith.addf %170, %171 : vector<48x128xf32>
      %173 = vector.shape_cast %172 : vector<48x128xf32> to vector<6x8x128xf32>
      %c0_74 = arith.constant 0 : index
      %c0_75 = arith.constant 0 : index
      %c0_76 = arith.constant 0 : index
      %174 = vector.load %arg17[%c0_74, %c0_75, %c0_76] : memref<6x8x128xf32, #tpu.memory_space<vmem>>, vector<6x8x128xf32>
      tpu.vector_store %arg17[%c0_74, %c0_75, %c0_76], %173 {strides = array<i32>} : memref<6x8x128xf32, #tpu.memory_space<vmem>>, vector<6x8x128xf32>,
    } else {
    }
    return
  }
  func.func @transform_0(%arg0: i32, %arg1: i32) -> (i32, i32, i32) {
    %c0_i32 = arith.constant 0 : i32
    %c0_i32_0 = arith.constant 0 : i32
    %c0_i32_1 = arith.constant 0 : i32
    return %arg0, %c0_i32, %c0_i32_0 : i32, i32, i32
  }
  func.func @transform_1(%arg0: i32, %arg1: i32) -> (i32, i32, i32) {
    %c0_i32 = arith.constant 0 : i32
    %c0_i32_0 = arith.constant 0 : i32
    %c0_i32_1 = arith.constant 0 : i32
    return %arg1, %c0_i32, %c0_i32_0 : i32, i32, i32
  }
  func.func @transform_2(%arg0: i32, %arg1: i32) -> (i32, i32, i32) {
    %c0_i32 = arith.constant 0 : i32
    %c0_i32_0 = arith.constant 0 : i32
    %c0_i32_1 = arith.constant 0 : i32
    return %arg1, %c0_i32, %c0_i32_0 : i32, i32, i32
  }
  func.func @transform_3(%arg0: i32, %arg1: i32) -> (i32, i32, i32) {
    %c0_i32 = arith.constant 0 : i32
    %c0_i32_0 = arith.constant 0 : i32
    %c0_i32_1 = arith.constant 0 : i32
    return %arg1, %c0_i32, %c0_i32_0 : i32, i32, i32
  }
  func.func @transform_4(%arg0: i32, %arg1: i32) -> (i32, i32, i32) {
    %c0_i32 = arith.constant 0 : i32
    %c0_i32_0 = arith.constant 0 : i32
    %c0_i32_1 = arith.constant 0 : i32
    return %arg1, %c0_i32, %c0_i32_0 : i32, i32, i32
  }
  func.func @transform_5(%arg0: i32, %arg1: i32) -> (i32, i32, i32) {
    %c0_i32 = arith.constant 0 : i32
    %c0_i32_0 = arith.constant 0 : i32
    %c0_i32_1 = arith.constant 0 : i32
    return %arg1, %c0_i32, %c0_i32_0 : i32, i32, i32
  }
  func.func @transform_6(%arg0: i32, %arg1: i32) -> (i32, i32, i32) {
    %c0_i32 = arith.constant 0 : i32
    %c0_i32_0 = arith.constant 0 : i32
    %c0_i32_1 = arith.constant 0 : i32
    return %arg1, %c0_i32, %c0_i32_0 : i32, i32, i32
  }
  func.func @transform_7(%arg0: i32, %arg1: i32) -> (i32, i32, i32) {
    %c0_i32 = arith.constant 0 : i32
    %c0_i32_0 = arith.constant 0 : i32
    %c0_i32_1 = arith.constant 0 : i32
    return %arg1, %c0_i32, %c0_i32_0 : i32, i32, i32
  }
  func.func @transform_8(%arg0: i32, %arg1: i32) -> (i32, i32, i32) {
    %c0_i32 = arith.constant 0 : i32
    %c0_i32_0 = arith.constant 0 : i32
    %c0_i32_1 = arith.constant 0 : i32
    return %arg1, %c0_i32, %c0_i32_0 : i32, i32, i32
  }
  func.func @transform_9(%arg0: i32, %arg1: i32) -> (i32, i32, i32) {
    %c0_i32 = arith.constant 0 : i32
    %c0_i32_0 = arith.constant 0 : i32
    %c0_i32_1 = arith.constant 0 : i32
    return %arg1, %c0_i32, %c0_i32_0 : i32, i32, i32
  }
  func.func @transform_10(%arg0: i32, %arg1: i32) -> (i32, i32, i32) {
    %c0_i32 = arith.constant 0 : i32
    %c0_i32_0 = arith.constant 0 : i32
    %c0_i32_1 = arith.constant 0 : i32
    return %arg1, %c0_i32, %c0_i32_0 : i32, i32, i32
  }
  func.func @transform_11(%arg0: i32, %arg1: i32) -> (i32, i32, i32) {
    %c0_i32 = arith.constant 0 : i32
    %c0_i32_0 = arith.constant 0 : i32
    %c0_i32_1 = arith.constant 0 : i32
    return %arg1, %c0_i32, %c0_i32_0 : i32, i32, i32
  }
  func.func @transform_12(%arg0: i32, %arg1: i32) -> (i32, i32, i32) {
    %c0_i32 = arith.constant 0 : i32
    %c0_i32_0 = arith.constant 0 : i32
    %c0_i32_1 = arith.constant 0 : i32
    return %arg1, %c0_i32, %c0_i32_0 : i32, i32, i32
  }
  func.func @transform_13(%arg0: i32, %arg1: i32) -> (i32, i32) {
    %c0_i32 = arith.constant 0 : i32
    %c0_i32_0 = arith.constant 0 : i32
    %c0_i32_1 = arith.constant 0 : i32
    return %c0_i32, %c0_i32_0 : i32, i32
  }
  func.func @transform_14(%arg0: i32, %arg1: i32) -> (i32, i32) {
    %c0_i32 = arith.constant 0 : i32
    %c0_i32_0 = arith.constant 0 : i32
    %c0_i32_1 = arith.constant 0 : i32
    return %c0_i32, %c0_i32_0 : i32, i32
  }
  func.func @transform_15(%arg0: i32, %arg1: i32) -> (i32, i32, i32) {
    %c0_i32 = arith.constant 0 : i32
    %c0_i32_0 = arith.constant 0 : i32
    %c0_i32_1 = arith.constant 0 : i32
    return %arg0, %c0_i32, %c0_i32_0 : i32, i32, i32
  }
}

</mosaic_0001>

<bundles_post_ra>
// kernel: tpu_custom_call.1
= control target key start
LH: loop header
LB: loop body
LE: loop exit
PB: predicated region body
PF: predicated region fallthrough
CT: control target
= control target key end

     0   :  { %s13262_s0 = inlined_call_operand.hbm [shape: f32[6,8,128], index: 0, kind: input, shape index: {}]   ;;  %s13263_s1 = inlined_call_operand.hbm [shape: f32[2,1,128], index: 1, kind: input, shape index: {}]   ;;  %s13264_s2 = inlined_call_operand.hbm [shape: f32[2,1,128], index: 2, kind: input, shape index: {}]   ;;  %s13265_s3 = inlined_call_operand.hbm [shape: bf16[2,128,384], index: 3, kind: input, shape index: {}]   ;;  %s13266_s4 = inlined_call_operand.vmem [shape: f32[2,1,384], index: 4, kind: input, shape index: {}]   ;;  %s13267_s5 = inlined_call_operand.hbm [shape: bf16[2,128,128], index: 5, kind: input, shape index: {}]   ;;  %s13268_s6 = inlined_call_operand.vmem [shape: f32[2,1,128], index: 6, kind: input, shape index: {}]   ;;  %s13269_s7 = inlined_call_operand.vmem [shape: f32[2,1,128], index: 7, kind: input, shape index: {}]   ;;  %s13270_s8 = inlined_call_operand.vmem [shape: f32[2,1,128], index: 8, kind: input, shape index: {}]   ;;  %s13271_s9 = inlined_call_operand.hbm [shape: bf16[2,128,512], index: 9, kind: input, shape index: {}]   ;;  %s13272_s10 = inlined_call_operand.vmem [shape: f32[2,1,512], index: 10, kind: input, shape index: {}]   ;;  %s13273_s11 = inlined_call_operand.hbm [shape: bf16[2,512,128], index: 11, kind: input, shape index: {}]   ;;  %s13274_s12 = inlined_call_operand.vmem [shape: f32[2,1,128], index: 12, kind: input, shape index: {}]   ;;  %s13275_s13 = inlined_call_operand.vmem [shape: f32[1,128], index: 13, kind: input, shape index: {}]   ;;  %s13276_s14 = inlined_call_operand.vmem [shape: f32[1,128], index: 14, kind: input, shape index: {}]   ;;  %s13277_s15 = inlined_call_operand.hbm [shape: f32[6,8,128], index: 15, kind: output, shape index: {}]  }
   0x1   :  { %13301 = sst [smem:[#allocation26_spill]] %s13262_s0 }
   0x2   :  { %13302 = sst [smem:[#allocation27_spill]] %s13263_s1 }
   0x3   :  { %13303 = sst [smem:[#allocation28_spill]] %s13264_s2 }
   0x4   :  { %13304 = sst [smem:[#allocation29_spill]] %s13265_s3 }
   0x5   :  { %13305 = sst [smem:[#allocation30_spill]] %s13266_s4 }
   0x6   :  { %13306 = sst [smem:[#allocation31_spill]] %s13267_s5 }
   0x7   :  { %13307 = sst [smem:[#allocation32_spill]] %s13269_s7 }
   0x8   :  { %13308 = sst [smem:[#allocation33_spill]] %s13270_s8 }
   0x9   :  { %13309 = sst [smem:[#allocation34_spill]] %s13271_s9 }
   0xa   :  { %13310 = sst [smem:[#allocation35_spill]] %s13272_s10 }
   0xb   :  { %13311 = sst [smem:[#allocation36_spill]] %s13273_s11 }
   0xc   :  { %13312 = sst [smem:[#allocation37_spill]] %s13274_s12 }
   0xd   :  { %13313 = sst [smem:[#allocation38_spill]] %s13275_s13 }
   0xe   :  { %13314 = sst [smem:[#allocation39_spill]] %s13276_s14 }
   0xf   :  { %13315 = sst [smem:[#allocation40_spill]] %s13277_s15 }
  0x10   :  { %20 = vsyncpa [#allocation4], 0 }
  0x11   :  { %21 = vsyncpa [#allocation7], 0 }
  0x12   :  { %23 = vsyncpa [#allocation7 + $0x1], 0 }
  0x13   :  { %24 = vsyncpa [#allocation10], 0 }
  0x14   :  { %26 = vsyncpa [#allocation10 + $0x1], 0 }
  0x15   :  { %27 = vsyncpa [#allocation13], 0 }
  0x16   :  { %29 = vsyncpa [#allocation13 + $0x1], 0 }
  0x17   :  { %30 = vsyncpa [#allocation5], 0  ;;  %s10569_s18 = smov 0   ;;  %s10571_s19 = smov 0  }
  0x18   :  { %s10573_s20 = smov 0   ;;  %s10575_s21 = smov 0  }
  0x19   :  { %s10577_s22 = smov 0   ;;  %s10579_s23 = smov 0  }
  0x1a LB: > { %13316 = sst [smem:[#allocation21_spill]] %s10448_s20  ;;  %s45_s24 = sadd.s32 1, %s10456_s22  ;;  %s10460_s23 = sphi %s10579_s23, %s36_s23   ;;  %s10456_s22 = sphi %s10577_s22, %s13375_s22   ;;  %s10452_s21 = sphi %s10575_s21, %s13374_s21   ;;  %s10448_s20 = sphi %s10573_s20, %s13373_s20   ;;  %s10444_s19 = sphi %s10571_s19, %s13377_s19   ;;  %s10440_s18 = sphi %s10569_s18, %s13376_s18  }
  0x1b   : > { %13317 = sst [smem:[#allocation22_spill]] %s10456_s22  ;;  %s81_s25 = sadd.s32 1, %s10448_s20 }
  0x1c   : > { %13318 = sst [smem:[#allocation23_spill]] %s10460_s23  ;;  %p46_p0 = scmp.ge.s32.totalorder %s45_s24, 2 }
  0x1d   : > { %p88_p1 = scmp.ne.s32.totalorder %s10448_s20, %s10444_s19  ;;  %p89_p2 = scmp.eq.s32.totalorder %s10460_s23, 0 }
  0x1e   : > { %s13379_s24 = smov (%p46_p0, %s45_s24), 0  ;;  %p9736_p4 = scmp.lt.s32.totalorder %s10460_s23, 2 }
  0x1f   : > { %13319 = sst [smem:[#allocation24_spill]] %s13379_s24  ;;  %p90_p3 = por %p89_p2, %p88_p1 }
  0x20   : > { %s78_s26 = ssub.s32 %s10456_s22, %s13379_s24  ;;  %s10610_s27 = sand.u32 1, %s10460_s23  }
  0x21   : > { %p79_p5 = scmp.eq.s32.totalorder %s78_s26, 0  ;;  %s10613_s28 = sand.u32 1, %s10448_s20  }
  0x22   : > { %s8931_s29 = sshll.u32 %s10456_s22, 4  ;;  %s13321_s1 = sld [smem:[#allocation27_spill]] }
  0x23   : > { %s10617_s30 = scalar_select %p79_p5, %s10448_s20, %s81_s25  }
  0x24   : > { %s497_s24 = scalar_lea.vmem [#allocation6], %s10613_s28  ;;  %p10625_p6 = pnand %p9736_p4, %p90_p3 }
  0x25   : > { %13320 = sst [smem:[#allocation25_spill]] %s10617_s30  ;;  %s504_s14 = sshll.u32 %s497_s24, 4  ;;  %s10629_s14 = int_to_ptr.vmem [resolvable:$true] %s504_s14 }
  0x26   : > { %s13322_s13 = scalar_select %p10625_p6, 1, 0 }
  0x27   : > { %s13323_s2 = sld [smem:[#allocation28_spill]]  ;;  %s13281_s16 = scalar_lea.sflag [#allocation7], %s10610_s27 }
  0x28   : > { %s10622_s15 = scalar_lea.hbm %s13321_s1, %s8931_s29  ;;  %p10641_p8 = pneg %p10625_p6 }
  0x29   : > { %s10160_s17 = scalar_lea.hbm %s10622_s15, 16  ;;  %s10165_s10 = scalar_lea.hbm %s13321_s1, 32 }
  0x2a   : > { %p10161_p7 = scmp.ne.s32.totalorder %s10622_s15, %s10160_s17  ;;  %p10166_p11 = scmp.lt.u32.totalorder %s10622_s15, %s13321_s1 }
  0x2b   : > { %s13324_s20 = scalar_select %p10641_p8, 1, 0 }
  0x2c   : > { %p10163_p9 = pnand %p10641_p8, %p10161_p7  ;;  %p10167_p12 = scmp.lt.u32.totalorder %s10165_s10, %s10160_s17 }
  0x2d   : > { %s10634_s30 = scalar_lea.hbm %s13323_s2, %s8931_s29  ;;  %p10169_p0 = scmp.lt.u32.totalorder %s10160_s17, %s10622_s15 }
  0x2e   : > { %p10164_p10 = pneg %p10163_p9  ;;  %p10168_p13 = por %p10167_p12, %p10166_p11 }
  0x30   : > { %p10170_p1 = por %p10169_p0, %p10168_p13 }
  0x32   : > { %p10171_p2 = pnand %p10170_p1, %p10164_p10 }
  0x34   : > { %10174 = shalt.err (!%p10171_p2)
}
  0x35   : > { %s10175_s29 = scalar_lea.vmem %s10629_s14, 16  ;;  %s10462_s12 = smov [#allocation6]  }
  0x36   : > { %p10176_p3 = scmp.ne.s32.totalorder %s10629_s14, %s10175_s29  ;;  %s10180_s26 = sshll.u32 %s10462_s12, 4  ;;  %s10181_s26 = int_to_ptr.vmem [resolvable:$false] %s10180_s26 }
  0x37   : > { %s10182_s4 = scalar_lea.vmem %s10181_s26, 32  ;;  %p10183_p7 = scmp.lt.s32.totalorder %s10629_s14, %s10181_s26 }
  0x38   : > { %p10178_p4 = pnand %p10176_p3, %p10641_p8  ;;  %p10184_p9 = scmp.lt.s32.totalorder %s10182_s4, %s10175_s29 }
  0x3a   : > { %p10179_p5 = pneg %p10178_p4  ;;  %p10185_p11 = por %p10184_p9, %p10183_p7 }
  0x3c   : > { %p10186_p12 = pnand %p10185_p11, %p10179_p5 }
  0x3e   : > { %10189 = shalt.err (!%p10186_p12)
}
  0x3f   : > { %9719 = dma.hbm_to_vmem [thread:$0]  (!%p10625_p6), %s10622_s15, 16, %s10629_s14, %s13281_s16  }
  0x40   : > { %s9688_s10 = smul.u32 192, %s10613_s28  ;;  %s13325_s3 = sld [smem:[#allocation29_spill]] }
  0x41   : > { %s9689_s17 = smul.u32 3072, %s10456_s22  ;;  %s8937_s4 = sshll.u32 %s10613_s28, 8 }
  0x42   : > { %s532_s12 = scalar_lea.vmem [#allocation9], %s9688_s10  ;;  %s13283_s1 = scalar_lea.sflag [#allocation10], %s10610_s27 }
  0x43   : > { %s539_s26 = sshll.u32 %s532_s12, 4  ;;  %s10673_s26 = int_to_ptr.vmem [resolvable:$true] %s539_s26 }
  0x46   : > { %s10671_s29 = scalar_lea.hbm %s13325_s3, %s9689_s17  ;;  %s10195_s17 = scalar_lea.hbm %s13325_s3, 6144 }
  0x47   : > { %s10190_s8 = scalar_lea.hbm %s10671_s29, 3072  ;;  %p10196_p1 = scmp.lt.u32.totalorder %s10671_s29, %s13325_s3 }
  0x48   : > { %p10191_p10 = scmp.ne.s32.totalorder %s10671_s29, %s10190_s8  ;;  %p10197_p2 = scmp.lt.u32.totalorder %s10195_s17, %s10190_s8 }
  0x49   : > { %p10199_p4 = scmp.lt.u32.totalorder %s10190_s8, %s10671_s29 }
  0x4a   : > { %p10193_p13 = pnand %p10191_p10, %p10641_p8  ;;  %p10198_p3 = por %p10197_p2, %p10196_p1 }
  0x4c   : > { %p10194_p0 = pneg %p10193_p13  ;;  %p10200_p5 = por %p10199_p4, %p10198_p3 }
  0x4e   : > { %p10201_p7 = pnand %p10200_p5, %p10194_p0 }
  0x50   : > { %10204 = shalt.err (!%p10201_p7)
}
  0x51   : > { %s10205_s10 = scalar_lea.vmem %s10673_s26, 3072  ;;  %s10463_s12 = smov [#allocation9]  }
  0x52   : > { %p10206_p9 = scmp.ne.s32.totalorder %s10673_s26, %s10205_s10  ;;  %s10210_s14 = sshll.u32 %s10463_s12, 4  ;;  %s10211_s14 = int_to_ptr.vmem [resolvable:$false] %s10210_s14 }
  0x53   : > { %s10212_s15 = scalar_lea.vmem %s10211_s14, 6144  ;;  %p10213_p10 = scmp.lt.s32.totalorder %s10673_s26, %s10211_s14 }
  0x54   : > { %p10208_p11 = pnand %p10206_p9, %p10641_p8  ;;  %p10214_p13 = scmp.lt.s32.totalorder %s10212_s15, %s10205_s10 }
  0x56   : > { %p10209_p12 = pneg %p10208_p11  ;;  %p10215_p1 = por %p10214_p13, %p10213_p10 }
  0x58   : > { %p10216_p2 = pnand %p10215_p1, %p10209_p12 }
  0x5a   : > { %10219 = shalt.err (!%p10216_p2)
}
  0x5b   : > { %s10464_s8 = smov 192   ;;  %s10465_s17 = smov 12  }
  0x5c   : > { %9725 = dma.hbm_to_vmem [thread:$0]  (!%p10625_p6), %s10671_s29, 3072, %s10673_s26, %s13283_s1, %s10464_s8, %s10464_s8, %s10465_s17  }
  0x5d   : > { %s9156_s24 = sshll.u32 %s10456_s22, 12  ;;  %s13326_s9 = sld [smem:[#allocation34_spill]] }
  0x5e   : > { %s599_s14 = scalar_lea.vmem [#allocation12], %s8937_s4  ;;  %s13282_s16 = scalar_lea.sflag [#allocation13], %s10610_s27 }
  0x5f   : > { %s606_s15 = sshll.u32 %s599_s14, 4  ;;  %s10710_s15 = int_to_ptr.vmem [resolvable:$true] %s606_s15 }
  0x63   : > { %s10706_s12 = scalar_lea.hbm %s13326_s9, %s9156_s24  ;;  %s10225_s8 = scalar_lea.hbm %s13326_s9, 8192 }
  0x64   : > { %s10220_s3 = scalar_lea.hbm %s10706_s12, 4096  ;;  %p10226_p5 = scmp.lt.u32.totalorder %s10706_s12, %s13326_s9 }
  0x65   : > { %p10221_p0 = scmp.ne.s32.totalorder %s10706_s12, %s10220_s3  ;;  %p10227_p7 = scmp.lt.u32.totalorder %s10225_s8, %s10220_s3 }
  0x66   : > { %p10229_p11 = scmp.lt.u32.totalorder %s10220_s3, %s10706_s12 }
  0x67   : > { %p10223_p3 = pnand %p10221_p0, %p10641_p8  ;;  %p10228_p9 = por %p10227_p7, %p10226_p5 }
  0x69   : > { %p10224_p4 = pneg %p10223_p3  ;;  %p10230_p12 = por %p10229_p11, %p10228_p9 }
  0x6b   : > { %p10231_p10 = pnand %p10230_p12, %p10224_p4 }
  0x6d   : > { %10234 = shalt.err (!%p10231_p10)
}
  0x6e   : > { %s10235_s10 = scalar_lea.vmem %s10710_s15, 4096  ;;  %s10466_s14 = smov [#allocation12]  }
  0x6f   : > { %p10236_p13 = scmp.ne.s32.totalorder %s10710_s15, %s10235_s10  ;;  %s10240_s29 = sshll.u32 %s10466_s14, 4  ;;  %s10241_s29 = int_to_ptr.vmem [resolvable:$false] %s10240_s29 }
  0x70   : > { %s10242_s26 = scalar_lea.vmem %s10241_s29, 8192  ;;  %p10243_p0 = scmp.lt.s32.totalorder %s10710_s15, %s10241_s29 }
  0x71   : > { %p10238_p1 = pnand %p10236_p13, %p10641_p8  ;;  %p10244_p3 = scmp.lt.s32.totalorder %s10242_s26, %s10235_s10 }
  0x73   : > { %p10239_p2 = pneg %p10238_p1  ;;  %p10245_p5 = por %p10244_p3, %p10243_p0 }
  0x75   : > { %p10246_p7 = pnand %p10245_p5, %p10239_p2 }
  0x77   : > { %10249 = shalt.err (!%p10246_p7)
}
  0x78   : > { %s10467_s3 = smov 256   ;;  %s10468_s8 = smov 16  }
  0x79   : > { %9731 = dma.hbm_to_vmem [thread:$0]  (!%p10625_p6), %s10706_s12, 4096, %s10710_s15, %s13282_s16, %s10467_s3, %s10467_s3, %s10468_s8  }
  0x7a   : > { %s13327_s11 = sld [smem:[#allocation36_spill]]  ;;  %s627_s14 = scalar_lea.vmem [#allocation14], %s8937_s4 }
  0x7b   : > { %s634_s29 = sshll.u32 %s627_s14, 4  ;;  %s10748_s26 = sadd.s32 4294967295, %s10460_s23   ;;  %s10745_s29 = int_to_ptr.vmem [resolvable:$true] %s634_s29 }
  0x7c   : > { %p94_p4 = scmp.ne.s32.totalorder %s10444_s19, %s10440_s18  ;;  %p13285_p9 = scmp.eq.s32.totalorder %s10748_s26, 0 }
  0x7d   : > { %p8928_p11 = scmp.ge.s32.totalorder %s10460_s23, 1  ;;  %p459_p12 = scmp.lt.s32.totalorder %s10460_s23, 3 }
  0x7e   : > { %p10757_p10 = por %p13285_p9, %p94_p4  ;;  %s10469_s12 = smov [#allocation3]  }
  0x7f   : > { %p10761_p13 = pnand %p8928_p11, %p459_p12  ;;  %s474_s15 = sshll.u32 %s10469_s12, 4  ;;  %s475_s15 = int_to_ptr.vmem [resolvable:$true] %s474_s15 }
  0x80   : > { %s10741_s10 = scalar_lea.hbm %s13327_s11, %s9156_s24  ;;  %s514_s3 = scalar_lea.vmem [#allocation8], %s10613_s28 }
  0x81   : > { %s13328_s24 = scalar_select %p10757_p10, 1, 0 }
  0x82   : > { %s13329_s4 = scalar_select %p10761_p13, 1, 0 }
  0x83   : > { %p9712_p1 = pneg %p10761_p13  ;;  %s521_s8 = sshll.u32 %s514_s3, 4  ;;  %s10774_s8 = int_to_ptr.vmem [resolvable:$true] %s521_s8 }
  0x84   : > { %s13331_s0 = sld [smem:[#allocation26_spill]] }
  0x85   : > { %p10769_p2 = pnand %p9712_p1, %p13285_p9 }
  0x87   : > { %p10252_p3 = pneg %p10769_p2 }
  0x8a   : > { %s10250_s16 = scalar_lea.hbm %s13331_s0, 768 }
  0x8b   : > { %p10251_p0 = scmp.ne.s32.totalorder %s13331_s0, %s10250_s16  ;;  %p10257_p4 = scmp.lt.u32.totalorder %s10250_s16, %s13331_s0 }
  0x8d   : > { %p10253_p5 = pnand %p10252_p3, %p10251_p0 }
  0x8f   : > { %p10254_p7 = pneg %p10253_p5 }
  0x91   : > { %p10259_p11 = pnand %p10257_p4, %p10254_p7 }
  0x93   : > { %10262 = shalt.err (!%p10259_p11)
}
  0x94   : > { %s10263_s3 = scalar_lea.vmem %s475_s15, 768  ;;  %p10271_p10 = scmp.lt.s32.totalorder %s475_s15, %s475_s15 }
  0x95   : > { %p10264_p12 = scmp.ne.s32.totalorder %s475_s15, %s10263_s3  ;;  %p10272_p13 = scmp.lt.s32.totalorder %s10263_s3, %s10263_s3 }
  0x97   : > { %p10266_p1 = pnand %p10264_p12, %p10252_p3  ;;  %p10273_p6 = por %p10272_p13, %p10271_p10 }
  0x99   : > { %p10267_p9 = pneg %p10266_p1 }
  0x9b   : > { %p10274_p8 = pnand %p10273_p6, %p10267_p9 }
  0x9d   : > { %10277 = shalt.err (!%p10274_p8)
}
  0x9e   : > { %s10470_s1 = smov 128   ;;  %s10471_s9 = smov 8  }
  0x9f   : > { %9715 = dma.hbm_to_vmem [thread:$0]  (!%p10769_p2), %s13331_s0, 768, %s475_s15, [#allocation4], %s10470_s1, %s10470_s1, %s10471_s9  }
  0xa0   : > { %s10278_s25 = scalar_lea.hbm %s10634_s30, 16  ;;  %p13332_p3 = scmp.ne.s32.totalorder %s13324_s20, 0 }
  0xa1   : > { %p10279_p0 = scmp.ne.s32.totalorder %s10634_s30, %s10278_s25  ;;  %s10283_s3 = scalar_lea.hbm %s13323_s2, 32 }
  0xa2   : > { %p10284_p6 = scmp.lt.u32.totalorder %s10634_s30, %s13323_s2  ;;  %p10285_p8 = scmp.lt.u32.totalorder %s10283_s3, %s10278_s25 }
  0xa3   : > { %p10281_p5 = pnand %p10279_p0, %p13332_p3  ;;  %p10287_p13 = scmp.lt.u32.totalorder %s10278_s25, %s10634_s30 }
  0xa4   : > { %p10286_p9 = por %p10285_p8, %p10284_p6 }
  0xa5   : > { %p10282_p10 = pneg %p10281_p5 }
  0xa6   : > { %p10288_p7 = por %p10287_p13, %p10286_p9 }
  0xa8   : > { %p10289_p4 = pnand %p10288_p7, %p10282_p10 }
  0xaa   : > { %10292 = shalt.err (!%p10289_p4)
}
  0xab   : > { %s10293_s15 = scalar_lea.vmem %s10774_s8, 16  ;;  %s10472_s18 = smov [#allocation8]  }
  0xac   : > { %p10294_p2 = scmp.ne.s32.totalorder %s10774_s8, %s10293_s15  ;;  %s10298_s1 = sshll.u32 %s10472_s18, 4  ;;  %s10299_s1 = int_to_ptr.vmem [resolvable:$false] %s10298_s1 }
  0xad   : > { %s10300_s7 = scalar_lea.vmem %s10299_s1, 32  ;;  %p10301_p1 = scmp.lt.s32.totalorder %s10774_s8, %s10299_s1 }
  0xae   : > { %p10296_p11 = pnand %p10294_p2, %p13332_p3  ;;  %p10302_p0 = scmp.lt.s32.totalorder %s10300_s7, %s10293_s15 }
  0xb0   : > { %p10297_p12 = pneg %p10296_p11  ;;  %p10303_p5 = por %p10302_p0, %p10301_p1 }
  0xb2   : > { %p10304_p6 = pnand %p10303_p5, %p10297_p12 }
  0xb4   : > { %10307 = shalt.err (!%p10304_p6)
}
  0xb5   : > { %p13333_p10 = scmp.ne.s32.totalorder %s13322_s13, 0  ;;  %s13334_s17 = scalar_lea.sflag [#allocation7], %s10610_s27 }
  0xb6   : > { %s9155_s9 = sshll.u32 %s10456_s22, 10  ;;  %s13335_s23 = sshll.u32 %s10613_s28, 6 }
  0xb7   : > { %9722 = dma.hbm_to_vmem [thread:$0]  (!%p13333_p10), %s10634_s30, 16, %s10774_s8, %s13334_s17  }
  0xb8   : > { %s560_s16 = scalar_lea.vmem [#allocation11], %s13335_s23  ;;  %s13336_s5 = sld [smem:[#allocation31_spill]] }
  0xb9   : > { %s567_s25 = sshll.u32 %s560_s16, 4  ;;  %s10824_s25 = int_to_ptr.vmem [resolvable:$true] %s567_s25 }
  0xbe   : > { %s10822_s3 = scalar_lea.hbm %s13336_s5, %s9155_s9  ;;  %s10313_s8 = scalar_lea.hbm %s13336_s5, 2048 }
  0xbf   : > { %s10308_s15 = scalar_lea.hbm %s10822_s3, 1024  ;;  %p10314_p7 = scmp.lt.u32.totalorder %s10822_s3, %s13336_s5 }
  0xc0   : > { %p10309_p8 = scmp.ne.s32.totalorder %s10822_s3, %s10308_s15  ;;  %p10315_p4 = scmp.lt.u32.totalorder %s10313_s8, %s10308_s15 }
  0xc1   : > { %p10317_p11 = scmp.lt.u32.totalorder %s10308_s15, %s10822_s3 }
  0xc2   : > { %p10311_p9 = pnand %p10309_p8, %p13332_p3  ;;  %p10316_p2 = por %p10315_p4, %p10314_p7 }
  0xc4   : > { %p10312_p13 = pneg %p10311_p9  ;;  %p10318_p12 = por %p10317_p11, %p10316_p2 }
  0xc6   : > { %p10319_p1 = pnand %p10318_p12, %p10312_p13 }
  0xc8   : > { %10322 = shalt.err (!%p10319_p1)
}
  0xc9   : > { %s10323_s7 = scalar_lea.vmem %s10824_s25, 1024  ;;  %s10473_s17 = smov [#allocation11]  }
  0xca   : > { %p10324_p0 = scmp.ne.s32.totalorder %s10824_s25, %s10323_s7  ;;  %s10328_s9 = sshll.u32 %s10473_s17, 4  ;;  %s10329_s9 = int_to_ptr.vmem [resolvable:$false] %s10328_s9 }
  0xcb   : > { %s10330_s23 = scalar_lea.vmem %s10329_s9, 2048  ;;  %p10331_p8 = scmp.lt.s32.totalorder %s10824_s25, %s10329_s9 }
  0xcc   : > { %p10326_p5 = pnand %p10324_p0, %p13332_p3  ;;  %p10332_p9 = scmp.lt.s32.totalorder %s10330_s23, %s10323_s7 }
  0xce   : > { %p10327_p6 = pneg %p10326_p5  ;;  %p10333_p7 = por %p10332_p9, %p10331_p8 }
  0xd0   : > { %p10334_p4 = pnand %p10333_p7, %p10327_p6 }
  0xd2   : > { %10337 = shalt.err (!%p10334_p4)
}
  0xd3   : > { %s10474_s16 = smov 64   ;;  %s10475_s14 = smov 4  }
  0xd4   : > { %s13337_s12 = scalar_lea.sflag [#allocation10], %s10610_s27  ;;  %s10338_s15 = scalar_lea.hbm %s10741_s10, 4096 }
  0xd5   : > { %9728 = dma.hbm_to_vmem [thread:$0]  (!%p13333_p10), %s10822_s3, 1024, %s10824_s25, %s13337_s12, %s10474_s16, %s10474_s16, %s10475_s14  }
  0xd6   : > { %p10339_p13 = scmp.ne.s32.totalorder %s10741_s10, %s10338_s15  ;;  %s10343_s8 = scalar_lea.hbm %s13327_s11, 8192 }
  0xd7   : > { %p10344_p12 = scmp.lt.u32.totalorder %s10741_s10, %s13327_s11  ;;  %p10345_p1 = scmp.lt.u32.totalorder %s10343_s8, %s10338_s15 }
  0xd8   : > { %p10341_p2 = pnand %p10339_p13, %p13332_p3  ;;  %p10347_p5 = scmp.lt.u32.totalorder %s10338_s15, %s10741_s10 }
  0xd9   : > { %p10346_p0 = por %p10345_p1, %p10344_p12 }
  0xda   : > { %p10342_p11 = pneg %p10341_p2 }
  0xdb   : > { %p10348_p6 = por %p10347_p5, %p10346_p0 }
  0xdd   : > { %p10349_p8 = pnand %p10348_p6, %p10342_p11 }
  0xdf   : > { %10352 = shalt.err (!%p10349_p8)
}
  0xe0   : > { %s10353_s25 = scalar_lea.vmem %s10745_s29, 4096  ;;  %s10476_s3 = smov [#allocation14]  }
  0xe1   : > { %p10354_p9 = scmp.ne.s32.totalorder %s10745_s29, %s10353_s25  ;;  %s10358_s7 = sshll.u32 %s10476_s3, 4  ;;  %s10359_s7 = int_to_ptr.vmem [resolvable:$false] %s10358_s7 }
  0xe2   : > { %s10360_s17 = scalar_lea.vmem %s10359_s7, 8192  ;;  %p10361_p13 = scmp.lt.s32.totalorder %s10745_s29, %s10359_s7 }
  0xe3   : > { %p10356_p7 = pnand %p10354_p9, %p13332_p3  ;;  %p10362_p2 = scmp.lt.s32.totalorder %s10360_s17, %s10353_s25 }
  0xe5   : > { %p10357_p4 = pneg %p10356_p7  ;;  %p10363_p12 = por %p10362_p2, %p10361_p13 }
  0xe7   : > { %p10364_p1 = pnand %p10363_p12, %p10357_p4 }
  0xe9   : > { %10367 = shalt.err (!%p10364_p1)
}
  0xea   : > { %s13338_s9 = scalar_lea.sflag [#allocation13], %s10610_s27  ;;  %p13339_p3 = scmp.ne.s32.totalorder %s13329_s4, 0 }
  0xeb   : > { %9734 = dma.hbm_to_vmem [thread:$0]  (!%p13333_p10), %s10741_s10, 4096, %s10745_s29, %s13338_s9, %s10474_s16, %s10474_s16, %s10475_s14  }
  0xec   : > { %652 = sbr.rel (%p13339_p3) target bundleno = 3440 (0xd70), region = 80  ;;  %p13340_p11 = scmp.eq.s32.totalorder (!%p13339_p3), %s10748_s26, 0 }
  0xf3   : > { %10419 = dma.done.wait (%p13340_p11), [#allocation4], 768   ;;  %p13341_p0 = pmov %p13340_p11 }
  0xf4   : > { %s658_s13 = sand.u32 1, %s10748_s26   ;;  %s10886_s20 = sand.u32 1, %s10444_s19  }
  0xf5   : > { %10421 = vsyncadd (%p13341_p0), [#allocation4], 4294966528  ;;  %s659_s27 = scalar_lea.sflag [#allocation7], %s658_s13  ;;  %p13342_p5 = scmp.ne.s32.totalorder %s13328_s24, 0 }
  0xf7   : > { %10423 = dma.done.wait (%p13342_p5), %s659_s27, 32  }
  0xf8   : > { %10425 = vsyncadd (%p13342_p5), %s659_s27, 4294967264  ;;  %s9690_s10 = smul.u32 192, %s10886_s20  ;;  %s675_s4 = scalar_lea.sflag [#allocation10], %s658_s13 }
  0xfa   : > { %s10895_s16 = scalar_lea.vmem [#allocation9], %s9690_s10 }
  0xfb   : > { %10427 = dma.done.wait (%p13342_p5), %s675_s4, 4096  }
  0xfc   : > { %10429 = vsyncadd (%p13342_p5), %s675_s4, 4294963200  ;;  %s8945_s14 = sshll.u32 %s10886_s20, 6  ;;  %s8946_s12 = sshll.u32 %s10886_s20, 8 }
  0xfd   : > { %s10903_s15 = scalar_lea.vmem [#allocation11], %s8945_s14  ;;  %s693_s30 = scalar_lea.sflag [#allocation13], %s658_s13 }
  0xfe   : > { %s10905_s28 = scalar_lea.vmem [#allocation12], %s8946_s12 }
  0xff   : > { %10431 = dma.done.wait (%p13342_p5), %s693_s30, 8192  }
 0x100   : > { %10433 = vsyncadd (%p13342_p5), %s693_s30, 4294959104  ;;  %p791_p10 = scmp.lt.s32.totalorder %s10452_s21, 1  ;;  %s13343_s24 = sld [smem:[#allocation32_spill]] }
 0x101   : > { %s13344_s10 = sld [smem:[#allocation33_spill]]  ;;  %s13345_s29 = sld [smem:[#allocation30_spill]] }
 0x102   : > { %s10913_s8 = scalar_select %p791_p10, %s10452_s21, 1 }
 0x103   : > { %s13346_s11 = sld [smem:[#allocation35_spill]]  ;;  %s13347_s3 = sld [smem:[#allocation37_spill]] }
 0x104   : > { %s9691_s18 = smul.u32 3, %s10913_s8  ;;  %s8948_s0 = sshll.u32 %s10913_s8, 2 }
 0x105   : > { %s10943_s17 = scalar_lea.vmem [#allocation14], %s8946_s12  ;;  %p8949_p6 = scmp.ne.s32.totalorder %s10452_s21, 0 }
 0x106   : > { %s800_s9 = scalar_lea.vmem %s13343_s24, %s10913_s8  ;;  %v817_v0 = vld [vmem:[#allocation3] sm:$0xff] (!%p8949_p6)  ;;  %v818_v1 = vld [vmem:[#allocation3 + $0x8] sm:$0xff] (!%p8949_p6)  ;;  %v819_v2 = vld [vmem:[#allocation3 + $0x10] sm:$0xff] (!%p8949_p6) }
 0x107   : > { %s803_s4 = scalar_lea.vmem %s13344_s10, %s10913_s8  ;;  %s10931_s23 = scalar_lea.vmem %s13345_s29, %s9691_s18  ;;  %823 = vst [vmem:[#allocation2] sm:$0xff] (!%p8949_p6), %v817_v0  ;;  %824 = vst [vmem:[#allocation2 + $0x8] sm:$0xff] (!%p8949_p6), %v818_v1  ;;  %v820_v3 = vld [vmem:[#allocation3 + $0x18] sm:$0xff] (!%p8949_p6)  ;;  %v821_v4 = vld [vmem:[#allocation3 + $0x20] sm:$0xff] (!%p8949_p6) }
 0x108   : > { %816 = sbr.rel (%p8949_p6) target bundleno = 271 (0x10f), region = 112  ;;  %825 = vst [vmem:[#allocation2 + $0x10] sm:$0xff] (!%p8949_p6), %v819_v2  ;;  %v822_v5 = vld [vmem:[#allocation3 + $0x28] sm:$0xff] (!%p8949_p6)  ;;  %826 = vst [vmem:[#allocation2 + $0x18] sm:$0xff] (!%p8949_p6), %v820_v3 }
 0x109   : > { %s10937_s22 = scalar_lea.vmem %s13346_s11, %s8948_s0  ;;  %s810_s7 = scalar_lea.vmem %s13347_s3, %s10913_s8  ;;  %827 = vst [vmem:[#allocation2 + $0x20] sm:$0xff] (!%p8949_p6), %v821_v4  ;;  %828 = vst [vmem:[#allocation2 + $0x28] sm:$0xff] (!%p8949_p6), %v822_v5 }
 0x10f PF: > { %v835_v6 = vld [vmem:[#allocation2] sm:$0xff]  ;;  %v836_v7 = vld [vmem:[#allocation2 + $0x8] sm:$0xff]  ;;  %v837_v8 = vld [vmem:[#allocation2 + $0x10] sm:$0xff]  ;;  %v13299_v12 = vmov 0.0   ;;  %v13296_v51 = vmov 0   ;;  %vm10479_vm0 = vmmov 0  }
 0x110   : > { %843 = vadd.xlane.f32.xlu0 %v835_v6  ;;  %847 = vadd.xlane.f32.xlu1 %v837_v8  ;;  %v838_v9 = vld [vmem:[#allocation2 + $0x18] sm:$0xff]  ;;  %v9854_v10 = vld [vmem:[%s10895_s16 + $0x4] ss:$12 sps:$4 sm:$0xff]   ;;  %v9856_v11 = vld [vmem:[%s10895_s16] ss:$12 sps:$4 sm:$0xff]   ;;  %s13348_s0 = scalar_lea.vmem [#allocation6], %s10886_s20 }
 0x111   : > { %9344 = vmatprep.subr.bf16.mxu1 %v13299_v12  ;;  %v9857_v13 = vld [vmem:[%s10895_s16 + $0x8] ss:$12 sps:$4 sm:$0xff]   ;;  %1114 = vmatprep.subr.bf16.mxu0 %v9854_v10  ;;  %v10960_v27 = vld [vmem:[#allocation2 + $0x20] sm:$0xff]  ;;  %v9860_v33 = vld [vmem:[%s10895_s16 + $0x18] ss:$12 sps:$4 sm:$0xff]   ;;  %s13349_s2 = scalar_lea.vmem [#allocation8], %s10886_s20 }
 0x112   : > { %v9858_v14 = vld [vmem:[%s10895_s16 + $0x1c] ss:$12 sps:$4 sm:$0xff]   ;;  %1115 = vmatpush1.bf16.msra.mxu0 %v9856_v11  ;;  %9345 = vmatpush3.bf16.msra.mxu1 %v9857_v13  ;;  %v9861_v34 = vld [vmem:[%s10895_s16 + $0x20] ss:$12 sps:$4 sm:$0xff]   ;;  %v9865_v37 = vld [vmem:[%s10895_s16 + $0x38] ss:$12 sps:$4 sm:$0xff]  }
 0x113   : > { %1116 = vmatprep.subr.bf16.mxu0 %v9858_v14  ;;  %9346 = vmatprep.subr.bf16.mxu1 %v13299_v12  ;;  %v10969_v31 = vld [vmem:[#allocation2 + $0x28] sm:$0xff]  ;;  %v9862_v35 = vld [vmem:[%s10895_s16 + $0x34] ss:$12 sps:$4 sm:$0xff]   ;;  %v9864_v36 = vld [vmem:[%s10895_s16 + $0x30] ss:$12 sps:$4 sm:$0xff]   ;;  %s10480_s5 = smov 64  }
 0x114   : > { %845 = vadd.xlane.f32.xlu0 %v836_v7  ;;  %849 = vadd.xlane.f32.xlu1 %v838_v9  ;;  %v9866_v38 = vld [vmem:[%s10895_s16 + $0x4c] ss:$12 sps:$4 sm:$0xff]   ;;  %v9868_v39 = vld [vmem:[%s10895_s16 + $0x48] ss:$12 sps:$4 sm:$0xff]   ;;  %v9869_v40 = vld [vmem:[%s10895_s16 + $0x50] ss:$12 sps:$4 sm:$0xff]  }
 0x115   : > { %v9870_v41 = vld [vmem:[%s10895_s16 + $0x64] ss:$12 sps:$4 sm:$0xff]   ;;  %v9872_v42 = vld [vmem:[%s10895_s16 + $0x60] ss:$12 sps:$4 sm:$0xff]   ;;  %v9873_v43 = vld [vmem:[%s10895_s16 + $0x68] ss:$12 sps:$4 sm:$0xff]   ;;  %1146 = vmatprep.mubr.bf16.mxu0 %v13296_v51  ;;  %9360 = vmatprep.mubr.msk.bf16.mxu1 %vm10479_vm0, %v13299_v12 }
 0x116   : > { %1117 = vmatpush1.bf16.msra.mxu0 %v9860_v33  ;;  %9347 = vmatpush3.bf16.msra.mxu1 %v9861_v34  ;;  %v9874_v44 = vld [vmem:[%s10895_s16 + $0x7c] ss:$12 sps:$4 sm:$0xff]   ;;  %v9876_v45 = vld [vmem:[%s10895_s16 + $0x78] ss:$12 sps:$4 sm:$0xff]   ;;  %v9877_v46 = vld [vmem:[%s10895_s16 + $0x80] ss:$12 sps:$4 sm:$0xff]  }
 0x117   : > { %9348 = vmatprep.subr.bf16.mxu1 %v13299_v12  ;;  %1118 = vmatprep.subr.bf16.mxu0 %v9862_v35  ;;  %v9878_v47 = vld [vmem:[%s10895_s16 + $0x94] ss:$12 sps:$4 sm:$0xff]   ;;  %v9880_v48 = vld [vmem:[%s10895_s16 + $0x90] ss:$12 sps:$4 sm:$0xff]   ;;  %v9881_v49 = vld [vmem:[%s10895_s16 + $0x98] ss:$12 sps:$4 sm:$0xff]  }
 0x118   : > { %v9882_v50 = vld [vmem:[%s10895_s16 + $0xac] ss:$12 sps:$4 sm:$0xff]   ;;  %v9884_v52 = vld [vmem:[%s10895_s16 + $0xa8] ss:$12 sps:$4 sm:$0xff]   ;;  %v9885_v53 = vld [vmem:[%s10895_s16 + $0xb0] ss:$12 sps:$4 sm:$0xff]   ;;  %s13361_s16 = scalar_lea.vmem %s13268_s6, %s10913_s8 }
 0x119   : > { %v8950_v13 = vld [vmem:[%s13348_s0] ss:$0 sm:$0xff]  ;;  %s10481_s11 = smov 96   ;;  %s10482_s20 = smov 32   ;;  %vm3934_vm1 = vcmask 261120   ;;  %vm5379_vm2 = vcmask 1043456  }
 0x11a   : > { %1119 = vmatpush1.bf16.msra.mxu0 %v9864_v36  ;;  %9349 = vmatpush3.bf16.msra.mxu1 %v9865_v37  ;;  %vm5087_vm4 = vcmask 64512   ;;  %vm7375_vm5 = vcmask 523264   ;;  %vm7382_vm6 = vcmask 785408   ;;  %p9148_p8 = scmp.ne.s32.totalorder %s10452_s21, 1 }
 0x11b   : > { %9350 = vmatprep.subr.bf16.mxu1 %v13299_v12  ;;  %1120 = vmatprep.subr.bf16.mxu0 %v9866_v38  ;;  %s13368_s27 = sld [smem:[#allocation38_spill]] (!%p9148_p8)  ;;  %s13369_s14 = sld [smem:[#allocation39_spill]] (!%p9148_p8) }
 0x11e   : > { %1121 = vmatpush1.bf16.msra.mxu0 %v9868_v39  ;;  %9351 = vmatpush3.bf16.msra.mxu1 %v9869_v40 }
 0x11f   : > { %9352 = vmatprep.subr.bf16.mxu1 %v13299_v12  ;;  %1122 = vmatprep.subr.bf16.mxu0 %v9870_v41 }
 0x122   : > { %1123 = vmatpush1.bf16.msra.mxu0 %v9872_v42  ;;  %9353 = vmatpush3.bf16.msra.mxu1 %v9873_v43 }
 0x123   : > { %9354 = vmatprep.subr.bf16.mxu1 %v13299_v12  ;;  %1124 = vmatprep.subr.bf16.mxu0 %v9874_v44 }
 0x126   : > { %1125 = vmatpush1.bf16.msra.mxu0 %v9876_v45  ;;  %9355 = vmatpush3.bf16.msra.mxu1 %v9877_v46  ;;  %v13298_v46 = vlaneseq }
 0x127   : > { %9356 = vmatprep.subr.bf16.mxu1 %v13299_v12  ;;  %1126 = vmatprep.subr.bf16.mxu0 %v9878_v47 }
 0x128   : > { %v11026_v47 = vshrl.u32 %v13298_v46, 7 }
 0x12a   : > { %1127 = vmatpush1.bf16.msra.mxu0 %v9880_v48  ;;  %9357 = vmatpush3.bf16.msra.mxu1 %v9881_v49  ;;  %v13293_v48 = vsub.s32 1, %v11026_v47  ;;  %v11030_v49 = vld [vmem:[%s10931_s23] sm:$0x7] }
 0x12b   : > { %1128 = vmatprep.subr.bf16.mxu0 %v9882_v50  ;;  %9358 = vmatprep.subr.bf16.mxu1 %v13299_v12  ;;  %v13295_v50 = vsub.s32 0, %v11026_v47 }
 0x12e   : > { %1129 = vmatpush1.bf16.msra.mxu0 %v9884_v52  ;;  %9359 = vmatpush3.bf16.msra.mxu1 %v9885_v53  ;;  %v11036_v52 = vrot.slane %v11030_v49, %v13293_v48 }
 0x12f   : > { %9372 = vmatprep.subr.bf16.mxu1 %v13299_v12  ;;  %9396 = vmatprep.subr.bf16.mxu0 %v13299_v12 }
 0x19d   : > { %v844_v15 = vpop.xlane.xlu0 %843  ;;  %v848_v16 = vpop.xlane.xlu1 %847 }
 0x19e   : > { %v856_v17 = vmul.f32 0.0078125, %v844_v15  ;;  %v858_v19 = vmul.f32 0.0078125, %v848_v16 }
 0x1a0   : > { %v10952_v18 = vsub.f32 %v835_v6, %v856_v17  ;;  %v10958_v26 = vsub.f32 %v837_v8, %v858_v19  ;;  %v8951_v17 = vld [vmem:[%s13349_s2] ss:$0 sm:$0xff] }
 0x1a1   : > { %v846_v20 = vpop.xlane.xlu0 %845  ;;  %v850_v21 = vpop.xlane.xlu1 %849 }
 0x1a2   : > { %v857_v22 = vmul.f32 0.0078125, %v846_v20  ;;  %v868_v23 = vmul.f32 %v10952_v18, %v10952_v18  ;;  %v859_v25 = vmul.f32 0.0078125, %v850_v21  ;;  %v870_v29 = vmul.f32 %v10958_v26, %v10958_v26 }
 0x1a4   : > { %874 = vadd.xlane.f32.xlu0 %v868_v23  ;;  %v10956_v24 = vsub.f32 %v836_v7, %v857_v22  ;;  %v10967_v30 = vsub.f32 %v838_v9, %v859_v25 }
 0x1a6   : > { %v869_v28 = vmul.f32 %v10956_v24, %v10956_v24  ;;  %v871_v32 = vmul.f32 %v10967_v30, %v10967_v30 }
 0x1a8   : > { %851 = vadd.xlane.f32.xlu0 %v10960_v27  ;;  %876 = vadd.xlane.f32.xlu1 %v869_v28 }
 0x1ac   : > { %878 = vadd.xlane.f32.xlu0 %v870_v29  ;;  %853 = vadd.xlane.f32.xlu1 %v10969_v31 }
 0x1b0   : > { %880 = vadd.xlane.f32.xlu1 %v871_v32 }
 0x231   : > { %v875_v54 = vpop.xlane.xlu0 %874 }
 0x232   : > { %v886_v55 = vmul.f32 0.0078125, %v875_v54 }
 0x234   : > { %v892_v56 = vadd.f32 1e-05, %v886_v55 }
 0x235   : > { %v877_v57 = vpop.xlane.xlu1 %876  ;;  %v852_v58 = vpop.xlane.xlu0 %851 }
 0x236   : > { %9974 = vrsqrt.f32 %v892_v56  ;;  %v887_v59 = vmul.f32 0.0078125, %v877_v57  ;;  %v860_v60 = vmul.f32 0.0078125, %v852_v58  ;;  %v11043_v57 = vrot.slane %v11030_v49, %v13295_v50 }
 0x238   : > { %v893_v61 = vadd.f32 1e-05, %v887_v59  ;;  %v866_v62 = vsub.f32 %v10960_v27, %v860_v60 }
 0x239   : > { %v854_v63 = vpop.xlane.xlu1 %853  ;;  %v879_v0 = vpop.xlane.xlu0 %878 }
 0x23a   : > { %9976 = vrsqrt.f32 %v893_v61  ;;  %v861_v1 = vmul.f32 0.0078125, %v854_v63  ;;  %v888_v2 = vmul.f32 0.0078125, %v879_v0  ;;  %v872_v3 = vmul.f32 %v866_v62, %v866_v62 }
 0x23c   : > { %v894_v4 = vadd.f32 1e-05, %v888_v2  ;;  %882 = vadd.xlane.f32.xlu0 %v872_v3  ;;  %v867_v5 = vsub.f32 %v10969_v31, %v861_v1 }
 0x23d   : > { %v881_v6 = vpop.xlane.xlu1 %880 }
 0x23e   : > { %9978 = vrsqrt.f32 %v894_v4  ;;  %v889_v7 = vmul.f32 0.0078125, %v881_v6  ;;  %v873_v8 = vmul.f32 %v867_v5, %v867_v5 }
 0x240   : > { %v9975_v9 = vpop.eup %9974  ;;  %v895_v10 = vadd.f32 1e-05, %v889_v7  ;;  %884 = vadd.xlane.f32.xlu1 %v873_v8 }
 0x241   : > { %v904_v11 = vmul.f32 %v9975_v9, %v10952_v18 }
 0x242   : > { %9980 = vrsqrt.f32 %v895_v10 }
 0x243   : > { %v916_v16 = vmul.f32 %v8950_v13, %v904_v11 }
 0x244   : > { %v9977_v14 = vpop.eup %9976 }
 0x245   : > { %v905_v15 = vmul.f32 %v9977_v14, %v10956_v24  ;;  %v928_v21 = vadd.f32 %v8951_v17, %v916_v16 }
 0x247   : > { %v917_v19 = vmul.f32 %v8950_v13, %v905_v15  ;;  %v10483_v15 = vmov 1983009808  }
 0x248   : > { %v9979_v20 = vpop.eup %9978  ;;  %v1297_v16 = vunpack.c.l.s4 %v10483_v15 }
 0x249   : > { %v929_v22 = vadd.f32 %v8951_v17, %v917_v19  ;;  %v906_v23 = vmul.f32 %v9979_v20, %v10958_v26 }
 0x24b   : > { %v934_v25 = vpack.c.bf16 %v929_v22, %v928_v21  ;;  %v918_v28 = vmul.f32 %v8950_v13, %v906_v23  ;;  %v10484_v21 = vmov 1934713408  }
 0x24c   : > { %v9981_v27 = vpop.eup %9980  ;;  %v1329_v22 = vunpack.c.l.s4 %v10484_v21 }
 0x24d   : > { %1147 = vmatmul.mubr.bf16.vlgmr.msra.gmra.mrb[0].mxu0 %v934_v25  ;;  %9361 = vmatmul.mubr.bf16.vlgmr.msra.gmra.mrb[0].mxu1 %v934_v25  ;;  %v907_v18 = vmul.f32 %v9981_v27, %v10967_v30  ;;  %v930_v29 = vadd.f32 %v8951_v17, %v918_v28 }
 0x24e   : > { %1156 = vmatprep.mubr.bf16.mxu0 %v13296_v51  ;;  %9364 = vmatprep.mubr.msk.bf16.mxu1 %vm10479_vm0, %v13299_v12  ;;  %v1330_v28 = vunpack.c.0.s8 %v1329_v22 }
 0x24f   : > { %v919_v24 = vmul.f32 %v8950_v13, %v907_v18 }
 0x251   : > { %v931_v31 = vadd.f32 %v8951_v17, %v919_v24 }
 0x253   : > { %v935_v32 = vpack.c.bf16 %v931_v31, %v930_v29 }
 0x255   : > { %1157 = vmatmul.mubr.bf16.gmra.mrb[4].mxu0 %v935_v32  ;;  %9365 = vmatmul.mubr.bf16.gmra.mrb[4].mxu1 %v935_v32 }
 0x256   : > { %1166 = vmatprep.mubr.bf16.mxu0 %v13296_v51  ;;  %9368 = vmatprep.mubr.msk.bf16.mxu1 %vm10479_vm0, %v13299_v12 }
 0x2c9   : > { %v883_v26 = vpop.xlane.xlu0 %882 }
 0x2ca   : > { %v890_v33 = vmul.f32 0.0078125, %v883_v26 }
 0x2cc   : > { %v896_v30 = vadd.f32 1e-05, %v890_v33 }
 0x2cd   : > { %v885_v34 = vpop.xlane.xlu1 %884 }
 0x2ce   : > { %9982 = vrsqrt.f32 %v896_v30  ;;  %v891_v35 = vmul.f32 0.0078125, %v885_v34 }
 0x2d0   : > { %v897_v36 = vadd.f32 1e-05, %v891_v35  ;;  %v11134_v35 = vsub.s32 %v1330_v28, %v11026_v47 }
 0x2d2   : > { %9984 = vrsqrt.f32 %v897_v36 }
 0x2d8   : > { %v9983_v37 = vpop.eup %9982 }
 0x2d9   : > { %v908_v38 = vmul.f32 %v9983_v37, %v866_v62 }
 0x2db   : > { %v920_v41 = vmul.f32 %v8950_v13, %v908_v38 }
 0x2dc   : > { %v9985_v39 = vpop.eup %9984 }
 0x2dd   : > { %v909_v40 = vmul.f32 %v9985_v39, %v867_v5  ;;  %v932_v43 = vadd.f32 %v8951_v17, %v920_v41 }
 0x2df   : > { %v921_v42 = vmul.f32 %v8950_v13, %v909_v40 }
 0x2e1   : > { %v933_v44 = vadd.f32 %v8951_v17, %v921_v42  ;;  %v1298_v17 = vunpack.c.0.s8 %v1297_v16 }
 0x2e3   : > { %v936_v45 = vpack.c.bf16 %v933_v44, %v932_v43  ;;  %v11124_v23 = vsub.s32 %v1298_v17, %v11026_v47 }
 0x2e5   : > { %1167 = vmatmul.mubr.bf16.gmra.mrb[8].mxu0 %v936_v45  ;;  %9369 = vmatmul.mubr.bf16.gmra.mrb[8].mxu1 %v936_v45  ;;  %v13294_v45 = vsub.s32 2, %v11026_v47 }
 0x2e6   : > { %9374 = vmatprep.mubr.msk.bf16.mxu1 %vm10479_vm0, %v13299_v12  ;;  %9398 = vmatprep.mubr.msk.bf16.mxu0 %vm10479_vm0, %v13299_v12 }
 0x320   : > { %v1148_v53 = vpop.f32.mrb[0].mxu0  ;;  %v11038_v54 = vpop.f32.mrb[0].mxu1 }
 0x321   : > { %v1150_v55 = vpop.f32.mrb[1].mxu0  ;;  %v9362_v56 = vpop.f32.mrb[1].mxu1  ;;  %v11055_v63 = vadd.f32 %v1148_v53, %v11043_v57 }
 0x322   : > { %v11046_v58 = vadd.f32 %v1150_v55, %v11036_v52  ;;  %v1152_v59 = vpop.f32.mrb[2].mxu0  ;;  %v11048_v60 = vpop.f32.mrb[2].mxu1 }
 0x323   : > { %v1154_v61 = vpop.f32.mrb[3].mxu0  ;;  %v9363_v62 = vpop.f32.mrb[3].mxu1  ;;  %v11077_v9 = vadd.f32 %v1152_v59, %v11043_v57 }
 0x324   : > { %2158 = vrot.lane.b32.xlu1 %v11046_v58, %s10480_s5  ;;  %2140 = vrot.lane.b32.xlu0 %v11046_v58, %s10481_s11  ;;  %v11064_v4 = vadd.f32 %v1154_v61, %v11036_v52 }
 0x328   : > { %v1158_v0 = vpop.f32.mrb[4].mxu0  ;;  %v11057_v1 = vpop.f32.mrb[4].mxu1  ;;  %2176 = vrot.lane.b32.xlu1 %v11046_v58, %s10482_s20  ;;  %1258 = vrot.lane.b32.xlu0 %v11055_v63, %s10480_s5 }
 0x329   : > { %v1160_v2 = vpop.f32.mrb[5].mxu0  ;;  %v9366_v3 = vpop.f32.mrb[5].mxu1  ;;  %v11095_v11 = vadd.f32 %v1158_v0, %v11043_v57 }
 0x32a   : > { %v1162_v5 = vpop.f32.mrb[6].mxu0  ;;  %v11066_v6 = vpop.f32.mrb[6].mxu1  ;;  %v11084_v10 = vadd.f32 %v1160_v2, %v11036_v52 }
 0x32b   : > { %v1164_v7 = vpop.f32.mrb[7].mxu0  ;;  %v9367_v8 = vpop.f32.mrb[7].mxu1  ;;  %v11113_v14 = vadd.f32 %v1162_v5, %v11043_v57 }
 0x32c   : > { %2142 = vrot.lane.b32.xlu0 %v11064_v4, %s10481_s11  ;;  %1240 = vrot.lane.b32.xlu1 %v11055_v63, %s10481_s11  ;;  %v11102_v13 = vadd.f32 %v1164_v7, %v11036_v52  ;;  %v11151_v7 = vrot.slane %v11030_v49, %v13294_v45 }
 0x330   : > { %2178 = vrot.lane.b32.xlu0 %v11064_v4, %s10482_s20  ;;  %1276 = vrot.lane.b32.xlu1 %v11055_v63, %s10482_s20 }
 0x334   : > { %1260 = vrot.lane.b32.xlu0 %v11077_v9, %s10480_s5  ;;  %2160 = vrot.lane.b32.xlu1 %v11064_v4, %s10480_s5 }
 0x338   : > { %2144 = vrot.lane.b32.xlu0 %v11084_v10, %s10481_s11  ;;  %1242 = vrot.lane.b32.xlu1 %v11077_v9, %s10481_s11 }
 0x33c   : > { %2180 = vrot.lane.b32.xlu0 %v11084_v10, %s10482_s20  ;;  %1278 = vrot.lane.b32.xlu1 %v11077_v9, %s10482_s20 }
 0x340   : > { %1262 = vrot.lane.b32.xlu0 %v11095_v11, %s10480_s5  ;;  %2162 = vrot.lane.b32.xlu1 %v11084_v10, %s10480_s5 }
 0x344   : > { %2146 = vrot.lane.b32.xlu0 %v11102_v13, %s10481_s11  ;;  %1244 = vrot.lane.b32.xlu1 %v11095_v11, %s10481_s11 }
 0x348   : > { %2182 = vrot.lane.b32.xlu0 %v11102_v13, %s10482_s20  ;;  %1280 = vrot.lane.b32.xlu1 %v11095_v11, %s10482_s20 }
 0x34c   : > { %1264 = vrot.lane.b32.xlu0 %v11113_v14, %s10480_s5  ;;  %2164 = vrot.lane.b32.xlu1 %v11102_v13, %s10480_s5 }
 0x350   : > { %1246 = vrot.lane.b32.xlu1 %v11113_v14, %s10481_s11 }
 0x354   : > { %1282 = vrot.lane.b32.xlu1 %v11113_v14, %s10482_s20 }
 0x396   : > { %v2159_v19 = vpop.permute.xlu1 %2158  ;;  %v2141_v20 = vpop.permute.xlu0 %2140 }
 0x397   : > { %v2194_v25 = vcombine.low %v11046_v58, %v2159_v19  ;;  %v2195_v24 = vcombine.high %v11046_v58, %v2159_v19 }
 0x399   : > { %v2202_v32 = vrot.slane %v2194_v25, %v11124_v23  ;;  %v2209_v36 = vrot.slane %v2195_v24, %v11124_v23 }
 0x39a   : > { %v2177_v27 = vpop.permute.xlu1 %2176  ;;  %v1259_v18 = vpop.permute.xlu0 %1258 }
 0x39b   : > { %v2210_v29 = vcombine.low %v2141_v20, %v2177_v27  ;;  %v2211_v31 = vcombine.high %v2141_v20, %v2177_v27  ;;  %v1294_v41 = vcombine.low %v11055_v63, %v1259_v18  ;;  %v1295_v42 = vcombine.high %v11055_v63, %v1259_v18 }
 0x39d   : > { %v2218_v26 = vrot.slane %v2210_v29, %v11124_v23  ;;  %v2225_v33 = vrot.slane %v2211_v31, %v11124_v23  ;;  %v1302_v62 = vrot.slane %v1294_v41, %v11124_v23  ;;  %v1309_v0 = vrot.slane %v1295_v42, %v11124_v23 }
 0x39e   : > { %v11131_v30 = vpop.permute.xlu0 %2142  ;;  %v1241_v34 = vpop.permute.xlu1 %1240  ;;  %v11160_v29 = vadd.f32 %v11038_v54, %v11151_v7 }
 0x39f   : > { %v2226_v37 = vcombine.low %v2202_v32, %v2218_v26  ;;  %v2227_v38 = vcombine.high %v2202_v32, %v2218_v26  ;;  %v2242_v39 = vcombine.low %v2209_v36, %v2225_v33  ;;  %v2243_v40 = vcombine.high %v2209_v36, %v2225_v33 }
 0x3a1   : > { %v2234_v53 = vrot.slane %v2226_v37, %v11134_v35  ;;  %v2241_v55 = vrot.slane %v2227_v38, %v11134_v35  ;;  %v2250_v59 = vrot.slane %v2242_v39, %v11134_v35  ;;  %v2257_v61 = vrot.slane %v2243_v40, %v11134_v35 }
 0x3a2   : > { %v2179_v43 = vpop.permute.xlu0 %2178  ;;  %v1277_v44 = vpop.permute.xlu1 %1276  ;;  %v11169_v39 = vadd.f32 %v11048_v60, %v11151_v7 }
 0x3a3   : > { %v1310_v56 = vcombine.low %v1241_v34, %v1277_v44  ;;  %v1311_v58 = vcombine.high %v1241_v34, %v1277_v44  ;;  %v2602_v8 = vcombine.low %v2234_v53, %v2241_v55  ;;  %v8988_v20 = vcombine.high %v2234_v53, %v2241_v55 }
 0x3a4   : > { %v2618_v21 = vcombine.low %v2250_v59, %v2257_v61  ;;  %v8989_v22 = vcombine.high %v2250_v59, %v2257_v61  ;;  %v2278_v31 = vcombine.low %v11131_v30, %v2179_v43  ;;  %v2279_v32 = vcombine.high %v11131_v30, %v2179_v43 }
 0x3a5   : > { %v1318_v63 = vrot.slane %v1310_v56, %v11124_v23  ;;  %v1325_v2 = vrot.slane %v1311_v58, %v11124_v23  ;;  %v11174_v41 = vrot.slane %v2602_v8, %v11124_v23  ;;  %v11178_v42 = vrot.slane %v8988_v20, %v11124_v23 }
 0x3a6   : > { %v1261_v3 = vpop.permute.xlu0 %1260  ;;  %v2161_v5 = vpop.permute.xlu1 %2160  ;;  %v11181_v43 = vrot.slane %v2618_v21, %v11124_v23  ;;  %v11184_v44 = vrot.slane %v8989_v22, %v11124_v23  ;;  %v11200_v56 = vadd.f32 %v11057_v1, %v11151_v7  ;;  %v2286_v58 = vrot.slane %v2278_v31, %v11124_v23 }
 0x3a7   : > { %v1326_v15 = vcombine.low %v1302_v62, %v1318_v63  ;;  %v1327_v16 = vcombine.high %v1302_v62, %v1318_v63  ;;  %v1342_v17 = vcombine.low %v1309_v0, %v1325_v2  ;;  %v1343_v19 = vcombine.high %v1309_v0, %v1325_v2 }
 0x3a8   : > { %v2262_v25 = vcombine.low %v11064_v4, %v2161_v5  ;;  %v2263_v26 = vcombine.high %v11064_v4, %v2161_v5  ;;  %v1362_v40 = vcombine.low %v11077_v9, %v1261_v3  ;;  %v1363_v54 = vcombine.high %v11077_v9, %v1261_v3 }
 0x3a9   : > { %v1334_v27 = vrot.slane %v1326_v15, %v11134_v35  ;;  %v1341_v18 = vrot.slane %v1327_v16, %v11134_v35  ;;  %v1350_v28 = vrot.slane %v1342_v17, %v11134_v35  ;;  %v1357_v24 = vrot.slane %v1343_v19, %v11134_v35 }
 0x3aa   : > { %v1243_v49 = vpop.permute.xlu1 %1242  ;;  %v11165_v33 = vpop.permute.xlu0 %2144  ;;  %v2270_v30 = vrot.slane %v2262_v25, %v11124_v23  ;;  %v2293_v59 = vrot.slane %v2279_v32, %v11124_v23  ;;  %v2277_v61 = vrot.slane %v2263_v26, %v11124_v23  ;;  %v1370_v62 = vrot.slane %v1362_v40, %v11124_v23 }
 0x3ab   : > { %v1702_v34 = vcombine.low %v1334_v27, %v1341_v18  ;;  %v8976_v36 = vcombine.high %v1334_v27, %v1341_v18  ;;  %v1718_v37 = vcombine.low %v1350_v28, %v1357_v24  ;;  %v8977_v38 = vcombine.high %v1350_v28, %v1357_v24 }
 0x3ac   : > { %v1377_v0 = vrot.slane %v1363_v54, %v11124_v23  ;;  %v2294_v5 = vcombine.low %v2270_v30, %v2286_v58  ;;  %v2295_v8 = vcombine.high %v2270_v30, %v2286_v58  ;;  %v2634_v1 = vcombine.low %v11174_v41, %v11178_v42 }
 0x3ad   : > { %v11187_v60 = vrot.slane %v1702_v34, %v11124_v23  ;;  %v11190_v9 = vrot.slane %v8976_v36, %v11124_v23  ;;  %v11193_v53 = vrot.slane %v1718_v37, %v11124_v23  ;;  %v11196_v55 = vrot.slane %v8977_v38, %v11124_v23 }
 0x3ae   : > { %v1279_v4 = vpop.permute.xlu1 %1278  ;;  %v11207_v63 = vpop.permute.xlu0 %2180  ;;  %v2650_v15 = vcombine.low %v11181_v43, %v11184_v44  ;;  %v2310_v22 = vcombine.low %v2277_v61, %v2293_v59  ;;  %v2311_v25 = vcombine.high %v2277_v61, %v2293_v59  ;;  %v11222_v27 = vrot.slane %v2634_v1, %v11134_v35 }
 0x3af   : > { %v1378_v2 = vcombine.low %v1243_v49, %v1279_v4  ;;  %v1379_v3 = vcombine.high %v1243_v49, %v1279_v4  ;;  %v1734_v17 = vcombine.low %v11187_v60, %v11190_v9  ;;  %v1750_v19 = vcombine.low %v11193_v53, %v11196_v55 }
 0x3b0   : > { %v2658_v18 = vrot.slane %v2650_v15, %v11134_v35  ;;  %v11226_v32 = vrot.slane %v2294_v5, %v11134_v35  ;;  %v11229_v26 = vrot.slane %v2295_v8, %v11134_v35  ;;  %v2346_v40 = vcombine.low %v11165_v33, %v11207_v63 }
 0x3b1   : > { %v1386_v20 = vrot.slane %v1378_v2, %v11124_v23  ;;  %v1393_v21 = vrot.slane %v1379_v3, %v11124_v23  ;;  %v11235_v37 = vrot.slane %v1734_v17, %v11134_v35  ;;  %v11238_v38 = vrot.slane %v1750_v19, %v11134_v35 }
 0x3b2   : > { %v11213_v16 = vpop.permute.xlu1 %2162  ;;  %v2666_v34 = vcombine.low %v11222_v27, %v2658_v18  ;;  %v1263_v54 = vpop.permute.xlu0 %1262  ;;  %v11245_v4 = vrot.slane %v2310_v22, %v11134_v35  ;;  %v11254_v2 = vrot.slane %v2311_v25, %v11134_v35  ;;  %v11261_v17 = vadd.f32 %v11066_v6, %v11151_v7 }
 0x3b3   : > { %v1394_v28 = vcombine.low %v1370_v62, %v1386_v20  ;;  %v1395_v24 = vcombine.high %v1370_v62, %v1386_v20  ;;  %v1410_v49 = vcombine.low %v1377_v0, %v1393_v21  ;;  %v1411_v31 = vcombine.high %v1377_v0, %v1393_v21 }
 0x3b4   : > { %v2330_v36 = vcombine.low %v11084_v10, %v11213_v16  ;;  %v3010_v61 = vpack.c.bf16 %v2666_v34, %v2666_v34  ;;  %v2670_v19 = vcombine.low %v11226_v32, %v11229_v26  ;;  %v2347_v20 = vcombine.high %v11165_v33, %v11207_v63 }
 0x3b5   : > { %v1402_v58 = vrot.slane %v1394_v28, %v11134_v35  ;;  %v1409_v59 = vrot.slane %v1395_v24, %v11134_v35  ;;  %v1418_v3 = vrot.slane %v1410_v49, %v11134_v35  ;;  %v1425_v5 = vrot.slane %v1411_v31, %v11134_v35 }
 0x3b6   : > { %v11242_v30 = vpop.permute.xlu1 %1244  ;;  %v2338_v8 = vrot.slane %v2330_v36, %v11124_v23  ;;  %v3939_v21 = vsel %vm3934_vm1, %v3010_v61, 0  ;;  %v2354_v28 = vrot.slane %v2346_v40, %v11124_v23  ;;  %v1430_v24 = vcombine.low %v11095_v11, %v1263_v54 }
 0x3b7   : > { %9373 = vmatpush3.bf16.xpose.msra.mxu1 %v3939_v21  ;;  %v2331_v6 = vcombine.high %v11084_v10, %v11213_v16  ;;  %v1766_v49 = vcombine.low %v11235_v37, %v11238_v38  ;;  %v8990_v33 = vcombine.high %v11226_v32, %v11229_v26  ;;  %v1770_v63 = vcombine.low %v1402_v58, %v1409_v59 }
 0x3b8   : > { %v11249_v62 = vpop.f32.mrb[8].mxu0  ;;  %v11251_v0 = vpop.f32.mrb[8].mxu1  ;;  %v8978_v31 = vcombine.high %v1402_v58, %v1409_v59  ;;  %v1431_v34 = vcombine.high %v11095_v11, %v1263_v54  ;;  %9378 = vmatprep.subr.bf16.mxu1 %v13299_v12  ;;  %v2686_v61 = vcombine.low %v11245_v4, %v11254_v2  ;;  %v8979_v10 = vcombine.high %v1418_v3, %v1425_v5 }
 0x3b9   : > { %v1170_v1 = vpop.f32.mrb[9].mxu0  ;;  %v9370_v15 = vpop.f32.mrb[9].mxu1  ;;  %v2362_v16 = vcombine.low %v2338_v8, %v2354_v28  ;;  %v8991_v11 = vcombine.high %v11245_v4, %v11254_v2  ;;  %v2363_v26 = vcombine.high %v2338_v8, %v2354_v28  ;;  %v2361_v58 = vrot.slane %v2347_v20, %v11124_v23 }
 0x3ba   : > { %v11268_v22 = vpop.f32.mrb[10].mxu0  ;;  %v11270_v25 = vpop.f32.mrb[10].mxu1  ;;  %v1786_v15 = vcombine.low %v1418_v3, %v1425_v5  ;;  %v1438_v59 = vrot.slane %v1430_v24, %v11124_v23  ;;  %v2110_v3 = vpack.c.bf16 %v1766_v49, %v1766_v49  ;;  %v11298_v48 = vrot.slane %v1770_v63, %v11124_v23 }
 0x3bb   : > { %v11282_v36 = vpop.f32.mrb[11].mxu0  ;;  %v9371_v40 = vpop.f32.mrb[11].mxu1  ;;  %v11301_v45 = vrot.slane %v8978_v31, %v11124_v23  ;;  %v1445_v50 = vrot.slane %v1431_v34, %v11124_v23  ;;  %v2667_v4 = vcombine.high %v11222_v27, %v2658_v18  ;;  %v11309_v8 = vrot.slane %v8979_v10, %v11124_v23 }
 0x3bc   : > { %v11292_v54 = vpop.permute.xlu0 %2146  ;;  %v2345_v40 = vrot.slane %v2331_v6, %v11124_v23  ;;  %v1281_v5 = vpop.permute.xlu1 %1280  ;;  %v11306_v2 = vrot.slane %v1786_v15, %v11124_v23  ;;  %v11312_v20 = vrot.slane %v2362_v16, %v11134_v35  ;;  %v11315_v28 = vadd.f32 %v1170_v1, %v11036_v52 }
 0x3bd   : > { %v11318_v24 = vrot.slane %v2363_v26, %v11134_v35  ;;  %v3011_v6 = vpack.c.bf16 %v2667_v4, %v2667_v4  ;;  %v1446_v27 = vcombine.low %v11242_v30, %v1281_v5  ;;  %v1447_v18 = vcombine.high %v11242_v30, %v1281_v5 }
 0x3be   : > { %9375 = vmatmul.mubr.msk.bf16.vlgmr.msra.gmra.mrb[12].mxu1 %vm3934_vm1, %v2110_v3  ;;  %v2378_v49 = vcombine.low %v2345_v40, %v2361_v58  ;;  %v2379_v63 = vcombine.high %v2345_v40, %v2361_v58  ;;  %2148 = vrot.lane.b32.xlu0 %v11315_v28, %s10481_s11  ;;  %v11328_v1 = vrot.slane %v2670_v19, %v11124_v23 }
 0x3bf   : > { %2166 = vrot.lane.b32.xlu1 %v11315_v28, %s10480_s5  ;;  %v1802_v31 = vcombine.low %v11298_v48, %v11301_v45  ;;  %v3985_v34 = vsel %vm3934_vm1, %v3011_v6, 0  ;;  %v1454_v10 = vrot.slane %v1446_v27, %v11124_v23  ;;  %v1461_v30 = vrot.slane %v1447_v18, %v11124_v23  ;;  %9380 = vmatprep.mubr.msk.bf16.mxu1 %vm10479_vm0, %v13299_v12 }
 0x3c0   : > { %v2183_v15 = vpop.permute.xlu0 %2182  ;;  %9379 = vmatpush3.bf16.xpose.msra.mxu1 %v3985_v34  ;;  %v11340_v19 = vrot.slane %v8990_v33, %v11124_v23  ;;  %v11343_v26 = vrot.slane %v2686_v61, %v11124_v23  ;;  %v11346_v58 = vrot.slane %v8991_v11, %v11124_v23  ;;  %v1818_v40 = vcombine.low %v11306_v2, %v11309_v8  ;;  %v2165_v6 = vpop.permute.xlu1 %2164 }
 0x3c1   : > { %v11352_v3 = vadd.f32 %v11249_v62, %v11043_v57  ;;  %v1462_v5 = vcombine.low %v1438_v59, %v1454_v10  ;;  %v1463_v4 = vcombine.high %v1438_v59, %v1454_v10  ;;  %9384 = vmatprep.subr.bf16.mxu1 %v13299_v12  ;;  %v1478_v33 = vcombine.low %v1445_v50, %v1461_v30 }
 0x3c2   : > { %v1479_v27 = vcombine.high %v1445_v50, %v1461_v30  ;;  %v2702_v61 = vcombine.low %v11328_v1, %v11340_v19  ;;  %v2718_v11 = vcombine.low %v11343_v26, %v11346_v58  ;;  %2184 = vrot.lane.b32.xlu0 %v11315_v28, %s10482_s20  ;;  %v11364_v18 = vrot.slane %v2378_v49, %v11134_v35 }
 0x3c3   : > { %v11367_v59 = vrot.slane %v2379_v63, %v11134_v35  ;;  %1248 = vrot.lane.b32.xlu1 %v11352_v3, %s10481_s11  ;;  %v11374_v34 = vrot.slane %v1802_v31, %v11134_v35  ;;  %v11385_v63 = vrot.slane %v1818_v40, %v11134_v35  ;;  %v2414_v51 = vcombine.low %v11292_v54, %v2183_v15 }
 0x3c4   : > { %v11379_v30 = vrot.slane %v2702_v61, %v11134_v35  ;;  %v11382_v49 = vrot.slane %v2718_v11, %v11134_v35  ;;  %v2415_v46 = vcombine.high %v11292_v54, %v2183_v15  ;;  %v1470_v50 = vrot.slane %v1462_v5, %v11134_v35  ;;  %v1265_v31 = vpop.permute.xlu0 %1264 }
 0x3c5   : > { %v1477_v62 = vrot.slane %v1463_v4, %v11134_v35  ;;  %v1486_v10 = vrot.slane %v1478_v33, %v11134_v35  ;;  %v1493_v61 = vrot.slane %v1479_v27, %v11134_v35  ;;  %v2398_v15 = vcombine.low %v11102_v13, %v2165_v6  ;;  %v11404_v4 = vpop.permute.xlu1 %1246 }
 0x3c6   : > { %v2734_v11 = vcombine.low %v11379_v30, %v11382_v49  ;;  %1266 = vrot.lane.b32.xlu0 %v11352_v3, %s10480_s5  ;;  %v1767_v5 = vcombine.high %v11235_v37, %v11238_v38  ;;  %v11410_v33 = vadd.f32 %v11282_v36, %v11036_v52  ;;  %v1498_v40 = vcombine.low %v11113_v14, %v1265_v31 }
 0x3c7   : > { %1284 = vrot.lane.b32.xlu1 %v11352_v3, %s10482_s20  ;;  %v1499_v16 = vcombine.high %v11113_v14, %v1265_v31  ;;  %v11416_v54 = vadd.f32 %v11268_v22, %v11043_v57  ;;  %v2422_v37 = vrot.slane %v2414_v51, %v11124_v23  ;;  %v11420_v38 = vrot.slane %v2415_v46, %v11124_v23 }
 0x3c8   : > { %v3014_v27 = vpack.c.bf16 %v2734_v11, %v2734_v11  ;;  %v2399_v32 = vcombine.high %v11102_v13, %v2165_v6  ;;  %v1838_v21 = vcombine.low %v1470_v50, %v1477_v62  ;;  %v8980_v12 = vcombine.high %v1470_v50, %v1477_v62 }
 0x3c9   : > { %v1854_v52 = vcombine.low %v1486_v10, %v1493_v61  ;;  %v2406_v14 = vrot.slane %v2398_v15, %v11124_v23  ;;  %v2111_v57 = vpack.c.bf16 %v1767_v5, %v1767_v5  ;;  %v2635_v51 = vcombine.high %v11174_v41, %v11178_v42 }
 0x3ca   : > { %v4123_v36 = vsel %vm3934_vm1, %v3014_v27, 0  ;;  %2150 = vrot.lane.b32.xlu0 %v11410_v33, %s10481_s11  ;;  %v2651_v46 = vcombine.high %v11181_v43, %v11184_v44  ;;  %v8981_v22 = vcombine.high %v1486_v10, %v1493_v61  ;;  %v11432_v13 = vrot.slane %v1498_v40, %v11124_v23  ;;  %v1283_v44 = vpop.permute.xlu1 %1282 }
 0x3cb   : > { %9397 = vmatpush3.bf16.xpose.msra.mxu0 %v4123_v36  ;;  %v11435_v6 = vrot.slane %v1499_v16, %v11124_v23  ;;  %v1834_v62 = vcombine.low %v11374_v34, %v11385_v63  ;;  %v13350_v50 = vmov 0.0   ;;  %v2413_v31 = vrot.slane %v2399_v32, %v11124_v23  ;;  %9381 = vmatmul.mubr.msk.bf16.vlgmr.msra.gmra.mrb[16].mxu1 %vm3934_vm1, %v2111_v57 }
 0x3cc   : > { %9408 = vmatprep.subr.bf16.mxu0 %v13350_v50  ;;  %v2649_v41 = vrot.slane %v2635_v51, %v11134_v35  ;;  %v2665_v42 = vrot.slane %v2651_v46, %v11134_v35  ;;  %v2703_v43 = vcombine.high %v11328_v1, %v11340_v19  ;;  %v11447_v16 = vrot.slane %v1838_v21, %v11124_v23 }
 0x3cd   : > { %v11450_v10 = vrot.slane %v8980_v12, %v11124_v23  ;;  %v2114_v61 = vpack.c.bf16 %v1834_v62, %v1834_v62  ;;  %v2719_v32 = vcombine.high %v11343_v26, %v11346_v58  ;;  %9386 = vmatprep.mubr.msk.bf16.mxu1 %vm10479_vm0, %v13350_v50  ;;  %v11457_v11 = vrot.slane %v1854_v52, %v11124_v23 }
 0x3ce   : > { %v2430_v40 = vcombine.low %v2406_v14, %v2422_v37  ;;  %v2668_v15 = vcombine.low %v2649_v41, %v2665_v42  ;;  %v11460_v1 = vrot.slane %v2703_v43, %v11134_v35  ;;  %2168 = vrot.lane.b32.xlu1 %v11410_v33, %s10480_s5  ;;  %v11465_v12 = vrot.slane %v8981_v22, %v11124_v23 }
 0x3cf   : > { %v2431_v21 = vcombine.high %v2406_v14, %v2422_v37  ;;  %v11468_v19 = vrot.slane %v2719_v32, %v11134_v35  ;;  %v1514_v26 = vcombine.low %v11404_v4, %v1283_v44  ;;  %2186 = vrot.lane.b32.xlu0 %v11410_v33, %s10482_s20  ;;  %v2446_v58 = vcombine.low %v2413_v31, %v11420_v38 }
 0x3d0   : > { %v3012_v5 = vpack.c.bf16 %v2668_v15, %v2668_v15  ;;  %v13351_v27 = vcombine.high %v11187_v60, %v11190_v9  ;;  %v13352_v37 = vcombine.high %v11193_v53, %v11196_v55  ;;  %v1870_v14 = vcombine.low %v11447_v16, %v11450_v10 }
 0x3d1   : > { %v2447_v57 = vcombine.high %v2413_v31, %v11420_v38  ;;  %v2736_v51 = vcombine.low %v11460_v1, %v11468_v19  ;;  %v1515_v46 = vcombine.high %v11404_v4, %v1283_v44  ;;  %v1871_v60 = vcombine.high %v11447_v16, %v11450_v10 }
 0x3d2   : > { %v1749_v52 = vrot.slane %v13351_v27, %v11134_v35  ;;  %v1765_v36 = vrot.slane %v13352_v37, %v11134_v35  ;;  %9399 = vmatmul.mubr.msk.bf16.vlgmr.msra.gmra.mrb[12].mxu0 %vm3934_vm1, %v2114_v61  ;;  %v11492_v9 = vrot.slane %v2430_v40, %v11134_v35  ;;  %v4031_v53 = vsel %vm3934_vm1, %v3012_v5, 0  ;;  %1250 = vrot.lane.b32.xlu1 %v11416_v54, %s10481_s11 }
 0x3d3   : > { %v2669_v55 = vcombine.high %v2649_v41, %v2665_v42  ;;  %9410 = vmatprep.mubr.msk.bf16.mxu0 %vm10479_vm0, %v13350_v50  ;;  %v11500_v38 = vrot.slane %v2431_v21, %v11134_v35  ;;  %9385 = vmatpush3.bf16.xpose.msra.mxu1 %v4031_v53  ;;  %v3016_v4 = vpack.c.bf16 %v2736_v51, %v2736_v51 }
 0x3d4   : > { %v1522_v22 = vrot.slane %v1514_v26, %v11124_v23  ;;  %v13353_v62 = vcombine.high %v11298_v48, %v11301_v45  ;;  %v11510_v41 = vrot.slane %v2446_v58, %v11134_v35  ;;  %v1768_v42 = vcombine.low %v1749_v52, %v1765_v36  ;;  %9390 = vmatprep.subr.bf16.mxu1 %v13350_v50 }
 0x3d5   : > { %v13354_v43 = vcombine.high %v11306_v2, %v11309_v8  ;;  %1268 = vrot.lane.b32.xlu0 %v11416_v54, %s10480_s5  ;;  %v11522_v61 = vrot.slane %v2447_v57, %v11134_v35  ;;  %v4215_v48 = vsel %vm3934_vm1, %v3016_v4, 0  ;;  %v1529_v45 = vrot.slane %v1515_v46, %v11124_v23 }
 0x3d6   : > { %v11507_v31 = vrot.slane %v13353_v62, %v11134_v35  ;;  %v13355_v32 = vcombine.low %v11312_v20, %v11318_v24  ;;  %v1886_v2 = vcombine.low %v11457_v11, %v11465_v12  ;;  %v1887_v8 = vcombine.high %v11457_v11, %v11465_v12  ;;  %9409 = vmatpush3.bf16.xpose.msra.mxu0 %v4215_v48 }
 0x3d7   : > { %v11517_v44 = vrot.slane %v13354_v43, %v11134_v35  ;;  %v3013_v15 = vpack.c.bf16 %v2669_v55, %v2669_v55  ;;  %v13356_v21 = vcombine.high %v11312_v20, %v11318_v24  ;;  %v1530_v58 = vcombine.low %v11432_v13, %v1522_v22  ;;  %9420 = vmatprep.subr.bf16.mxu0 %v13350_v50 }
 0x3d8   : > { %v2745_v40 = vrot.slane %v13355_v32, %v11124_v23  ;;  %v13357_v27 = vcombine.low %v11364_v18, %v11367_v59  ;;  %v13358_v57 = vcombine.high %v11364_v18, %v11367_v59  ;;  %v2806_v20 = vcombine.low %v11492_v9, %v11500_v38  ;;  %1286 = vrot.lane.b32.xlu1 %v11416_v54, %s10482_s20 }
 0x3d9   : > { %v2753_v26 = vrot.slane %v13356_v21, %v11124_v23  ;;  %v1836_v5 = vcombine.low %v11507_v31, %v11517_v44  ;;  %v1531_v24 = vcombine.high %v11432_v13, %v1522_v22  ;;  %v2112_v46 = vpack.c.bf16 %v1768_v42, %v1768_v42  ;;  %3040 = vrot.lane.b32.xlu0 %v11160_v29, %s10481_s11 }
 0x3da   : > { %v2761_v37 = vrot.slane %v13357_v27, %v11124_v23  ;;  %v2769_v51 = vrot.slane %v13358_v57, %v11124_v23  ;;  %v8994_v55 = vcombine.high %v11492_v9, %v11500_v38  ;;  %v2822_v4 = vcombine.low %v11510_v41, %v11522_v61 }
 0x3db   : > { %v2770_v53 = vcombine.low %v2745_v40, %v2753_v26  ;;  %v1546_v62 = vcombine.low %v11435_v6, %v1529_v45  ;;  %v1547_v59 = vcombine.high %v11435_v6, %v1529_v45  ;;  %9387 = vmatmul.mubr.msk.bf16.vlgmr.msra.gmra.mrb[20].mxu1 %vm3934_vm1, %v2112_v46  ;;  %v4077_v13 = vsel %vm3934_vm1, %v3013_v15, 0 }
 0x3dc   : > { %v2786_v18 = vcombine.low %v2761_v37, %v2769_v51  ;;  %v2735_v9 = vcombine.high %v11379_v30, %v11382_v49  ;;  %v1538_v38 = vrot.slane %v1530_v58, %v11134_v35  ;;  %9391 = vmatpush3.bf16.xpose.msra.mxu1 %v4077_v13  ;;  %v2116_v42 = vpack.c.bf16 %v1836_v5, %v1836_v5 }
 0x3dd   : > { %v11566_v22 = vrot.slane %v2770_v53, %v11134_v35  ;;  %9392 = vmatprep.mubr.msk.bf16.mxu1 %vm10479_vm0, %v13350_v50  ;;  %v1545_v6 = vrot.slane %v1531_v24, %v11134_v35  ;;  %v1769_v48 = vcombine.high %v1749_v52, %v1765_v36  ;;  %9402 = vmatprep.subr.bf16.mxu1 %v13350_v50 }
 0x3de   : > { %v11572_v43 = vrot.slane %v2786_v18, %v11134_v35  ;;  %3058 = vrot.lane.b32.xlu1 %v11160_v29, %s10480_s5  ;;  %v2771_v45 = vcombine.high %v2745_v40, %v2753_v26  ;;  %v8995_v30 = vcombine.high %v11510_v41, %v11522_v61  ;;  %9411 = vmatmul.mubr.msk.bf16.vlgmr.msra.gmra.mrb[16].mxu0 %vm3934_vm1, %v2116_v42 }
 0x3df   : > { %v2787_v32 = vcombine.high %v2761_v37, %v2769_v51  ;;  %3060 = vrot.lane.b32.xlu0 %v11169_v39, %s10480_s5  ;;  %v1554_v52 = vrot.slane %v1546_v62, %v11134_v35  ;;  %v1561_v36 = vrot.slane %v1547_v59, %v11134_v35  ;;  %v3015_v15 = vpack.c.bf16 %v2735_v9, %v2735_v9 }
 0x3e0   : > { %v2802_v49 = vcombine.low %v11566_v22, %v11572_v43  ;;  %9422 = vmatprep.mubr.msk.bf16.mxu0 %vm10479_vm0, %v13350_v50  ;;  %v11592_v40 = vrot.slane %v2771_v45, %v11134_v35  ;;  %v11598_v61 = vrot.slane %v1870_v14, %v11134_v35  ;;  %v11601_v21 = vrot.slane %v1886_v2, %v11134_v35 }
 0x3e1   : > { %v11604_v26 = vrot.slane %v2787_v32, %v11134_v35  ;;  %v1906_v58 = vcombine.low %v1538_v38, %v1545_v6  ;;  %v8982_v5 = vcombine.high %v1538_v38, %v1545_v6  ;;  %v2113_v27 = vpack.c.bf16 %v1769_v48, %v1769_v48 }
 0x3e2   : > { %v3018_v41 = vpack.c.bf16 %v2802_v49, %v2802_v49  ;;  %3076 = vrot.lane.b32.xlu1 %v11160_v29, %s10482_s20  ;;  %v2813_v37 = vrot.slane %v2806_v20, %v11124_v23  ;;  %v2821_v2 = vrot.slane %v8994_v55, %v11124_v23  ;;  %v2829_v51 = vrot.slane %v2822_v4, %v11124_v23 }
 0x3e3   : > { %v2804_v14 = vcombine.low %v11592_v40, %v11604_v26  ;;  %3044 = vrot.lane.b32.xlu0 %v11200_v56, %s10481_s11  ;;  %v1922_v24 = vcombine.low %v1554_v52, %v1561_v36  ;;  %9393 = vmatmul.mubr.msk.bf16.vlgmr.msra.gmra.mrb[24].mxu1 %vm3934_vm1, %v2113_v27  ;;  %v4169_v46 = vsel %vm3934_vm1, %v3015_v15, 0  ;;  %v2737_v20 = vcombine.high %v11460_v1, %v11468_v19 }
 0x3e4   : > { %v4307_v57 = vsel %vm3934_vm1, %v3018_v41, 0  ;;  %v2837_v53 = vrot.slane %v8995_v30, %v11124_v23  ;;  %v8983_v62 = vcombine.high %v1554_v52, %v1561_v36  ;;  %9403 = vmatpush3.bf16.xpose.msra.mxu1 %v4169_v46  ;;  %v1902_v18 = vcombine.low %v11598_v61, %v11601_v21  ;;  %9404 = vmatprep.mubr.msk.bf16.mxu1 %vm10479_vm0, %v13350_v50 }
 0x3e5   : > { %9421 = vmatpush3.bf16.xpose.msra.mxu0 %v4307_v57  ;;  %v2838_v55 = vcombine.low %v2813_v37, %v2821_v2  ;;  %v1835_v4 = vcombine.high %v11374_v34, %v11385_v63  ;;  %9414 = vmatprep.subr.bf16.mxu1 %v13350_v50  ;;  %v11630_v1 = vrot.slane %v1906_v58, %v11124_v23 }
 0x3e6   : > { %9432 = vmatprep.subr.bf16.mxu0 %v13350_v50  ;;  %v2854_v59 = vcombine.low %v2829_v51, %v2837_v53  ;;  %v3020_v19 = vpack.c.bf16 %v2804_v14, %v2804_v14  ;;  %3042 = vrot.lane.b32.xlu1 %v11169_v39, %s10481_s11  ;;  %v1921_v9 = vrot.slane %v8982_v5, %v11124_v23 }
 0x3e7   : > { %v11635_v13 = vrot.slane %v2838_v55, %v11134_v35  ;;  %3064 = vrot.lane.b32.xlu0 %v11261_v17, %s10480_s5  ;;  %v1929_v34 = vrot.slane %v1922_v24, %v11124_v23  ;;  %v3017_v63 = vpack.c.bf16 %v2737_v20, %v2737_v20  ;;  %v1937_v42 = vrot.slane %v8983_v62, %v11124_v23 }
 0x3e8   : > { %v11642_v38 = vrot.slane %v2854_v59, %v11134_v35  ;;  %v2118_v6 = vpack.c.bf16 %v1902_v18, %v1902_v18  ;;  %v11649_v48 = vrot.slane %v1871_v60, %v11134_v35  ;;  %v11655_v45 = vrot.slane %v1887_v8, %v11134_v35 }
 0x3e9   : > { %v2115_v30 = vpack.c.bf16 %v1835_v4, %v1835_v4  ;;  %v4399_v49 = vsel %vm3934_vm1, %v3020_v19, 0  ;;  %v2839_v16 = vcombine.high %v2813_v37, %v2821_v2  ;;  %v2855_v10 = vcombine.high %v2829_v51, %v2837_v53 }
 0x3ea   : > { %v2870_v32 = vcombine.low %v11635_v13, %v11642_v38  ;;  %3078 = vrot.lane.b32.xlu1 %v11169_v39, %s10482_s20  ;;  %v4261_v11 = vsel %vm3934_vm1, %v3017_v63, 0  ;;  %v2803_v12 = vcombine.high %v11566_v22, %v11572_v43  ;;  %v1938_v60 = vcombine.low %v11630_v1, %v1921_v9 }
 0x3eb   : > { %9405 = vmatmul.mubr.msk.bf16.vlgmr.msra.gmra.mrb[28].mxu1 %vm3934_vm1, %v2115_v30  ;;  %v1954_v8 = vcombine.low %v1929_v34, %v1937_v42  ;;  %v1904_v52 = vcombine.low %v11649_v48, %v11655_v45  ;;  %v1837_v36 = vcombine.high %v11507_v31, %v11517_v44  ;;  %v2853_v22 = vrot.slane %v2839_v16, %v11134_v35 }
 0x3ec   : > { %9423 = vmatmul.mubr.msk.bf16.vlgmr.msra.gmra.mrb[20].mxu0 %vm3934_vm1, %v2118_v6  ;;  %9415 = vmatpush3.bf16.xpose.msra.mxu1 %v4261_v11  ;;  %v3022_v15 = vpack.c.bf16 %v2870_v32, %v2870_v32  ;;  %v2869_v43 = vrot.slane %v2855_v10, %v11134_v35  ;;  %v3019_v41 = vpack.c.bf16 %v2803_v12, %v2803_v12 }
 0x3ed   : > { %9433 = vmatpush3.bf16.xpose.msra.mxu0 %v4399_v49  ;;  %9434 = vmatprep.mubr.msk.bf16.mxu0 %vm10479_vm0, %v13350_v50  ;;  %v2120_v58 = vpack.c.bf16 %v1904_v52, %v1904_v52  ;;  %v1946_v5 = vrot.slane %v1938_v60, %v11134_v35  ;;  %v1962_v27 = vrot.slane %v1954_v8, %v11134_v35 }
 0x3ee   : > { %9444 = vmatprep.subr.bf16.mxu0 %v13350_v50  ;;  %9416 = vmatprep.mubr.msk.bf16.mxu1 %vm10479_vm0, %v13350_v50  ;;  %v2117_v37 = vpack.c.bf16 %v1837_v36, %v1837_v36  ;;  %v4491_v31 = vsel %vm3934_vm1, %v3022_v15, 0  ;;  %v2872_v44 = vcombine.low %v2853_v22, %v2869_v43  ;;  %v4353_v57 = vsel %vm3934_vm1, %v3019_v41, 0 }
 0x3ef   : > { %9426 = vmatprep.subr.bf16.mxu1 %v13350_v50  ;;  %3062 = vrot.lane.b32.xlu1 %v11200_v56, %s10480_s5  ;;  %v2805_v14 = vcombine.high %v11592_v40, %v11604_v26  ;;  %v1939_v2 = vcombine.high %v11630_v1, %v1921_v9  ;;  %v1955_v51 = vcombine.high %v1929_v34, %v1937_v42 }
 0x3f0   : > { %v1970_v24 = vcombine.low %v1946_v5, %v1962_v27  ;;  %v1903_v46 = vcombine.high %v11598_v61, %v11601_v21  ;;  %v3024_v20 = vpack.c.bf16 %v2872_v44, %v2872_v44  ;;  %v2871_v21 = vcombine.high %v11635_v13, %v11642_v38 }
 0x3f1   : > { %v3021_v40 = vpack.c.bf16 %v2805_v14, %v2805_v14  ;;  %v1953_v53 = vrot.slane %v1939_v2, %v11134_v35  ;;  %v1969_v62 = vrot.slane %v1955_v51, %v11134_v35  ;;  %v1905_v59 = vcombine.high %v11649_v48, %v11655_v45 }
 0x3f2   : > { %v2122_v26 = vpack.c.bf16 %v1970_v24, %v1970_v24  ;;  %v2119_v18 = vpack.c.bf16 %v1903_v46, %v1903_v46  ;;  %v4583_v55 = vsel %vm3934_vm1, %v3024_v20, 0  ;;  %v3023_v1 = vpack.c.bf16 %v2871_v21, %v2871_v21 }
 0x3f3   : > { %3080 = vrot.lane.b32.xlu1 %v11200_v56, %s10482_s20  ;;  %9417 = vmatmul.mubr.msk.bf16.vlgmr.msra.gmra.mrb[32].mxu1 %vm3934_vm1, %v2117_v37  ;;  %v4445_v61 = vsel %vm3934_vm1, %v3021_v40, 0  ;;  %v1972_v4 = vcombine.low %v1953_v53, %v1969_v62  ;;  %v2121_v9 = vpack.c.bf16 %v1905_v59, %v1905_v59  ;;  %v2873_v34 = vcombine.high %v2853_v22, %v2869_v43 }
 0x3f4   : > { %9435 = vmatmul.mubr.msk.bf16.vlgmr.msra.gmra.mrb[24].mxu0 %vm3934_vm1, %v2120_v58  ;;  %9427 = vmatpush3.bf16.xpose.msra.mxu1 %v4353_v57  ;;  %v4537_v13 = vsel %vm3934_vm1, %v3023_v1, 0  ;;  %v1971_v63 = vcombine.high %v1946_v5, %v1962_v27  ;;  %v1973_v48 = vcombine.high %v1953_v53, %v1969_v62 }
 0x3f5   : > { %9445 = vmatpush3.bf16.xpose.msra.mxu0 %v4491_v31  ;;  %9446 = vmatprep.mubr.msk.bf16.mxu0 %vm10479_vm0, %v13350_v50  ;;  %v2124_v19 = vpack.c.bf16 %v1972_v4, %v1972_v4  ;;  %v3025_v38 = vpack.c.bf16 %v2873_v34, %v2873_v34 }
 0x3f6   : > { %9456 = vmatprep.subr.bf16.mxu0 %v13350_v50  ;;  %9428 = vmatprep.mubr.msk.bf16.mxu1 %vm10479_vm0, %v13350_v50  ;;  %v2123_v42 = vpack.c.bf16 %v1971_v63, %v1971_v63  ;;  %v2125_v45 = vpack.c.bf16 %v1973_v48, %v1973_v48 }
 0x3f7   : > { %9438 = vmatprep.subr.bf16.mxu1 %v13350_v50  ;;  %3046 = vrot.lane.b32.xlu1 %v11261_v17, %s10481_s11  ;;  %v4629_v6 = vsel %vm3934_vm1, %v3025_v38, 0 }
 0x3fb   : > { %3082 = vrot.lane.b32.xlu1 %v11261_v17, %s10482_s20  ;;  %9429 = vmatmul.mubr.msk.bf16.vlgmr.msra.gmra.mrb[36].mxu1 %vm3934_vm1, %v2119_v18 }
 0x3fc   : > { %9447 = vmatmul.mubr.msk.bf16.vlgmr.msra.gmra.mrb[28].mxu0 %vm3934_vm1, %v2122_v26  ;;  %9439 = vmatpush3.bf16.xpose.msra.mxu1 %v4445_v61 }
 0x3fd   : > { %9457 = vmatpush3.bf16.xpose.msra.mxu0 %v4583_v55  ;;  %9458 = vmatprep.mubr.msk.bf16.mxu0 %vm10479_vm0, %v13350_v50 }
 0x3fe   : > { %9440 = vmatprep.mubr.msk.bf16.mxu1 %vm10479_vm0, %v13350_v50  ;;  %9450 = vmatprep.subr.bf16.mxu1 %v13350_v50 }
 0x3ff   : > { %9468 = vmatprep.subr.bf16.mxu0 %v13350_v50 }
 0x403   : > { %9441 = vmatmul.mubr.msk.bf16.vlgmr.msra.gmra.mrb[40].mxu1 %vm3934_vm1, %v2121_v9 }
 0x404   : > { %9459 = vmatmul.mubr.msk.bf16.vlgmr.msra.gmra.mrb[32].mxu0 %vm3934_vm1, %v2124_v19  ;;  %9451 = vmatpush3.bf16.xpose.msra.mxu1 %v4537_v13 }
 0x405   : > { %9470 = vmatprep.mubr.msk.bf16.mxu0 %vm10479_vm0, %v13350_v50  ;;  %9452 = vmatprep.mubr.msk.bf16.mxu1 %vm10479_vm0, %v13350_v50 }
 0x406   : > { %9462 = vmatprep.subr.bf16.mxu1 %v13350_v50 }
 0x40b   : > { %9453 = vmatmul.mubr.msk.bf16.vlgmr.msra.gmra.mrb[44].mxu1 %vm3934_vm1, %v2123_v42 }
 0x40c   : > { %9463 = vmatpush3.bf16.xpose.msra.mxu1 %v4629_v6  ;;  %9464 = vmatprep.mubr.msk.bf16.mxu1 %vm10479_vm0, %v13350_v50 }
 0x40d   : > { %9474 = vmatprep.subr.bf16.mxu1 %v13350_v50 }
 0x413   : > { %9465 = vmatmul.mubr.msk.bf16.vlgmr.msra.gmra.mrb[48].mxu1 %vm3934_vm1, %v2125_v45 }
 0x414   : > { %9476 = vmatprep.mubr.msk.bf16.mxu1 %vm10479_vm0, %v13350_v50 }
 0x430   : > { %v2149_v30 = vpop.permute.xlu0 %2148 }
 0x431   : > { %v2167_v49 = vpop.permute.xlu1 %2166 }
 0x432   : > { %v2466_v32 = vcombine.low %v11315_v28, %v2167_v49  ;;  %v2467_v16 = vcombine.high %v11315_v28, %v2167_v49 }
 0x434   : > { %v2185_v10 = vpop.permute.xlu0 %2184  ;;  %v2474_v8 = vrot.slane %v2466_v32, %v11124_v23  ;;  %v2481_v52 = vrot.slane %v2467_v16, %v11124_v23 }
 0x435   : > { %v2482_v11 = vcombine.low %v2149_v30, %v2185_v10  ;;  %v2483_v12 = vcombine.high %v2149_v30, %v2185_v10  ;;  %v1249_v60 = vpop.permute.xlu1 %1248 }
 0x437   : > { %v2490_v36 = vrot.slane %v2482_v11, %v11124_v23  ;;  %v2497_v15 = vrot.slane %v2483_v12, %v11124_v23 }
 0x438   : > { %v1267_v22 = vpop.permute.xlu0 %1266 }
 0x439   : > { %v2498_v43 = vcombine.low %v2474_v8, %v2490_v36  ;;  %v2499_v41 = vcombine.high %v2474_v8, %v2490_v36  ;;  %v2514_v58 = vcombine.low %v2481_v52, %v2497_v15  ;;  %v2515_v5 = vcombine.high %v2481_v52, %v2497_v15  ;;  %v1285_v27 = vpop.permute.xlu1 %1284 }
 0x43a   : > { %v1566_v28 = vcombine.low %v11352_v3, %v1267_v22  ;;  %v1567_v37 = vcombine.high %v11352_v3, %v1267_v22  ;;  %v1582_v31 = vcombine.low %v1249_v60, %v1285_v27  ;;  %v1583_v44 = vcombine.high %v1249_v60, %v1285_v27 }
 0x43b   : > { %v2506_v57 = vrot.slane %v2498_v43, %v11134_v35  ;;  %v2513_v14 = vrot.slane %v2499_v41, %v11134_v35  ;;  %v2522_v2 = vrot.slane %v2514_v58, %v11134_v35  ;;  %v2529_v51 = vrot.slane %v2515_v5, %v11134_v35 }
 0x43c   : > { %v1574_v24 = vrot.slane %v1566_v28, %v11124_v23  ;;  %v1581_v46 = vrot.slane %v1567_v37, %v11124_v23  ;;  %v1590_v20 = vrot.slane %v1582_v31, %v11124_v23  ;;  %v1597_v40 = vrot.slane %v1583_v44, %v11124_v23  ;;  %v2151_v26 = vpop.permute.xlu0 %2150 }
 0x43d   : > { %v2874_v3 = vcombine.low %v2506_v57, %v2513_v14  ;;  %v8996_v53 = vcombine.high %v2506_v57, %v2513_v14  ;;  %v2890_v62 = vcombine.low %v2522_v2, %v2529_v51  ;;  %v8997_v18 = vcombine.high %v2522_v2, %v2529_v51 }
 0x43e   : > { %v1598_v55 = vcombine.low %v1574_v24, %v1590_v20  ;;  %v1599_v61 = vcombine.high %v1574_v24, %v1590_v20  ;;  %v1614_v21 = vcombine.low %v1581_v46, %v1597_v40  ;;  %v1615_v4 = vcombine.high %v1581_v46, %v1597_v40 }
 0x43f   : > { %v11754_v59 = vrot.slane %v2874_v3, %v11124_v23  ;;  %v11757_v1 = vrot.slane %v8996_v53, %v11124_v23  ;;  %v11760_v19 = vrot.slane %v2890_v62, %v11124_v23  ;;  %v11763_v9 = vrot.slane %v8997_v18, %v11124_v23 }
 0x440   : > { %v1606_v13 = vrot.slane %v1598_v55, %v11134_v35  ;;  %v1613_v34 = vrot.slane %v1599_v61, %v11134_v35  ;;  %v1622_v63 = vrot.slane %v1614_v21, %v11134_v35  ;;  %v1629_v38 = vrot.slane %v1615_v4, %v11134_v35  ;;  %v2169_v42 = vpop.permute.xlu1 %2168 }
 0x441   : > { %v2187_v45 = vpop.permute.xlu0 %2186  ;;  %v2534_v49 = vcombine.low %v11410_v33, %v2169_v42  ;;  %v2906_v10 = vcombine.low %v11754_v59, %v11757_v1  ;;  %v2922_v11 = vcombine.low %v11760_v19, %v11763_v9  ;;  %v2535_v60 = vcombine.high %v11410_v33, %v2169_v42 }
 0x442   : > { %v1974_v6 = vcombine.low %v1606_v13, %v1613_v34  ;;  %v8984_v48 = vcombine.high %v1606_v13, %v1613_v34  ;;  %v1990_v30 = vcombine.low %v1622_v63, %v1629_v38  ;;  %v2550_v32 = vcombine.low %v2151_v26, %v2187_v45 }
 0x443   : > { %v2551_v16 = vcombine.high %v2151_v26, %v2187_v45  ;;  %v8985_v12 = vcombine.high %v1622_v63, %v1629_v38  ;;  %v2542_v43 = vrot.slane %v2534_v49, %v11124_v23  ;;  %v2914_v27 = vrot.slane %v2906_v10, %v11134_v35 }
 0x444   : > { %v2558_v8 = vrot.slane %v2550_v32, %v11124_v23  ;;  %v1251_v52 = vpop.permute.xlu1 %1250  ;;  %v11777_v36 = vrot.slane %v1974_v6, %v11124_v23  ;;  %v11780_v15 = vrot.slane %v8984_v48, %v11124_v23  ;;  %v11783_v22 = vrot.slane %v1990_v30, %v11124_v23 }
 0x445   : > { %v2565_v41 = vrot.slane %v2551_v16, %v11124_v23  ;;  %v2930_v28 = vrot.slane %v2922_v11, %v11134_v35  ;;  %v11792_v37 = vrot.slane %v8985_v12, %v11124_v23  ;;  %v2549_v31 = vrot.slane %v2535_v60, %v11124_v23 }
 0x446   : > { %v2566_v44 = vcombine.low %v2542_v43, %v2558_v8  ;;  %v2567_v57 = vcombine.high %v2542_v43, %v2558_v8  ;;  %v2006_v62 = vcombine.low %v11777_v36, %v11780_v15  ;;  %v2907_v10 = vcombine.high %v11754_v59, %v11757_v1 }
 0x447   : > { %v1269_v58 = vpop.permute.xlu0 %1268  ;;  %v2938_v14 = vcombine.low %v2914_v27, %v2930_v28  ;;  %v2939_v2 = vcombine.high %v2914_v27, %v2930_v28  ;;  %v2582_v51 = vcombine.low %v2549_v31, %v2565_v41  ;;  %v2583_v24 = vcombine.high %v2549_v31, %v2565_v41 }
 0x448   : > { %v1634_v5 = vcombine.low %v11416_v54, %v1269_v58  ;;  %v1635_v33 = vcombine.high %v11416_v54, %v1269_v58  ;;  %v2022_v18 = vcombine.low %v11783_v22, %v11792_v37  ;;  %v2574_v55 = vrot.slane %v2566_v44, %v11134_v35 }
 0x449   : > { %v3026_v3 = vpack.c.bf16 %v2938_v14, %v2938_v14  ;;  %v3027_v53 = vpack.c.bf16 %v2939_v2, %v2939_v2  ;;  %v2581_v61 = vrot.slane %v2567_v57, %v11134_v35  ;;  %v2590_v63 = vrot.slane %v2582_v51, %v11134_v35 }
 0x44a   : > { %v1642_v46 = vrot.slane %v1634_v5, %v11124_v23  ;;  %v1649_v20 = vrot.slane %v1635_v33, %v11124_v23  ;;  %v1287_v54 = vpop.permute.xlu1 %1286  ;;  %v2597_v38 = vrot.slane %v2583_v24, %v11134_v35  ;;  %v2014_v32 = vrot.slane %v2006_v62, %v11134_v35 }
 0x44b   : > { %v1650_v40 = vcombine.low %v1251_v52, %v1287_v54  ;;  %v1651_v26 = vcombine.high %v1251_v52, %v1287_v54  ;;  %v4675_v13 = vsel %vm3934_vm1, %v3026_v3, 0  ;;  %v4721_v34 = vsel %vm3934_vm1, %v3027_v53, 0  ;;  %v3041_v42 = vpop.permute.xlu0 %3040 }
 0x44c   : > { %9469 = vmatpush3.bf16.xpose.msra.mxu0 %v4675_v13  ;;  %9475 = vmatpush3.bf16.xpose.msra.mxu1 %v4721_v34  ;;  %v2030_v16 = vrot.slane %v2022_v18, %v11134_v35  ;;  %v2942_v11 = vcombine.low %v2574_v55, %v2581_v61  ;;  %v8998_v12 = vcombine.high %v2574_v55, %v2581_v61 }
 0x44d   : > { %v1658_v21 = vrot.slane %v1650_v40, %v11124_v23  ;;  %v1665_v4 = vrot.slane %v1651_v26, %v11124_v23  ;;  %9480 = vmatprep.subr.bf16.mxu0 %v13350_v50  ;;  %9486 = vmatprep.subr.bf16.mxu1 %v13350_v50  ;;  %v2007_v52 = vcombine.high %v11777_v36, %v11780_v15 }
 0x44e   : > { %v2923_v5 = vcombine.high %v11760_v19, %v11763_v9  ;;  %v2023_v59 = vcombine.high %v11783_v22, %v11792_v37  ;;  %v2958_v1 = vcombine.low %v2590_v63, %v2597_v38  ;;  %v8999_v33 = vcombine.high %v2590_v63, %v2597_v38 }
 0x44f   : > { %v1666_v48 = vcombine.low %v1642_v46, %v1658_v21  ;;  %v1667_v45 = vcombine.high %v1642_v46, %v1658_v21  ;;  %v1682_v30 = vcombine.low %v1649_v20, %v1665_v4  ;;  %v1683_v49 = vcombine.high %v1649_v20, %v1665_v4 }
 0x450   : > { %v3059_v6 = vpop.permute.xlu1 %3058  ;;  %v2038_v57 = vcombine.low %v2014_v32, %v2030_v16  ;;  %v2039_v14 = vcombine.high %v2014_v32, %v2030_v16  ;;  %v11826_v2 = vrot.slane %v2942_v11, %v11124_v23  ;;  %v11829_v51 = vrot.slane %v8998_v12, %v11124_v23 }
 0x451   : > { %v1674_v60 = vrot.slane %v1666_v48, %v11134_v35  ;;  %v1681_v8 = vrot.slane %v1667_v45, %v11134_v35  ;;  %v1690_v43 = vrot.slane %v1682_v30, %v11134_v35  ;;  %v1697_v41 = vrot.slane %v1683_v49, %v11134_v35  ;;  %v3061_v31 = vpop.permute.xlu0 %3060 }
 0x452   : > { %v3094_v24 = vcombine.low %v11160_v29, %v3059_v6  ;;  %v3095_v19 = vcombine.high %v11160_v29, %v3059_v6  ;;  %v2126_v54 = vpack.c.bf16 %v2038_v57, %v2038_v57  ;;  %v3162_v40 = vcombine.low %v11169_v39, %v3061_v31 }
 0x453   : > { %v2042_v27 = vcombine.low %v1674_v60, %v1681_v8  ;;  %v8986_v28 = vcombine.high %v1674_v60, %v1681_v8  ;;  %v2058_v9 = vcombine.low %v1690_v43, %v1697_v41  ;;  %v8987_v46 = vcombine.high %v1690_v43, %v1697_v41 }
 0x454   : > { %v3077_v58 = vpop.permute.xlu1 %3076  ;;  %v3163_v26 = vcombine.high %v11169_v39, %v3061_v31  ;;  %v2127_v53 = vpack.c.bf16 %v2039_v14, %v2039_v14  ;;  %v2921_v62 = vrot.slane %v2907_v10, %v11134_v35  ;;  %v11837_v18 = vrot.slane %v2958_v1, %v11124_v23  ;;  %9471 = vmatmul.mubr.msk.bf16.vlgmr.msra.gmra.mrb[36].mxu0 %vm3934_vm1, %v2126_v54 }
 0x455   : > { %v3110_v44 = vcombine.low %v3041_v42, %v3077_v58  ;;  %v3111_v20 = vcombine.high %v3041_v42, %v3077_v58  ;;  %v11840_v55 = vrot.slane %v2042_v27, %v11124_v23  ;;  %v11843_v29 = vrot.slane %v8986_v28, %v11124_v23  ;;  %9482 = vmatprep.mubr.msk.bf16.mxu0 %vm10479_vm0, %v13350_v50 }
 0x456   : > { %v11848_v21 = vrot.slane %v8999_v33, %v11124_v23  ;;  %v3102_v39 = vrot.slane %v3094_v24, %v11124_v23  ;;  %9477 = vmatmul.mubr.msk.bf16.vlgmr.msra.gmra.mrb[52].mxu1 %vm3934_vm1, %v2127_v53  ;;  %v2937_v4 = vrot.slane %v2923_v5, %v11134_v35  ;;  %v11856_v13 = vrot.slane %v2058_v9, %v11124_v23 }
 0x457   : > { %v3118_v61 = vrot.slane %v3110_v44, %v11124_v23  ;;  %v11859_v34 = vrot.slane %v8987_v46, %v11124_v23  ;;  %v3109_v63 = vrot.slane %v3095_v19, %v11124_v23  ;;  %v3125_v38 = vrot.slane %v3111_v20, %v11124_v23  ;;  %9488 = vmatprep.mubr.msk.bf16.mxu1 %vm10479_vm0, %v13350_v50 }
 0x458   : > { %v3043_v3 = vpop.permute.xlu1 %3042  ;;  %v3170_v42 = vrot.slane %v3162_v40, %v11124_v23  ;;  %v3177_v6 = vrot.slane %v3163_v26, %v11124_v23  ;;  %v2940_v48 = vcombine.low %v2921_v62, %v2937_v4  ;;  %v2941_v45 = vcombine.high %v2921_v62, %v2937_v4  ;;  %v3045_v62 = vpop.permute.xlu0 %3044 }
 0x459   : > { %v2074_v49 = vcombine.low %v11840_v55, %v11843_v29  ;;  %v2075_v32 = vcombine.high %v11840_v55, %v11843_v29  ;;  %v3126_v16 = vcombine.low %v3102_v39, %v3118_v61  ;;  %v3127_v10 = vcombine.high %v3102_v39, %v3118_v61 }
 0x45a   : > { %v3028_v11 = vpack.c.bf16 %v2940_v48, %v2940_v48  ;;  %v3029_v12 = vpack.c.bf16 %v2941_v45, %v2941_v45  ;;  %v2090_v43 = vcombine.low %v11856_v13, %v11859_v34  ;;  %v2091_v41 = vcombine.high %v11856_v13, %v11859_v34 }
 0x45b   : > { %v3142_v58 = vcombine.low %v3109_v63, %v3125_v38  ;;  %v3143_v5 = vcombine.high %v3109_v63, %v3125_v38  ;;  %v11880_v44 = vrot.slane %v3126_v16, %v11134_v35  ;;  %v11883_v57 = vrot.slane %v3127_v10, %v11134_v35 }
 0x45c   : > { %v3079_v30 = vpop.permute.xlu1 %3078  ;;  %v4767_v1 = vsel %vm3934_vm1, %v3028_v11, 0  ;;  %v4813_v33 = vsel %vm3934_vm1, %v3029_v12, 0  ;;  %v2021_v14 = vrot.slane %v2007_v52, %v11134_v35  ;;  %v2037_v40 = vrot.slane %v2023_v59, %v11134_v35 }
 0x45d   : > { %v3178_v60 = vcombine.low %v3043_v3, %v3079_v30  ;;  %v3179_v8 = vcombine.high %v3043_v3, %v3079_v30  ;;  %9481 = vmatpush3.bf16.xpose.msra.mxu0 %v4767_v1  ;;  %9487 = vmatpush3.bf16.xpose.msra.mxu1 %v4813_v33  ;;  %v2974_v36 = vcombine.low %v11826_v2, %v11829_v51 }
 0x45e   : > { %9492 = vmatprep.subr.bf16.mxu0 %v13350_v50  ;;  %9498 = vmatprep.subr.bf16.mxu1 %v13350_v50  ;;  %v2040_v22 = vcombine.low %v2021_v14, %v2037_v40  ;;  %v2041_v37 = vcombine.high %v2021_v14, %v2037_v40  ;;  %v2990_v53 = vcombine.low %v11837_v18, %v11848_v21 }
 0x45f   : > { %v3186_v27 = vrot.slane %v3178_v60, %v11124_v23  ;;  %v3193_v28 = vrot.slane %v3179_v8, %v11124_v23  ;;  %v2982_v59 = vrot.slane %v2974_v36, %v11134_v35  ;;  %v3150_v45 = vrot.slane %v3142_v58, %v11134_v35 }
 0x460   : > { %v2128_v38 = vpack.c.bf16 %v2040_v22, %v2040_v22  ;;  %v3157_v30 = vrot.slane %v3143_v5, %v11134_v35  ;;  %v3502_v16 = vcombine.low %v11880_v44, %v11883_v57  ;;  %v2082_v58 = vrot.slane %v2074_v49, %v11134_v35 }
 0x461   : > { %v3063_v31 = vpop.permute.xlu1 %3062  ;;  %v3194_v24 = vcombine.low %v3170_v42, %v3186_v27  ;;  %v3195_v19 = vcombine.high %v3170_v42, %v3186_v27  ;;  %v3210_v9 = vcombine.low %v3177_v6, %v3193_v28  ;;  %v3211_v46 = vcombine.high %v3177_v6, %v3193_v28 }
 0x462   : > { %v3230_v20 = vcombine.low %v11200_v56, %v3063_v31  ;;  %v3231_v54 = vcombine.high %v11200_v56, %v3063_v31  ;;  %v2129_v42 = vpack.c.bf16 %v2041_v37, %v2041_v37  ;;  %v2998_v6 = vrot.slane %v2990_v53, %v11134_v35 }
 0x463   : > { %v11900_v15 = vrot.slane %v3194_v24, %v11134_v35  ;;  %v11903_v52 = vrot.slane %v3195_v19, %v11134_v35  ;;  %v11906_v26 = vrot.slane %v3210_v9, %v11134_v35  ;;  %v11909_v56 = vrot.slane %v3211_v46, %v11134_v35 }
 0x464   : > { %v3238_v10 = vrot.slane %v3230_v20, %v11124_v23  ;;  %9483 = vmatmul.mubr.msk.bf16.vlgmr.msra.gmra.mrb[40].mxu0 %vm3934_vm1, %v2128_v38  ;;  %9489 = vmatmul.mubr.msk.bf16.vlgmr.msra.gmra.mrb[56].mxu1 %vm3934_vm1, %v2129_v42  ;;  %v3006_v11 = vcombine.low %v2982_v59, %v2998_v6  ;;  %v3007_v12 = vcombine.high %v2982_v59, %v2998_v6 }
 0x465   : > { %v3081_v3 = vpop.permute.xlu1 %3080  ;;  %v3570_v61 = vcombine.low %v11900_v15, %v11903_v52  ;;  %v9002_v39 = vcombine.high %v11900_v15, %v11903_v52  ;;  %v3586_v4 = vcombine.low %v11906_v26, %v11909_v56  ;;  %v9003_v63 = vcombine.high %v11906_v26, %v11909_v56  ;;  %9494 = vmatprep.mubr.msk.bf16.mxu0 %vm10479_vm0, %v13350_v50 }
 0x466   : > { %v3246_v48 = vcombine.low %v3045_v62, %v3081_v3  ;;  %v3247_v60 = vcombine.high %v3045_v62, %v3081_v3  ;;  %9500 = vmatprep.mubr.msk.bf16.mxu1 %vm10479_vm0, %v13350_v50  ;;  %v2098_v5 = vrot.slane %v2090_v43, %v11134_v35  ;;  %v3245_v1 = vrot.slane %v3231_v54, %v11124_v23 }
 0x467   : > { %v3030_v33 = vpack.c.bf16 %v3006_v11, %v3006_v11  ;;  %v3031_v27 = vpack.c.bf16 %v3007_v12, %v3007_v12  ;;  %v9000_v31 = vcombine.high %v11880_v44, %v11883_v57  ;;  %v2975_v19 = vcombine.high %v11826_v2, %v11829_v51 }
 0x468   : > { %v3254_v8 = vrot.slane %v3246_v48, %v11124_v23  ;;  %v3261_v28 = vrot.slane %v3247_v60, %v11124_v23  ;;  %v2106_v40 = vcombine.low %v2082_v58, %v2098_v5  ;;  %v2107_v36 = vcombine.high %v2082_v58, %v2098_v5 }
 0x469   : > { %v4859_v9 = vsel %vm3934_vm1, %v3030_v33, 0  ;;  %v4905_v49 = vsel %vm3934_vm1, %v3031_v27, 0  ;;  %v2989_v3 = vrot.slane %v2975_v19, %v11134_v35  ;;  %v2991_v22 = vcombine.high %v11837_v18, %v11848_v21 }
 0x46a   : > { %v3262_v14 = vcombine.low %v3238_v10, %v3254_v8  ;;  %v3263_v24 = vcombine.high %v3238_v10, %v3254_v8  ;;  %v3278_v46 = vcombine.low %v3245_v1, %v3261_v28  ;;  %v3279_v43 = vcombine.high %v3245_v1, %v3261_v28  ;;  %9493 = vmatpush3.bf16.xpose.msra.mxu0 %v4859_v9 }
 0x46b   : > { %9499 = vmatpush3.bf16.xpose.msra.mxu1 %v4905_v49  ;;  %9504 = vmatprep.subr.bf16.mxu0 %v13350_v50  ;;  %v3518_v53 = vcombine.low %v3150_v45, %v3157_v30  ;;  %v9001_v62 = vcombine.high %v3150_v45, %v3157_v30  ;;  %v3005_v38 = vrot.slane %v2991_v22, %v11134_v35 }
 0x46c   : > { %v3270_v20 = vrot.slane %v3262_v14, %v11134_v35  ;;  %v3277_v54 = vrot.slane %v3263_v24, %v11134_v35  ;;  %v3286_v44 = vrot.slane %v3278_v46, %v11134_v35  ;;  %v3293_v57 = vrot.slane %v3279_v43, %v11134_v35  ;;  %9510 = vmatprep.subr.bf16.mxu1 %v13350_v50 }
 0x46d   : > { %v3509_v42 = vrot.slane %v3502_v16, %v11124_v23  ;;  %v3517_v6 = vrot.slane %v9000_v31, %v11124_v23  ;;  %v2130_v48 = vpack.c.bf16 %v2106_v40, %v2106_v40  ;;  %v2131_v10 = vpack.c.bf16 %v2107_v36, %v2107_v36 }
 0x46e   : > { %v3638_v2 = vcombine.low %v3270_v20, %v3277_v54  ;;  %v9004_v51 = vcombine.high %v3270_v20, %v3277_v54  ;;  %v3654_v37 = vcombine.low %v3286_v44, %v3293_v57  ;;  %v9005_v59 = vcombine.high %v3286_v44, %v3293_v57 }
 0x46f   : > { %v3008_v11 = vcombine.low %v2989_v3, %v3005_v38  ;;  %v3009_v12 = vcombine.high %v2989_v3, %v3005_v38  ;;  %v2089_v60 = vrot.slane %v2075_v32, %v11134_v35  ;;  %v2105_v18 = vrot.slane %v2091_v41, %v11134_v35 }
 0x470   : > { %v3525_v55 = vrot.slane %v3518_v53, %v11124_v23  ;;  %v3533_v29 = vrot.slane %v9001_v62, %v11124_v23  ;;  %v3577_v13 = vrot.slane %v3570_v61, %v11124_v23  ;;  %v3534_v34 = vcombine.low %v3509_v42, %v3517_v6 }
 0x471   : > { %9495 = vmatmul.mubr.msk.bf16.vlgmr.msra.gmra.mrb[44].mxu0 %vm3934_vm1, %v2130_v48  ;;  %v3032_v21 = vpack.c.bf16 %v3008_v11, %v3008_v11  ;;  %v3033_v45 = vpack.c.bf16 %v3009_v12, %v3009_v12  ;;  %v2108_v30 = vcombine.low %v2089_v60, %v2105_v18  ;;  %v2109_v16 = vcombine.high %v2089_v60, %v2105_v18 }
 0x472   : > { %9501 = vmatmul.mubr.msk.bf16.vlgmr.msra.gmra.mrb[60].mxu1 %vm3934_vm1, %v2131_v10  ;;  %9506 = vmatprep.mubr.msk.bf16.mxu0 %vm10479_vm0, %v13350_v50  ;;  %v3585_v8 = vrot.slane %v9002_v39, %v11124_v23  ;;  %v3593_v58 = vrot.slane %v3586_v4, %v11124_v23  ;;  %v3601_v61 = vrot.slane %v9003_v63, %v11124_v23  ;;  %v13359_v60 = vlaneseq }
 0x473   : > { %9512 = vmatprep.mubr.msk.bf16.mxu1 %vm10479_vm0, %v13350_v50  ;;  %v4951_v32 = vsel %vm3934_vm1, %v3032_v21, 0  ;;  %v4997_v41 = vsel %vm3934_vm1, %v3033_v45, 0  ;;  %v3645_v5 = vrot.slane %v3638_v2, %v11124_v23  ;;  %v3653_v1 = vrot.slane %v9004_v51, %v11124_v23 }
 0x474   : > { %9505 = vmatpush3.bf16.xpose.msra.mxu0 %v4951_v32  ;;  %9511 = vmatpush3.bf16.xpose.msra.mxu1 %v4997_v41  ;;  %v3661_v15 = vrot.slane %v3654_v37, %v11124_v23  ;;  %v3669_v52 = vrot.slane %v9005_v59, %v11124_v23  ;;  %v3542_v39 = vrot.slane %v3534_v34, %v11134_v35  ;;  %v832_v18 = vand.u32 127, %v13359_v60 }
 0x475   : > { %9516 = vmatprep.subr.bf16.mxu0 %v13350_v50  ;;  %9522 = vmatprep.subr.bf16.mxu1 %v13350_v50  ;;  %v3550_v4 = vcombine.low %v3525_v55, %v3533_v29  ;;  %v2132_v33 = vpack.c.bf16 %v2108_v30, %v2108_v30  ;;  %v2133_v26 = vpack.c.bf16 %v2109_v16, %v2109_v16 }
 0x476   : > { %v3535_v56 = vcombine.high %v3509_v42, %v3517_v6  ;;  %v3551_v63 = vcombine.high %v3525_v55, %v3533_v29  ;;  %v3602_v28 = vcombine.low %v3577_v13, %v3585_v8  ;;  %v3618_v31 = vcombine.low %v3593_v58, %v3601_v61 }
 0x477   : > { %v3558_v27 = vrot.slane %v3550_v4, %v11134_v35  ;;  %v3603_v14 = vcombine.high %v3577_v13, %v3585_v8  ;;  %v3619_v9 = vcombine.high %v3593_v58, %v3601_v61  ;;  %v3670_v49 = vcombine.low %v3645_v5, %v3653_v1 }
 0x478   : > { %v3549_v24 = vrot.slane %v3535_v56, %v11134_v35  ;;  %v3565_v19 = vrot.slane %v3551_v63, %v11134_v35  ;;  %v3610_v20 = vrot.slane %v3602_v28, %v11134_v35  ;;  %v3626_v54 = vrot.slane %v3618_v31, %v11134_v35 }
 0x479   : > { %v3566_v46 = vcombine.low %v3542_v39, %v3558_v27  ;;  %v3567_v43 = vcombine.high %v3542_v39, %v3558_v27  ;;  %v3617_v57 = vrot.slane %v3603_v14, %v11134_v35  ;;  %v3633_v22 = vrot.slane %v3619_v9, %v11134_v35 }
 0x47a   : > { %v12005_v40 = vcombine.low %v3549_v24, %v3565_v19  ;;  %v12007_v44 = vcombine.high %v3549_v24, %v3565_v19  ;;  %v12014_v51 = vcombine.low %v3610_v20, %v3626_v54  ;;  %v12016_v3 = vcombine.high %v3610_v20, %v3626_v54 }
 0x47b   : > { %9507 = vmatmul.mubr.msk.bf16.vlgmr.msra.gmra.mrb[48].mxu0 %vm3934_vm1, %v2132_v33  ;;  %9513 = vmatmul.mubr.msk.bf16.vlgmr.msra.gmra.mrb[64].mxu1 %vm3934_vm1, %v2133_v26  ;;  %v3910_v36 = vpack.c.bf16 %v3566_v46, %v3566_v46  ;;  %v3911_v2 = vpack.c.bf16 %v3567_v43, %v3567_v43  ;;  %v12021_v53 = vcombine.low %v3617_v57, %v3633_v22  ;;  %v10485_v13 = vmov -1e+30  }
 0x47c   : > { %9518 = vmatprep.mubr.msk.bf16.mxu0 %vm10479_vm0, %v13350_v50  ;;  %9524 = vmatprep.mubr.msk.bf16.mxu1 %vm10479_vm0, %v13350_v50  ;;  %v3678_v62 = vrot.slane %v3670_v49, %v11134_v35  ;;  %v3686_v38 = vcombine.low %v3661_v15, %v3669_v52  ;;  %v3671_v42 = vcombine.high %v3645_v5, %v3653_v1 }
 0x47d   : > { %v5381_v37 = vsel %vm5379_vm2, %v3910_v36, 0  ;;  %v5427_v59 = vsel %vm5379_vm2, %v3911_v2, 0  ;;  %v3687_v6 = vcombine.high %v3661_v15, %v3669_v52  ;;  %v12026_v48 = vcombine.high %v3617_v57, %v3633_v22 }
 0x47e   : > { %9517 = vmatpush3.bf16.msra.mxu0 %v5381_v37  ;;  %9523 = vmatpush3.bf16.msra.mxu1 %v5427_v59  ;;  %v3694_v10 = vrot.slane %v3686_v38, %v11134_v35  ;;  %v3685_v11 = vrot.slane %v3671_v42, %v11134_v35  ;;  %vm833_vm3 = vcmp.le.s32.totalorder %v832_v18, %v11026_v47 }
 0x47f   : > { %9528 = vmatprep.subr.bf16.mxu0 %v13350_v50  ;;  %9534 = vmatprep.subr.bf16.mxu1 %v13350_v50  ;;  %v3701_v12 = vrot.slane %v3687_v6, %v11134_v35  ;;  %v12041_v34 = vsel %vm833_vm3, 0.0, %v10485_v13  ;;  %v12063_v22 = vadd.f32 %v11251_v0, %v11151_v7 }
 0x480   : > { %v12032_v21 = vcombine.low %v3678_v62, %v3694_v10  ;;  %v12036_v55 = vcombine.high %v3678_v62, %v3694_v10 }
 0x481   : > { %v12034_v45 = vcombine.low %v3685_v11, %v3701_v12  ;;  %v12038_v29 = vcombine.high %v3685_v11, %v3701_v12 }
 0x491   : > { %v3975_v32 = vpop.f32.mrb[12].mxu1 }
 0x492   : > { %v5039_v41 = vmul.f32 0.17677669, %v3975_v32  ;;  %v9376_v30 = vpop.f32.mrb[13].mxu1 }
 0x493   : > { %v3978_v16 = vpop.f32.mrb[14].mxu1 }
 0x494   : > { %v9377_v8 = vpop.f32.mrb[15].mxu1  ;;  %v12044_v58 = vadd.f32 %v5039_v41, %v12041_v34 }
 0x496   : > { %v5088_v61 = vsel %vm5087_vm4, %v12044_v58, -inf }
 0x497   : > { %5089 = vmax.xlane.f32.xlu0 %v5088_v61 }
 0x49e   : > { %v4021_v5 = vpop.f32.mrb[16].mxu1 }
 0x49f   : > { %v5040_v1 = vmul.f32 0.17677669, %v4021_v5  ;;  %v9382_v15 = vpop.f32.mrb[17].mxu1 }
 0x4a0   : > { %v4024_v52 = vpop.f32.mrb[18].mxu1 }
 0x4a1   : > { %v9383_v39 = vpop.f32.mrb[19].mxu1  ;;  %v12049_v4 = vadd.f32 %v5040_v1, %v12041_v34 }
 0x4a3   : > { %v5091_v26 = vsel %vm5087_vm4, %v12049_v4, -inf }
 0x4a4   : > { %5092 = vmax.xlane.f32.xlu1 %v5091_v26 }
 0x4a5   : > { %v4159_v33 = vpop.f32.mrb[12].mxu0 }
 0x4a6   : > { %v5043_v56 = vmul.f32 0.17677669, %v4159_v33  ;;  %v9400_v63 = vpop.f32.mrb[13].mxu0 }
 0x4a7   : > { %v4162_v27 = vpop.f32.mrb[14].mxu0 }
 0x4a8   : > { %v9401_v28 = vpop.f32.mrb[15].mxu0  ;;  %v12054_v31 = vadd.f32 %v5043_v56, %v12041_v34 }
 0x4aa   : > { %v5100_v14 = vsel %vm5087_vm4, %v12054_v31, -inf }
 0x4ab   : > { %5101 = vmax.xlane.f32.xlu0 %v5100_v14 }
 0x4ae   : > { %v4067_v24 = vpop.f32.mrb[20].mxu1 }
 0x4af   : > { %v9388_v19 = vpop.f32.mrb[21].mxu1  ;;  %v5041_v43 = vmul.f32 0.17677669, %v4067_v24 }
 0x4b0   : > { %v4070_v9 = vpop.f32.mrb[22].mxu1 }
 0x4b1   : > { %v9389_v49 = vpop.f32.mrb[23].mxu1  ;;  %v4251_v46 = vpop.f32.mrb[16].mxu0  ;;  %v12068_v62 = vadd.f32 %v5041_v43, %v12041_v34 }
 0x4b2   : > { %v5045_v20 = vmul.f32 0.17677669, %v4251_v46  ;;  %v9412_v54 = vpop.f32.mrb[17].mxu0 }
 0x4b3   : > { %v4254_v57 = vpop.f32.mrb[18].mxu0  ;;  %v5094_v10 = vsel %vm5087_vm4, %v12068_v62, -inf }
 0x4b4   : > { %v9413_v36 = vpop.f32.mrb[19].mxu0  ;;  %v12059_v2 = vadd.f32 %v5045_v20, %v12041_v34 }
 0x4b5   : > { %3066 = vrot.lane.b32.xlu1 %v12063_v22, %s10480_s5 }
 0x4b6   : > { %v4113_v37 = vpop.f32.mrb[24].mxu1  ;;  %v5106_v59 = vsel %vm5087_vm4, %v12059_v2, -inf }
 0x4b7   : > { %v9394_v38 = vpop.f32.mrb[25].mxu1  ;;  %5107 = vmax.xlane.f32.xlu0 %v5106_v59  ;;  %v5042_v11 = vmul.f32 0.17677669, %v4113_v37 }
 0x4b8   : > { %v4116_v42 = vpop.f32.mrb[26].mxu1 }
 0x4b9   : > { %v9395_v6 = vpop.f32.mrb[27].mxu1  ;;  %3084 = vrot.lane.b32.xlu1 %v12063_v22, %s10482_s20  ;;  %v12082_v5 = vadd.f32 %v5042_v11, %v12041_v34 }
 0x4bb   : > { %5095 = vmax.xlane.f32.xlu0 %v5094_v10  ;;  %v5097_v39 = vsel %vm5087_vm4, %v12082_v5, -inf }
 0x4be   : > { %v4205_v18 = vpop.f32.mrb[28].mxu1 }
 0x4bf   : > { %v4343_v0 = vpop.f32.mrb[20].mxu0  ;;  %v9406_v32 = vpop.f32.mrb[29].mxu1  ;;  %v5044_v37 = vmul.f32 0.17677669, %v4205_v18 }
 0x4c0   : > { %v5047_v12 = vmul.f32 0.17677669, %v4343_v0  ;;  %v9424_v60 = vpop.f32.mrb[21].mxu0  ;;  %v4208_v30 = vpop.f32.mrb[30].mxu1 }
 0x4c1   : > { %v4346_v13 = vpop.f32.mrb[22].mxu0  ;;  %v9407_v8 = vpop.f32.mrb[31].mxu1  ;;  %v12092_v60 = vadd.f32 %v5044_v37, %v12041_v34 }
 0x4c2   : > { %v9425_v41 = vpop.f32.mrb[23].mxu0  ;;  %v12077_v16 = vadd.f32 %v5047_v12, %v12041_v34 }
 0x4c3   : > { %v5103_v41 = vsel %vm5087_vm4, %v12092_v60, -inf }
 0x4c4   : > { %v5112_v61 = vsel %vm5087_vm4, %v12077_v16, -inf }
 0x4c5   : > { %5113 = vmax.xlane.f32.xlu0 %v5112_v61 }
 0x4c6   : > { %v4297_v33 = vpop.f32.mrb[32].mxu1 }
 0x4c7   : > { %v4435_v1 = vpop.f32.mrb[24].mxu0  ;;  %v9418_v56 = vpop.f32.mrb[33].mxu1  ;;  %v5046_v12 = vmul.f32 0.17677669, %v4297_v33 }
 0x4c8   : > { %v5049_v15 = vmul.f32 0.17677669, %v4435_v1  ;;  %v9436_v52 = vpop.f32.mrb[25].mxu0  ;;  %v4300_v27 = vpop.f32.mrb[34].mxu1 }
 0x4c9   : > { %v4438_v26 = vpop.f32.mrb[26].mxu0  ;;  %5098 = vmax.xlane.f32.xlu0 %v5097_v39  ;;  %v9419_v14 = vpop.f32.mrb[35].mxu1  ;;  %v12097_v30 = vadd.f32 %v5046_v12, %v12041_v34 }
 0x4ca   : > { %v9437_v63 = vpop.f32.mrb[27].mxu0  ;;  %v12087_v28 = vadd.f32 %v5049_v15, %v12041_v34 }
 0x4cb   : > { %v5109_v15 = vsel %vm5087_vm4, %v12097_v30, -inf }
 0x4cc   : > { %v5118_v24 = vsel %vm5087_vm4, %v12087_v28, -inf }
 0x4cd   : > { %5119 = vmax.xlane.f32.xlu0 %v5118_v24 }
 0x4ce   : > { %v4389_v49 = vpop.f32.mrb[36].mxu1 }
 0x4cf   : > { %v4527_v19 = vpop.f32.mrb[28].mxu0  ;;  %v9430_v43 = vpop.f32.mrb[37].mxu1  ;;  %v5048_v13 = vmul.f32 0.17677669, %v4389_v49 }
 0x4d0   : > { %v9448_v9 = vpop.f32.mrb[29].mxu0  ;;  %v4392_v54 = vpop.f32.mrb[38].mxu1 }
 0x4d1   : > { %v4530_v46 = vpop.f32.mrb[30].mxu0  ;;  %v9431_v57 = vpop.f32.mrb[39].mxu1  ;;  %v12104_v52 = vadd.f32 %v5048_v13, %v12041_v34  ;;  %v5051_v54 = vmul.f32 0.17677669, %v4527_v19 }
 0x4d2   : > { %v9449_v20 = vpop.f32.mrb[31].mxu0 }
 0x4d3   : > { %v5115_v26 = vsel %vm5087_vm4, %v12104_v52, -inf  ;;  %v12124_v37 = vadd.f32 %v5051_v54, %v12041_v34 }
 0x4d6   : > { %v4481_v38 = vpop.f32.mrb[40].mxu1 }
 0x4d7   : > { %v4619_v36 = vpop.f32.mrb[32].mxu0  ;;  %v9442_v6 = vpop.f32.mrb[41].mxu1  ;;  %v5050_v1 = vmul.f32 0.17677669, %v4481_v38 }
 0x4d8   : > { %v9460_v59 = vpop.f32.mrb[33].mxu0  ;;  %v4484_v0 = vpop.f32.mrb[42].mxu1  ;;  %v5053_v57 = vmul.f32 0.17677669, %v4619_v36 }
 0x4d9   : > { %v4622_v42 = vpop.f32.mrb[34].mxu0  ;;  %v9443_v11 = vpop.f32.mrb[43].mxu1  ;;  %v12109_v56 = vadd.f32 %v5050_v1, %v12041_v34  ;;  %v5124_v59 = vsel %vm5087_vm4, %v12124_v37, -inf }
 0x4da   : > { %v9461_v10 = vpop.f32.mrb[35].mxu0  ;;  %v12129_v38 = vadd.f32 %v5053_v57, %v12041_v34 }
 0x4db   : > { %v5121_v9 = vsel %vm5087_vm4, %v12109_v56, -inf }
 0x4dc   : > { %v5130_v42 = vsel %vm5087_vm4, %v12129_v38, -inf }
 0x4dd   : > { %5104 = vmax.xlane.f32.xlu1 %v5103_v41 }
 0x4de   : > { %v4573_v32 = vpop.f32.mrb[44].mxu1 }
 0x4df   : > { %v9454_v18 = vpop.f32.mrb[45].mxu1  ;;  %v5052_v39 = vmul.f32 0.17677669, %v4573_v32 }
 0x4e0   : > { %v4576_v8 = vpop.f32.mrb[46].mxu1 }
 0x4e1   : > { %v9455_v61 = vpop.f32.mrb[47].mxu1  ;;  %5110 = vmax.xlane.f32.xlu1 %v5109_v15  ;;  %v12114_v49 = vadd.f32 %v5052_v39, %v12041_v34  ;;  %v12143_v15 = vpop.permute.xlu0 %3064 }
 0x4e2   : > { %v12145_v39 = vpop.permute.xlu1 %3046 }
 0x4e3   : > { %3048 = vrot.lane.b32.xlu0 %v12063_v22, %s10481_s11  ;;  %v5127_v46 = vsel %vm5087_vm4, %v12114_v49, -inf }
 0x4e5   : > { %5116 = vmax.xlane.f32.xlu1 %v5115_v26 }
 0x4e6   : > { %v4665_v33 = vpop.f32.mrb[48].mxu1 }
 0x4e7   : > { %v9466_v63 = vpop.f32.mrb[49].mxu1  ;;  %v5054_v24 = vmul.f32 0.17677669, %v4665_v33 }
 0x4e8   : > { %v4668_v27 = vpop.f32.mrb[50].mxu1 }
 0x4e9   : > { %v9467_v14 = vpop.f32.mrb[51].mxu1  ;;  %5122 = vmax.xlane.f32.xlu1 %v5121_v9  ;;  %v12119_v43 = vadd.f32 %v5054_v24, %v12041_v34 }
 0x4eb   : > { %v5133_v20 = vsel %vm5087_vm4, %v12119_v43, -inf }
 0x4ed   : > { %5128 = vmax.xlane.f32.xlu1 %v5127_v46 }
 0x4f1   : > { %5134 = vmax.xlane.f32.xlu1 %v5133_v20 }
 0x502   : > { %5125 = vmax.xlane.f32.xlu0 %v5124_v59 }
 0x506   : > { %5131 = vmax.xlane.f32.xlu0 %v5130_v42 }
 0x524   : > { %v5090_v33 = vpop.xlane.xlu0 %5089 }
 0x527   : > { %v4711_v6 = vpop.f32.mrb[36].mxu0 }
 0x528   : > { %v5055_v10 = vmul.f32 0.17677669, %v4711_v6  ;;  %v9472_v11 = vpop.f32.mrb[37].mxu0  ;;  %v12153_v6 = vpop.permute.xlu1 %3082 }
 0x529   : > { %v4757_v0 = vpop.f32.mrb[52].mxu1  ;;  %v4714_v12 = vpop.f32.mrb[38].mxu0 }
 0x52a   : > { %v5056_v19 = vmul.f32 0.17677669, %v4757_v0  ;;  %v9478_v36 = vpop.f32.mrb[53].mxu1  ;;  %v9473_v32 = vpop.f32.mrb[39].mxu0  ;;  %v12134_v41 = vadd.f32 %v5055_v10, %v12041_v34 }
 0x52b   : > { %v4760_v13 = vpop.f32.mrb[54].mxu1  ;;  %v5160_v36 = vsub.f32 %v12044_v58, %v5090_v33 }
 0x52c   : > { %v9479_v18 = vpop.f32.mrb[55].mxu1  ;;  %v12137_v8 = vadd.f32 %v5056_v19, %v12041_v34  ;;  %v5136_v61 = vsel %vm5087_vm4, %v12134_v41, -inf }
 0x52d   : > { %5137 = vmax.xlane.f32.xlu0 %v5136_v61 }
 0x52e   : > { %v5139_v1 = vsel %vm5087_vm4, %v12137_v8, -inf }
 0x52f   : > { %5140 = vmax.xlane.f32.xlu1 %v5139_v1 }
 0x531   : > { %v5093_v19 = vpop.xlane.xlu1 %5092 }
 0x532   : > { %v5161_v13 = vsub.f32 %v12049_v4, %v5093_v19 }
 0x537   : > { %v4803_v26 = vpop.f32.mrb[40].mxu0  ;;  %v4849_v63 = vpop.f32.mrb[56].mxu1 }
 0x538   : > { %v5057_v27 = vmul.f32 0.17677669, %v4803_v26  ;;  %v5058_v14 = vmul.f32 0.17677669, %v4849_v63  ;;  %v9484_v24 = vpop.f32.mrb[41].mxu0  ;;  %v9490_v9 = vpop.f32.mrb[57].mxu1 }
 0x539   : > { %v4806_v46 = vpop.f32.mrb[42].mxu0  ;;  %v4852_v20 = vpop.f32.mrb[58].mxu1 }
 0x53a   : > { %v9485_v54 = vpop.f32.mrb[43].mxu0  ;;  %v9491_v57 = vpop.f32.mrb[59].mxu1  ;;  %v12148_v59 = vadd.f32 %v5058_v14, %v12041_v34  ;;  %v12151_v42 = vadd.f32 %v5057_v27, %v12041_v34  ;;  %v5184_v27 = vmul.f32 1.442695, %v5160_v36  ;;  %v5186_v46 = vmul.f32 1.442695, %v5161_v13 }
 0x53b   : > { %v5102_v11 = vpop.xlane.xlu0 %5101 }
 0x53c   : > { %v5145_v10 = vsel %vm5087_vm4, %v12148_v59, -inf  ;;  %v5142_v0 = vsel %vm5087_vm4, %v12151_v42, -inf  ;;  %v5164_v14 = vsub.f32 %v12054_v31, %v5102_v11  ;;  %9986 = vpow2.f32 %v5184_v27 }
 0x53d   : > { %5146 = vmax.xlane.f32.xlu1 %v5145_v10  ;;  %5143 = vmax.xlane.f32.xlu0 %v5142_v0  ;;  %9988 = vpow2.f32 %v5186_v46 }
 0x53e   : > { %v5192_v11 = vmul.f32 1.442695, %v5164_v14 }
 0x540   : > { %9990 = vpow2.f32 %v5192_v11 }
 0x544   : > { %v5108_v12 = vpop.xlane.xlu0 %5107  ;;  %v4895_v32 = vpop.f32.mrb[44].mxu0 }
 0x545   : > { %v4941_v18 = vpop.f32.mrb[60].mxu1  ;;  %v5059_v61 = vmul.f32 0.17677669, %v4895_v32  ;;  %v9496_v26 = vpop.f32.mrb[45].mxu0  ;;  %v5166_v20 = vsub.f32 %v12059_v2, %v5108_v12 }
 0x546   : > { %v5060_v1 = vmul.f32 0.17677669, %v4941_v18  ;;  %v9502_v63 = vpop.f32.mrb[61].mxu1  ;;  %v4898_v24 = vpop.f32.mrb[46].mxu0 }
 0x547   : > { %v4944_v9 = vpop.f32.mrb[62].mxu1  ;;  %v9497_v54 = vpop.f32.mrb[47].mxu0  ;;  %v12167_v4 = vadd.f32 %v5059_v61, %v12041_v34  ;;  %v5196_v2 = vmul.f32 1.442695, %v5166_v20 }
 0x548   : > { %v9503_v57 = vpop.f32.mrb[63].mxu1  ;;  %v12164_v58 = vadd.f32 %v5060_v1, %v12041_v34  ;;  %v5096_v33 = vpop.xlane.xlu0 %5095 }
 0x549   : > { %v5162_v10 = vsub.f32 %v12068_v62, %v5096_v33  ;;  %v5148_v31 = vsel %vm5087_vm4, %v12167_v4, -inf  ;;  %9992 = vpow2.f32 %v5196_v2  ;;  %v12181_v20 = vpop.eup %9986 }
 0x54a   : > { %v5151_v0 = vsel %vm5087_vm4, %v12164_v58, -inf  ;;  %5149 = vmax.xlane.f32.xlu0 %v5148_v31  ;;  %v5232_v2 = vsel %vm5087_vm4, %v12181_v20, 0.0 }
 0x54b   : > { %5152 = vmax.xlane.f32.xlu1 %v5151_v0  ;;  %v5188_v36 = vmul.f32 1.442695, %v5162_v10  ;;  %v12188_v10 = vpop.eup %9988  ;;  %v3067_v0 = vpop.permute.xlu1 %3066 }
 0x54d   : > { %9994 = vpow2.f32 %v5188_v36  ;;  %v3366_v36 = vcombine.low %v12063_v22, %v3067_v0 }
 0x54e   : > { %v4987_v62 = vpop.f32.mrb[48].mxu0  ;;  %v5033_v32 = vpop.f32.mrb[64].mxu1 }
 0x54f   : > { %v5061_v18 = vmul.f32 0.17677669, %v4987_v62  ;;  %v5062_v61 = vmul.f32 0.17677669, %v5033_v32  ;;  %v9508_v1 = vpop.f32.mrb[49].mxu0  ;;  %v9514_v26 = vpop.f32.mrb[65].mxu1 }
 0x550   : > { %v4990_v63 = vpop.f32.mrb[50].mxu0  ;;  %v5036_v27 = vpop.f32.mrb[66].mxu1 }
 0x551   : > { %v9509_v14 = vpop.f32.mrb[51].mxu0  ;;  %v9515_v24 = vpop.f32.mrb[67].mxu1  ;;  %v12176_v9 = vadd.f32 %v5062_v61, %v12041_v34  ;;  %v3374_v27 = vrot.slane %v3366_v36, %v11124_v23 }
 0x552   : > { %v5114_v19 = vpop.xlane.xlu0 %5113  ;;  %v3085_v62 = vpop.permute.xlu1 %3084 }
 0x553   : > { %v5168_v12 = vsub.f32 %v12077_v16, %v5114_v19  ;;  %v12179_v16 = vadd.f32 %v5061_v18, %v12041_v34  ;;  %v5157_v57 = vsel %vm5087_vm4, %v12176_v9, -inf  ;;  %v12192_v34 = vpop.eup %9990 }
 0x554   : > { %5158 = vmax.xlane.f32.xlu1 %v5157_v57  ;;  %v12198_v19 = vpop.eup %9992  ;;  %v5244_v26 = vsel %vm5087_vm4, %v12192_v34, 0.0 }
 0x555   : > { %v5200_v13 = vmul.f32 1.442695, %v5168_v12  ;;  %v5154_v33 = vsel %vm5087_vm4, %v12179_v16, -inf  ;;  %v3367_v12 = vcombine.high %v12063_v22, %v3067_v0  ;;  %v5250_v63 = vsel %vm5087_vm4, %v12198_v19, 0.0 }
 0x556   : > { %v5099_v46 = vpop.xlane.xlu0 %5098  ;;  %5155 = vmax.xlane.f32.xlu0 %v5154_v33 }
 0x557   : > { %9996 = vpow2.f32 %v5200_v13  ;;  %v5163_v54 = vsub.f32 %v12082_v5, %v5099_v46  ;;  %v5235_v5 = vsel %vm5087_vm4, %v12188_v10, 0.0  ;;  %v12202_v13 = vpop.eup %9994  ;;  %v3381_v22 = vrot.slane %v3367_v12, %v11124_v23 }
 0x558   : > { %5236 = vadd.xlane.f32.xlu1 %v5235_v5  ;;  %v5238_v46 = vsel %vm5087_vm4, %v12202_v13, 0.0 }
 0x559   : > { %v5190_v31 = vmul.f32 1.442695, %v5163_v54 }
 0x55a   : > { %v12190_v11 = vpop.xlane.xlu0 %5119  ;;  %5233 = vadd.xlane.f32.xlu0 %v5232_v2 }
 0x55b   : > { %9998 = vpow2.f32 %v5190_v31 }
 0x55c   : > { %5251 = vadd.xlane.f32.xlu1 %v5250_v63 }
 0x55e   : > { %v3049_v32 = vpop.permute.xlu0 %3048  ;;  %5245 = vadd.xlane.f32.xlu0 %v5244_v26 }
 0x55f   : > { %v3382_v61 = vcombine.low %v3049_v32, %v3085_v62  ;;  %v3383_v1 = vcombine.high %v3049_v32, %v3085_v62 }
 0x560   : > { %5239 = vadd.xlane.f32.xlu1 %v5238_v46 }
 0x561   : > { %v12204_v18 = vpop.eup %9996  ;;  %v3390_v14 = vrot.slane %v3382_v61, %v11124_v23  ;;  %v3397_v24 = vrot.slane %v3383_v1, %v11124_v23 }
 0x562   : > { %v5256_v54 = vsel %vm5087_vm4, %v12204_v18, 0.0 }
 0x563   : > { %v3398_v57 = vcombine.low %v3374_v27, %v3390_v14  ;;  %v3399_v33 = vcombine.high %v3374_v27, %v3390_v14  ;;  %v3414_v0 = vcombine.low %v3381_v22, %v3397_v24  ;;  %v3415_v31 = vcombine.high %v3381_v22, %v3397_v24  ;;  %5257 = vadd.xlane.f32.xlu0 %v5256_v54 }
 0x565   : > { %v12218_v5 = vpop.eup %9998  ;;  %v3406_v2 = vrot.slane %v3398_v57, %v11134_v35  ;;  %v3413_v36 = vrot.slane %v3399_v33, %v11134_v35  ;;  %v3422_v12 = vrot.slane %v3414_v0, %v11134_v35  ;;  %v3429_v62 = vrot.slane %v3415_v31, %v11134_v35 }
 0x566   : > { %v5241_v32 = vsel %vm5087_vm4, %v12218_v5, 0.0 }
 0x567   : > { %v3774_v61 = vcombine.low %v3406_v2, %v3413_v36  ;;  %v9008_v1 = vcombine.high %v3406_v2, %v3413_v36  ;;  %v3790_v26 = vcombine.low %v3422_v12, %v3429_v62  ;;  %v9009_v63 = vcombine.high %v3422_v12, %v3429_v62  ;;  %5242 = vadd.xlane.f32.xlu0 %v5241_v32 }
 0x569   : > { %v3781_v27 = vrot.slane %v3774_v61, %v11124_v23  ;;  %v3789_v22 = vrot.slane %v9008_v1, %v11124_v23  ;;  %v3797_v14 = vrot.slane %v3790_v26, %v11124_v23  ;;  %v3805_v24 = vrot.slane %v9009_v63, %v11124_v23 }
 0x56a   : > { %v5105_v46 = vpop.xlane.xlu1 %5104 }
 0x56b   : > { %v3806_v54 = vcombine.low %v3781_v27, %v3789_v22  ;;  %v3822_v57 = vcombine.low %v3797_v14, %v3805_v24  ;;  %v3807_v33 = vcombine.high %v3781_v27, %v3789_v22  ;;  %v3823_v0 = vcombine.high %v3797_v14, %v3805_v24 }
 0x56c   : > { %v5165_v31 = vsub.f32 %v12092_v60, %v5105_v46  ;;  %v12245_v60 = vadd.f32 %v11270_v25, %v11151_v7  ;;  %v5170_v14 = vsub.f32 %v12087_v28, %v12190_v11 }
 0x56d   : > { %v3814_v2 = vrot.slane %v3806_v54, %v11134_v35  ;;  %v3830_v36 = vrot.slane %v3822_v57, %v11134_v35  ;;  %v3821_v12 = vrot.slane %v3807_v33, %v11134_v35  ;;  %v3837_v62 = vrot.slane %v3823_v0, %v11134_v35 }
 0x56e   : > { %v5194_v32 = vmul.f32 1.442695, %v5165_v31  ;;  %v5111_v24 = vpop.xlane.xlu1 %5110  ;;  %v5204_v46 = vmul.f32 1.442695, %v5170_v14 }
 0x56f   : > { %v12235_v61 = vcombine.low %v3814_v2, %v3830_v36  ;;  %v12237_v1 = vcombine.low %v3821_v12, %v3837_v62  ;;  %v12239_v26 = vcombine.high %v3814_v2, %v3830_v36  ;;  %v12241_v63 = vcombine.high %v3821_v12, %v3837_v62 }
 0x570   : > { %10000 = vpow2.f32 %v5194_v32  ;;  %v5167_v54 = vsub.f32 %v12097_v30, %v5111_v24 }
 0x571   : > { %3050 = vrot.lane.b32.xlu1 %v12245_v60, %s10481_s11  ;;  %10002 = vpow2.f32 %v5204_v46 }
 0x572   : > { %v5117_v57 = vpop.xlane.xlu1 %5116  ;;  %v5198_v33 = vmul.f32 1.442695, %v5167_v54 }
 0x573   : > { %v5169_v0 = vsub.f32 %v12104_v52, %v5117_v57 }
 0x575   : > { %v5202_v12 = vmul.f32 1.442695, %v5169_v0 }
 0x576   : > { %v5123_v46 = vpop.xlane.xlu1 %5122 }
 0x577   : > { %v5171_v54 = vsub.f32 %v12109_v56, %v5123_v46 }
 0x57a   : > { %v12249_v27 = vpop.eup %10000  ;;  %v5129_v57 = vpop.xlane.xlu1 %5128 }
 0x57b   : > { %v5247_v22 = vsel %vm5087_vm4, %v12249_v27, 0.0  ;;  %v12259_v11 = vpop.eup %10002  ;;  %v5173_v0 = vsub.f32 %v12114_v49, %v5129_v57 }
 0x57c   : > { %5248 = vadd.xlane.f32.xlu0 %v5247_v22  ;;  %v5262_v30 = vsel %vm5087_vm4, %v12259_v11, 0.0 }
 0x58f   : > { %v5126_v7 = vpop.xlane.xlu0 %5125 }
 0x590   : > { %v5172_v25 = vsub.f32 %v12124_v37, %v5126_v7 }
 0x592   : > { %v5208_v31 = vmul.f32 1.442695, %v5172_v25 }
 0x593   : > { %v5132_v2 = vpop.xlane.xlu0 %5131 }
 0x594   : > { %10004 = vpow2.f32 %v5208_v31  ;;  %v5174_v36 = vsub.f32 %v12129_v38, %v5132_v2  ;;  %v5210_v2 = vmul.f32 1.442695, %v5173_v0 }
 0x595   : > { %10006 = vpow2.f32 %v5198_v33  ;;  %5263 = vadd.xlane.f32.xlu1 %v5262_v30  ;;  %v5206_v33 = vmul.f32 1.442695, %v5171_v54 }
 0x596   : > { %v5212_v28 = vmul.f32 1.442695, %v5174_v36  ;;  %v5135_v36 = vpop.xlane.xlu1 %5134 }
 0x597   : > { %v5175_v54 = vsub.f32 %v12119_v43, %v5135_v36 }
 0x598   : > { %10008 = vpow2.f32 %v5212_v28 }
 0x599   : > { %10010 = vpow2.f32 %v5202_v12  ;;  %v5214_v0 = vmul.f32 1.442695, %v5175_v54 }
 0x59e   : > { %v12263_v37 = vpop.eup %10004 }
 0x59f   : > { %v5268_v52 = vsel %vm5087_vm4, %v12263_v37, 0.0  ;;  %v12267_v62 = vpop.eup %10006 }
 0x5a0   : > { %5269 = vadd.xlane.f32.xlu0 %v5268_v52  ;;  %v5253_v32 = vsel %vm5087_vm4, %v12267_v62, 0.0 }
 0x5a2   : > { %v12269_v38 = vpop.eup %10008 }
 0x5a3   : > { %v5274_v22 = vsel %vm5087_vm4, %v12269_v38, 0.0  ;;  %v12275_v14 = vpop.eup %10010 }
 0x5a4   : > { %5254 = vadd.xlane.f32.xlu0 %v5253_v32  ;;  %5275 = vadd.xlane.f32.xlu1 %v5274_v22  ;;  %v5259_v24 = vsel %vm5087_vm4, %v12275_v14, 0.0 }
 0x5a8   : > { %5260 = vadd.xlane.f32.xlu1 %v5259_v24 }
 0x5ba   : > { %v5138_v7 = vpop.xlane.xlu0 %5137 }
 0x5bb   : > { %v5176_v25 = vsub.f32 %v12134_v41, %v5138_v7 }
 0x5bc   : > { %v5141_v12 = vpop.xlane.xlu1 %5140 }
 0x5bd   : > { %v5216_v31 = vmul.f32 1.442695, %v5176_v25  ;;  %v5177_v30 = vsub.f32 %v12137_v8, %v5141_v12 }
 0x5bf   : > { %10012 = vpow2.f32 %v5216_v31  ;;  %v5218_v22 = vmul.f32 1.442695, %v5177_v30 }
 0x5c0   : > { %10014 = vpow2.f32 %v5206_v33 }
 0x5c1   : > { %10016 = vpow2.f32 %v5210_v2 }
 0x5c9   : > { %v12282_v28 = vpop.eup %10012 }
 0x5ca   : > { %v5144_v52 = vpop.xlane.xlu0 %5143  ;;  %v5280_v56 = vsel %vm5087_vm4, %v12282_v28, 0.0  ;;  %v12287_v32 = vpop.eup %10014 }
 0x5cb   : > { %v5178_v41 = vsub.f32 %v12151_v42, %v5144_v52  ;;  %5281 = vadd.xlane.f32.xlu0 %v5280_v56  ;;  %v5265_v24 = vsel %vm5087_vm4, %v12287_v32, 0.0  ;;  %v12292_v46 = vpop.eup %10016  ;;  %v5147_v7 = vpop.xlane.xlu1 %5146 }
 0x5cc   : > { %v5271_v8 = vsel %vm5087_vm4, %v12292_v46, 0.0  ;;  %v5179_v31 = vsub.f32 %v12148_v59, %v5147_v7 }
 0x5cd   : > { %v5220_v49 = vmul.f32 1.442695, %v5178_v41 }
 0x5ce   : > { %v5222_v43 = vmul.f32 1.442695, %v5179_v31 }
 0x5cf   : > { %5266 = vadd.xlane.f32.xlu0 %v5265_v24  ;;  %10018 = vpow2.f32 %v5220_v49 }
 0x5d0   : > { %10020 = vpow2.f32 %v5218_v22 }
 0x5d3   : > { %5272 = vadd.xlane.f32.xlu0 %v5271_v8 }
 0x5d7   : > { %v5150_v57 = vpop.xlane.xlu0 %5149 }
 0x5d8   : > { %v5180_v42 = vsub.f32 %v12167_v4, %v5150_v57  ;;  %v5153_v2 = vpop.xlane.xlu1 %5152 }
 0x5d9   : > { %v12298_v33 = vpop.eup %10018  ;;  %v5181_v36 = vsub.f32 %v12164_v58, %v5153_v2 }
 0x5da   : > { %v5224_v25 = vmul.f32 1.442695, %v5180_v42  ;;  %v5286_v12 = vsel %vm5087_vm4, %v12298_v33, 0.0  ;;  %v12303_v30 = vpop.eup %10020 }
 0x5db   : > { %5287 = vadd.xlane.f32.xlu1 %v5286_v12  ;;  %v5283_v4 = vsel %vm5087_vm4, %v12303_v30, 0.0  ;;  %v5226_v59 = vmul.f32 1.442695, %v5181_v36 }
 0x5dc   : > { %10022 = vpow2.f32 %v5224_v25 }
 0x5dd   : > { %10024 = vpow2.f32 %v5214_v0 }
 0x5de   : > { %10026 = vpow2.f32 %v5222_v43 }
 0x5df   : > { %5284 = vadd.xlane.f32.xlu1 %v5283_v4  ;;  %10028 = vpow2.f32 %v5226_v59  ;;  %v3913_v4 = vpack.c.bf16 %v12007_v44, %v12007_v44 }
 0x5e1   : > { %v12308_v52 = vpop.xlane.xlu1 %5158 }
 0x5e3   : > { %v12310_v56 = vpop.xlane.xlu0 %5155 }
 0x5e5   : > { %v5237_v41 = vpop.xlane.xlu1 %5236 }
 0x5e6   : > { %v12312_v22 = vpop.eup %10022  ;;  %10030 = vrcp.f32 %v5237_v41 }
 0x5e7   : > { %v5234_v49 = vpop.xlane.xlu0 %5233  ;;  %v5292_v24 = vsel %vm5087_vm4, %v12312_v22, 0.0  ;;  %v12316_v8 = vpop.eup %10024 }
 0x5e8   : > { %5293 = vadd.xlane.f32.xlu0 %v5292_v24  ;;  %10032 = vrcp.f32 %v5234_v49  ;;  %v5277_v57 = vsel %vm5087_vm4, %v12316_v8, 0.0  ;;  %v12320_v7 = vpop.eup %10026  ;;  %v3912_v49 = vpack.c.bf16 %v12005_v40, %v12005_v40 }
 0x5e9   : > { %v5252_v58 = vpop.xlane.xlu1 %5251  ;;  %v5289_v0 = vsel %vm5087_vm4, %v12320_v7, 0.0  ;;  %v12324_v31 = vpop.eup %10028 }
 0x5ea   : > { %v5295_v59 = vsel %vm5087_vm4, %v12324_v31, 0.0  ;;  %v5473_v44 = vsel %vm5379_vm2, %v3912_v49, 0 }
 0x5eb   : > { %v5246_v54 = vpop.xlane.xlu0 %5245 }
 0x5ec   : > { %5278 = vadd.xlane.f32.xlu0 %v5277_v57 }
 0x5ed   : > { %v5240_v42 = vpop.xlane.xlu1 %5239 }
 0x5ee   : > { %10034 = vrcp.f32 %v5240_v42  ;;  %v5519_v42 = vsel %vm5379_vm2, %v3913_v4, 0 }
 0x5f0   : > { %v5258_v25 = vpop.xlane.xlu0 %5257  ;;  %5290 = vadd.xlane.f32.xlu0 %v5289_v0  ;;  %3086 = vrot.lane.b32.xlu1 %v12245_v60, %s10482_s20  ;;  %v10031_v12 = vpop.eup %10030 }
 0x5f1   : > { %v5329_v36 = vmul.f32 %v10031_v12, %v12188_v10 }
 0x5f2   : > { %v10033_v43 = vpop.eup %10032 }
 0x5f3   : > { %v5328_v41 = vmul.f32 %v10033_v43, %v12181_v20  ;;  %v5353_v24 = vpack.c.bf16 %v5329_v36, %v5329_v36  ;;  %v5182_v43 = vsub.f32 %v12179_v16, %v12310_v56  ;;  %v3916_v16 = vpack.c.bf16 %v12021_v53, %v12021_v53 }
 0x5f4   : > { %v5243_v2 = vpop.xlane.xlu0 %5242  ;;  %5296 = vadd.xlane.f32.xlu0 %v5295_v59  ;;  %v3314_v59 = vcombine.low %v12145_v39, %v12153_v6  ;;  %v3298_v53 = vcombine.low %v11261_v17, %v12143_v15 }
 0x5f5   : > { %10036 = vrcp.f32 %v5243_v2  ;;  %v5352_v57 = vpack.c.bf16 %v5328_v41, %v5328_v41  ;;  %9525 = vmatmul.mubr.msk.bf16.vlgmr.msra.gmra.mrb[68].mxu1 %vm5087_vm4, %v5353_v24  ;;  %v5657_v41 = vsel %vm5379_vm2, %v3916_v16, 0  ;;  %v3299_v24 = vcombine.high %v11261_v17, %v12143_v15 }
 0x5f6   : > { %10038 = vrcp.f32 %v5246_v54  ;;  %9535 = vmatpush3.bf16.msra.mxu1 %v5519_v42  ;;  %9536 = vmatprep.mubr.msk.bf16.mxu1 %vm10479_vm0, %v13350_v50  ;;  %v3914_v54 = vpack.c.bf16 %v12014_v51, %v12014_v51  ;;  %v3918_v42 = vpack.c.bf16 %v12032_v21, %v12032_v21 }
 0x5f7   : > { %9519 = vmatmul.mubr.msk.bf16.vlgmr.msra.gmra.mrb[52].mxu0 %vm5087_vm4, %v5352_v57  ;;  %9546 = vmatprep.subr.bf16.mxu1 %v13350_v50  ;;  %10040 = vrcp.f32 %v5252_v58  ;;  %v3322_v57 = vrot.slane %v3314_v59, %v11124_v23 }
 0x5f8   : > { %v10035_v10 = vpop.eup %10034  ;;  %9529 = vmatpush3.bf16.msra.mxu0 %v5473_v44  ;;  %9530 = vmatprep.mubr.msk.bf16.mxu0 %vm10479_vm0, %v13350_v50  ;;  %v5565_v4 = vsel %vm5379_vm2, %v3914_v54, 0  ;;  %10042 = vrcp.f32 %v5258_v25  ;;  %v3315_v25 = vcombine.high %v12145_v39, %v12153_v6  ;;  %v3917_v54 = vpack.c.bf16 %v12026_v48, %v12026_v48 }
 0x5f9   : > { %v5330_v0 = vmul.f32 %v10035_v10, %v12202_v13  ;;  %9540 = vmatprep.subr.bf16.mxu0 %v13350_v50  ;;  %v3915_v13 = vpack.c.bf16 %v12016_v3, %v12016_v3  ;;  %v5228_v3 = vmul.f32 1.442695, %v5182_v43  ;;  %v3306_v10 = vrot.slane %v3298_v53, %v11124_v23 }
 0x5fa   : > { %v3329_v44 = vrot.slane %v3315_v25, %v11124_v23  ;;  %v5183_v43 = vsub.f32 %v12176_v9, %v12308_v52 }
 0x5fb   : > { %v5354_v20 = vpack.c.bf16 %v5330_v0, %v5330_v0  ;;  %v5611_v51 = vsel %vm5379_vm2, %v3915_v13, 0  ;;  %v3313_v0 = vrot.slane %v3299_v24, %v11124_v23  ;;  %v3331_v15 = vcombine.high %v3306_v10, %v3322_v57 }
 0x5fd   : > { %v3347_v13 = vcombine.high %v3313_v0, %v3329_v44  ;;  %v3345_v48 = vrot.slane %v3331_v15, %v11134_v35 }
 0x5ff   : > { %v10037_v40 = vpop.eup %10036  ;;  %9531 = vmatmul.mubr.msk.bf16.vlgmr.msra.gmra.mrb[56].mxu0 %vm5087_vm4, %v5354_v20  ;;  %v5749_v20 = vsel %vm5379_vm2, %v3918_v42, 0  ;;  %v3361_v9 = vrot.slane %v3347_v13, %v11134_v35 }
 0x600   : > { %v5331_v2 = vmul.f32 %v10037_v40, %v12218_v5  ;;  %v10039_v12 = vpop.eup %10038  ;;  %9541 = vmatpush3.bf16.msra.mxu0 %v5565_v4  ;;  %9542 = vmatprep.mubr.msk.bf16.mxu0 %vm10479_vm0, %v13350_v50  ;;  %v3330_v40 = vcombine.low %v3306_v10, %v3322_v57  ;;  %v3920_v4 = vpack.c.bf16 %v12034_v45, %v12034_v45  ;;  %v5230_v45 = vmul.f32 1.442695, %v5183_v43 }
 0x601   : > { %v5332_v58 = vmul.f32 %v10039_v12, %v12192_v34  ;;  %9552 = vmatprep.subr.bf16.mxu0 %v13350_v50  ;;  %v10041_v34 = vpop.eup %10040 }
 0x602   : > { %v5355_v36 = vpack.c.bf16 %v5331_v2, %v5331_v2  ;;  %v5334_v49 = vmul.f32 %v10041_v34, %v12198_v19  ;;  %v10043_v6 = vpop.eup %10042  ;;  %v3346_v2 = vcombine.low %v3313_v0, %v3329_v44 }
 0x603   : > { %v5356_v56 = vpack.c.bf16 %v5332_v58, %v5332_v58  ;;  %v5336_v12 = vmul.f32 %v10043_v6, %v12204_v18  ;;  %v5703_v18 = vsel %vm5379_vm2, %v3917_v54, 0 }
 0x604   : > { %9537 = vmatmul.mubr.msk.bf16.vlgmr.msra.gmra.mrb[72].mxu1 %vm5087_vm4, %v5355_v36  ;;  %v5358_v39 = vpack.c.bf16 %v5334_v49, %v5334_v49  ;;  %v3354_v58 = vrot.slane %v3346_v2, %v11134_v35  ;;  %v12424_v49 = vpop.permute.xlu1 %3050 }
 0x605   : > { %9547 = vmatpush3.bf16.msra.mxu1 %v5611_v51  ;;  %9548 = vmatprep.mubr.msk.bf16.mxu1 %vm10479_vm0, %v13350_v50  ;;  %v3338_v51 = vrot.slane %v3330_v40, %v11134_v35  ;;  %v5360_v52 = vpack.c.bf16 %v5336_v12, %v5336_v12 }
 0x606   : > { %9558 = vmatprep.subr.bf16.mxu1 %v13350_v50  ;;  %v9007_v34 = vcombine.high %v3354_v58, %v3361_v9 }
 0x607   : > { %9543 = vmatmul.mubr.msk.bf16.vlgmr.msra.gmra.mrb[60].mxu0 %vm5087_vm4, %v5356_v56  ;;  %v3706_v16 = vcombine.low %v3338_v51, %v3345_v48  ;;  %v3722_v56 = vcombine.low %v3354_v58, %v3361_v9 }
 0x608   : > { %9553 = vmatpush3.bf16.msra.mxu0 %v5657_v41  ;;  %9554 = vmatprep.mubr.msk.bf16.mxu0 %vm10479_vm0, %v13350_v50  ;;  %v3737_v25 = vrot.slane %v9007_v34, %v11124_v23 }
 0x609   : > { %v5249_v5 = vpop.xlane.xlu0 %5248  ;;  %9564 = vmatprep.subr.bf16.mxu0 %v13350_v50  ;;  %v3713_v59 = vrot.slane %v3706_v16, %v11124_v23  ;;  %v3729_v53 = vrot.slane %v3722_v56, %v11124_v23 }
 0x60a   : > { %10044 = vrcp.f32 %v5249_v5  ;;  %3068 = vrot.lane.b32.xlu0 %v12245_v60, %s10480_s5  ;;  %v9006_v5 = vcombine.high %v3338_v51, %v3345_v48 }
 0x60b   : > { %10046 = vpow2.f32 %v5228_v3  ;;  %v5841_v3 = vsel %vm5379_vm2, %v3920_v4, 0  ;;  %v3754_v42 = vcombine.low %v3729_v53, %v3737_v25 }
 0x60c   : > { %10048 = vpow2.f32 %v5230_v45  ;;  %v3721_v41 = vrot.slane %v9006_v5, %v11124_v23 }
 0x60d   : > { %v12432_v6 = vrot.slane %v3754_v42, %v11134_v35  ;;  %v3928_v42 = vpack.c.bf16 %v12237_v1, %v12237_v1 }
 0x60e   : > { %v3738_v57 = vcombine.low %v3713_v59, %v3721_v41  ;;  %v3739_v15 = vcombine.high %v3713_v59, %v3721_v41  ;;  %v3921_v59 = vpack.c.bf16 %v12038_v29, %v12038_v29 }
 0x60f   : > { %9555 = vmatmul.mubr.msk.bf16.vlgmr.msra.gmra.mrb[64].mxu0 %vm5087_vm4, %v5358_v39 }
 0x610   : > { %9565 = vmatpush3.bf16.msra.mxu0 %v5749_v20  ;;  %9566 = vmatprep.mubr.msk.bf16.mxu0 %vm10479_vm0, %v13350_v50  ;;  %v12429_v39 = vrot.slane %v3738_v57, %v11134_v35  ;;  %v12440_v43 = vrot.slane %v3739_v15, %v11134_v35 }
 0x611   : > { %9576 = vmatprep.subr.bf16.mxu0 %v13350_v50 }
 0x612   : > { %v3770_v20 = vcombine.low %v12429_v39, %v12432_v6 }
 0x614   : > { %v10045_v19 = vpop.eup %10044  ;;  %v3922_v12 = vpack.c.bf16 %v3770_v20, %v3770_v20  ;;  %v6209_v20 = vsel %vm5379_vm2, %v3928_v42, 0 }
 0x615   : > { %v12391_v17 = vpop.eup %10046  ;;  %v5333_v21 = vmul.f32 %v10045_v19, %v12249_v27 }
 0x616   : > { %v5298_v27 = vsel %vm5087_vm4, %v12391_v17, 0.0  ;;  %v12426_v10 = vpop.eup %10048  ;;  %v5933_v51 = vsel %vm5379_vm2, %v3922_v12, 0 }
 0x617   : > { %v5357_v36 = vpack.c.bf16 %v5333_v21, %v5333_v21  ;;  %5299 = vadd.xlane.f32.xlu1 %v5298_v27  ;;  %9567 = vmatmul.mubr.msk.bf16.vlgmr.msra.gmra.mrb[68].mxu0 %vm5087_vm4, %v5360_v52  ;;  %v5301_v19 = vsel %vm5087_vm4, %v12426_v10, 0.0  ;;  %v3755_v21 = vcombine.high %v3729_v53, %v3737_v25  ;;  %v3919_v52 = vpack.c.bf16 %v12036_v55, %v12036_v55 }
 0x618   : > { %9577 = vmatpush3.bf16.msra.mxu0 %v5841_v3  ;;  %9578 = vmatprep.mubr.msk.bf16.mxu0 %vm10479_vm0, %v13350_v50 }
 0x619   : > { %9549 = vmatmul.mubr.msk.bf16.vlgmr.msra.gmra.mrb[76].mxu1 %vm5087_vm4, %v5357_v36  ;;  %9588 = vmatprep.subr.bf16.mxu0 %v13350_v50  ;;  %v12443_v36 = vrot.slane %v3755_v21, %v11134_v35 }
 0x61a   : > { %9559 = vmatpush3.bf16.msra.mxu1 %v5703_v18  ;;  %9560 = vmatprep.mubr.msk.bf16.mxu1 %vm10479_vm0, %v13350_v50 }
 0x61b   : > { %9570 = vmatprep.subr.bf16.mxu1 %v13350_v50  ;;  %v3772_v48 = vcombine.low %v12440_v43, %v12443_v36 }
 0x61d   : > { %v3924_v58 = vpack.c.bf16 %v3772_v48, %v3772_v48 }
 0x61f   : > { %v6025_v56 = vsel %vm5379_vm2, %v3924_v58, 0 }
 0x622   : > { %v5264_v24 = vpop.xlane.xlu1 %5263 }
 0x623   : > { %10050 = vrcp.f32 %v5264_v24 }
 0x629   : > { %5302 = vadd.xlane.f32.xlu0 %v5301_v19 }
 0x62d   : > { %v5270_v44 = vpop.xlane.xlu0 %5269  ;;  %v10051_v54 = vpop.eup %10050 }
 0x62e   : > { %10052 = vrcp.f32 %v5270_v44  ;;  %v5338_v2 = vmul.f32 %v10051_v54, %v12259_v11  ;;  %v3771_v44 = vcombine.high %v12429_v39, %v12432_v6 }
 0x630   : > { %v5362_v4 = vpack.c.bf16 %v5338_v2, %v5338_v2  ;;  %v3923_v15 = vpack.c.bf16 %v3771_v44, %v3771_v44 }
 0x631   : > { %v5276_v0 = vpop.xlane.xlu1 %5275  ;;  %v5255_v40 = vpop.xlane.xlu0 %5254 }
 0x632   : > { %10054 = vrcp.f32 %v5255_v40  ;;  %9579 = vmatmul.mubr.msk.bf16.vlgmr.msra.gmra.mrb[72].mxu0 %vm5087_vm4, %v5362_v4  ;;  %v5979_v39 = vsel %vm5379_vm2, %v3923_v15, 0 }
 0x633   : > { %10056 = vrcp.f32 %v5276_v0  ;;  %9589 = vmatpush3.bf16.msra.mxu0 %v5933_v51  ;;  %9590 = vmatprep.mubr.msk.bf16.mxu0 %vm10479_vm0, %v13350_v50 }
 0x634   : > { %9600 = vmatprep.subr.bf16.mxu0 %v13350_v50 }
 0x635   : > { %v5261_v13 = vpop.xlane.xlu1 %5260 }
 0x636   : > { %10058 = vrcp.f32 %v5261_v13 }
 0x638   : > { %v10053_v27 = vpop.eup %10052 }
 0x639   : > { %v5340_v11 = vmul.f32 %v10053_v27, %v12263_v37  ;;  %v5795_v37 = vsel %vm5379_vm2, %v3919_v52, 0 }
 0x63b   : > { %v5364_v45 = vpack.c.bf16 %v5340_v11, %v5340_v11 }
 0x63c   : > { %v10055_v18 = vpop.eup %10054 }
 0x63d   : > { %v5335_v9 = vmul.f32 %v10055_v18, %v12267_v62  ;;  %v10057_v3 = vpop.eup %10056  ;;  %9591 = vmatmul.mubr.msk.bf16.vlgmr.msra.gmra.mrb[76].mxu0 %vm5087_vm4, %v5364_v45  ;;  %v3926_v62 = vpack.c.bf16 %v12235_v61, %v12235_v61  ;;  %v3927_v45 = vpack.c.bf16 %v12239_v26, %v12239_v26 }
 0x63e   : > { %9601 = vmatpush3.bf16.msra.mxu0 %v6025_v56  ;;  %v5342_v34 = vmul.f32 %v10057_v3, %v12269_v38  ;;  %9602 = vmatprep.mubr.msk.bf16.mxu0 %vm10479_vm0, %v13350_v50 }
 0x63f   : > { %v5359_v16 = vpack.c.bf16 %v5335_v9, %v5335_v9  ;;  %9612 = vmatprep.subr.bf16.mxu0 %v13350_v50  ;;  %v6117_v53 = vsel %vm5379_vm2, %v3926_v62, 0 }
 0x640   : > { %v10059_v5 = vpop.eup %10058  ;;  %v5366_v38 = vpack.c.bf16 %v5342_v34, %v5342_v34 }
 0x641   : > { %9561 = vmatmul.mubr.msk.bf16.vlgmr.msra.gmra.mrb[80].mxu1 %vm5087_vm4, %v5359_v16  ;;  %v5337_v55 = vmul.f32 %v10059_v5, %v12275_v14  ;;  %v5887_v14 = vsel %vm5379_vm2, %v3921_v59, 0 }
 0x642   : > { %9571 = vmatpush3.bf16.msra.mxu1 %v5795_v37  ;;  %9572 = vmatprep.mubr.msk.bf16.mxu1 %vm10479_vm0, %v13350_v50 }
 0x643   : > { %9582 = vmatprep.subr.bf16.mxu1 %v13350_v50  ;;  %v5361_v41 = vpack.c.bf16 %v5337_v55, %v5337_v55 }
 0x645   : > { %9603 = vmatmul.mubr.msk.bf16.vlgmr.msra.gmra.mrb[80].mxu0 %vm5087_vm4, %v5366_v38 }
 0x646   : > { %9613 = vmatpush3.bf16.msra.mxu0 %v6117_v53  ;;  %9614 = vmatprep.mubr.msk.bf16.mxu0 %vm10479_vm0, %v13350_v50 }
 0x647   : > { %9624 = vmatprep.subr.bf16.mxu0 %v13350_v50 }
 0x649   : > { %9573 = vmatmul.mubr.msk.bf16.vlgmr.msra.gmra.mrb[84].mxu1 %vm5087_vm4, %v5361_v41 }
 0x64a   : > { %9583 = vmatpush3.bf16.msra.mxu1 %v5887_v14  ;;  %9584 = vmatprep.mubr.msk.bf16.mxu1 %vm10479_vm0, %v13350_v50 }
 0x64b   : > { %9594 = vmatprep.subr.bf16.mxu1 %v13350_v50 }
 0x658   : > { %v5282_v29 = vpop.xlane.xlu0 %5281 }
 0x659   : > { %10060 = vrcp.f32 %v5282_v29 }
 0x65c   : > { %v5267_v61 = vpop.xlane.xlu0 %5266 }
 0x65d   : > { %10062 = vrcp.f32 %v5267_v61  ;;  %v3929_v61 = vpack.c.bf16 %v12241_v63, %v12241_v63 }
 0x65f   : > { %v6255_v15 = vsel %vm5379_vm2, %v3929_v61, 0 }
 0x660   : > { %v5273_v25 = vpop.xlane.xlu0 %5272 }
 0x661   : > { %10064 = vrcp.f32 %v5273_v25 }
 0x663   : > { %v10061_v24 = vpop.eup %10060 }
 0x664   : > { %v5344_v57 = vmul.f32 %v10061_v24, %v12282_v28 }
 0x666   : > { %v5368_v19 = vpack.c.bf16 %v5344_v57, %v5344_v57 }
 0x667   : > { %v10063_v0 = vpop.eup %10062 }
 0x668   : > { %v5339_v40 = vmul.f32 %v10063_v0, %v12287_v32  ;;  %9615 = vmatmul.mubr.msk.bf16.vlgmr.msra.gmra.mrb[84].mxu0 %vm5087_vm4, %v5368_v19  ;;  %v5288_v21 = vpop.xlane.xlu1 %5287  ;;  %v3773_v32 = vcombine.high %v12440_v43, %v12443_v36 }
 0x669   : > { %9625 = vmatpush3.bf16.msra.mxu0 %v6209_v20  ;;  %9626 = vmatprep.mubr.msk.bf16.mxu0 %vm10479_vm0, %v13350_v50  ;;  %10066 = vrcp.f32 %v5288_v21 }
 0x66a   : > { %v5363_v28 = vpack.c.bf16 %v5339_v40, %v5339_v40  ;;  %9636 = vmatprep.subr.bf16.mxu0 %v13350_v50  ;;  %v3925_v54 = vpack.c.bf16 %v3773_v32, %v3773_v32 }
 0x66b   : > { %v10065_v1 = vpop.eup %10064 }
 0x66c   : > { %9585 = vmatmul.mubr.msk.bf16.vlgmr.msra.gmra.mrb[88].mxu1 %vm5087_vm4, %v5363_v28  ;;  %v5341_v6 = vmul.f32 %v10065_v1, %v12292_v46  ;;  %v6071_v12 = vsel %vm5379_vm2, %v3925_v54, 0  ;;  %v5285_v36 = vpop.xlane.xlu1 %5284 }
 0x66d   : > { %9595 = vmatpush3.bf16.msra.mxu1 %v5979_v39  ;;  %9596 = vmatprep.mubr.msk.bf16.mxu1 %vm10479_vm0, %v13350_v50 }
 0x66e   : > { %9606 = vmatprep.subr.bf16.mxu1 %v13350_v50  ;;  %v5365_v2 = vpack.c.bf16 %v5341_v6, %v5341_v6 }
 0x670   : > { %v3087_v48 = vpop.permute.xlu1 %3086 }
 0x671   : > { %v3450_v18 = vcombine.low %v12424_v49, %v3087_v48  ;;  %v3451_v58 = vcombine.high %v12424_v49, %v3087_v48 }
 0x673   : > { %v10067_v13 = vpop.eup %10066  ;;  %v3458_v37 = vrot.slane %v3450_v18, %v11124_v23  ;;  %v3465_v34 = vrot.slane %v3451_v58, %v11124_v23 }
 0x674   : > { %9597 = vmatmul.mubr.msk.bf16.vlgmr.msra.gmra.mrb[92].mxu1 %vm5087_vm4, %v5365_v2  ;;  %v5346_v4 = vmul.f32 %v10067_v13, %v12298_v33 }
 0x675   : > { %v5294_v27 = vpop.xlane.xlu0 %5293  ;;  %9607 = vmatpush3.bf16.msra.mxu1 %v6071_v12  ;;  %9608 = vmatprep.mubr.msk.bf16.mxu1 %vm10479_vm0, %v13350_v50 }
 0x676   : > { %9618 = vmatprep.subr.bf16.mxu1 %v13350_v50  ;;  %v5370_v43 = vpack.c.bf16 %v5346_v4, %v5346_v4 }
 0x678   : > { %9627 = vmatmul.mubr.msk.bf16.vlgmr.msra.gmra.mrb[88].mxu0 %vm5087_vm4, %v5370_v43 }
 0x679   : > { %v5279_v46 = vpop.xlane.xlu0 %5278  ;;  %9638 = vmatprep.mubr.msk.bf16.mxu0 %vm10479_vm0, %v13350_v50 }
 0x67a   : > { %10068 = vrcp.f32 %v5279_v46 }
 0x67b   : > { %10070 = vrcp.f32 %v5285_v36 }
 0x67d   : > { %v5291_v51 = vpop.xlane.xlu0 %5290 }
 0x67e   : > { %10072 = vrcp.f32 %v5291_v51 }
 0x67f   : > { %10074 = vrcp.f32 %v5294_v27 }
 0x681   : > { %v5297_v33 = vpop.xlane.xlu0 %5296 }
 0x682   : > { %10076 = vrcp.f32 %v5297_v33 }
 0x684   : > { %v10069_v11 = vpop.eup %10068 }
 0x685   : > { %v5343_v9 = vmul.f32 %v10069_v11, %v12316_v8  ;;  %v3069_v52 = vpop.permute.xlu0 %3068  ;;  %v10071_v56 = vpop.eup %10070  ;;  %v6163_v8 = vsel %vm5379_vm2, %v3927_v45, 0 }
 0x686   : > { %v3434_v3 = vcombine.low %v12245_v60, %v3069_v52  ;;  %v3435_v16 = vcombine.high %v12245_v60, %v3069_v52  ;;  %v5345_v60 = vmul.f32 %v10071_v56, %v12303_v30 }
 0x687   : > { %v5367_v5 = vpack.c.bf16 %v5343_v9, %v5343_v9 }
 0x688   : > { %v3442_v55 = vrot.slane %v3434_v3, %v11124_v23  ;;  %v3449_v49 = vrot.slane %v3435_v16, %v11124_v23  ;;  %v5369_v42 = vpack.c.bf16 %v5345_v60, %v5345_v60  ;;  %v10073_v44 = vpop.eup %10072 }
 0x689   : > { %9609 = vmatmul.mubr.msk.bf16.vlgmr.msra.gmra.mrb[96].mxu1 %vm5087_vm4, %v5367_v5  ;;  %v5347_v1 = vmul.f32 %v10073_v44, %v12320_v7  ;;  %v10075_v2 = vpop.eup %10074 }
 0x68a   : > { %v3466_v26 = vcombine.low %v3442_v55, %v3458_v37  ;;  %v3467_v62 = vcombine.high %v3442_v55, %v3458_v37  ;;  %v3482_v59 = vcombine.low %v3449_v49, %v3465_v34  ;;  %v3483_v38 = vcombine.high %v3449_v49, %v3465_v34  ;;  %9619 = vmatpush3.bf16.msra.mxu1 %v6163_v8 }
 0x68b   : > { %9620 = vmatprep.mubr.msk.bf16.mxu1 %vm10479_vm0, %v13350_v50  ;;  %9630 = vmatprep.subr.bf16.mxu1 %v13350_v50  ;;  %v5371_v43 = vpack.c.bf16 %v5347_v1, %v5347_v1  ;;  %v5348_v36 = vmul.f32 %v10075_v2, %v12312_v22  ;;  %v13360_v8 = vmov 0  }
 0x68c   : > { %v3474_v41 = vrot.slane %v3466_v26, %v11134_v35  ;;  %v3481_v53 = vrot.slane %v3467_v62, %v11134_v35  ;;  %v3490_v14 = vrot.slane %v3482_v59, %v11134_v35  ;;  %v3497_v29 = vrot.slane %v3483_v38, %v11134_v35  ;;  %v10077_v27 = vpop.eup %10076 }
 0x68d   : > { %v5349_v58 = vmul.f32 %v10077_v27, %v12324_v31  ;;  %v5372_v9 = vpack.c.bf16 %v5348_v36, %v5348_v36 }
 0x68e   : > { %v3842_v25 = vcombine.low %v3474_v41, %v3481_v53  ;;  %v9010_v30 = vcombine.high %v3474_v41, %v3481_v53  ;;  %v3858_v24 = vcombine.low %v3490_v14, %v3497_v29  ;;  %v9011_v57 = vcombine.high %v3490_v14, %v3497_v29 }
 0x68f   : > { %v5373_v45 = vpack.c.bf16 %v5349_v58, %v5349_v58 }
 0x690   : > { %v3849_v19 = vrot.slane %v3842_v25, %v11124_v23  ;;  %v3857_v0 = vrot.slane %v9010_v30, %v11124_v23  ;;  %v3865_v40 = vrot.slane %v3858_v24, %v11124_v23  ;;  %v3873_v20 = vrot.slane %v9011_v57, %v11124_v23 }
 0x691   : > { %9621 = vmatmul.mubr.msk.bf16.vlgmr.msra.gmra.mrb[100].mxu1 %vm5087_vm4, %v5369_v42 }
 0x692   : > { %9631 = vmatpush3.bf16.msra.mxu1 %v6255_v15  ;;  %9632 = vmatprep.mubr.msk.bf16.mxu1 %vm10479_vm0, %v13350_v50  ;;  %v3874_v63 = vcombine.low %v3849_v19, %v3857_v0  ;;  %v3890_v21 = vcombine.low %v3865_v40, %v3873_v20  ;;  %v3875_v28 = vcombine.high %v3849_v19, %v3857_v0 }
 0x693   : > { %9642 = vmatprep.subr.bf16.mxu1 %v13350_v50  ;;  %v3891_v39 = vcombine.high %v3865_v40, %v3873_v20 }
 0x694   : > { %v3882_v32 = vrot.slane %v3874_v63, %v11134_v35  ;;  %v3898_v6 = vrot.slane %v3890_v21, %v11134_v35  ;;  %v3889_v54 = vrot.slane %v3875_v28, %v11134_v35 }
 0x695   : > { %v3905_v13 = vrot.slane %v3891_v39, %v11134_v35 }
 0x696   : > { %v3906_v12 = vcombine.low %v3882_v32, %v3898_v6  ;;  %v3907_v4 = vcombine.high %v3882_v32, %v3898_v6 }
 0x697   : > { %v3908_v46 = vcombine.low %v3889_v54, %v3905_v13  ;;  %v3909_v48 = vcombine.high %v3889_v54, %v3905_v13 }
 0x698   : > { %v3930_v7 = vpack.c.bf16 %v3906_v12, %v3906_v12  ;;  %v3931_v51 = vpack.c.bf16 %v3907_v4, %v3907_v4 }
 0x699   : > { %9633 = vmatmul.mubr.msk.bf16.vlgmr.msra.gmra.mrb[104].mxu1 %vm5087_vm4, %v5371_v43  ;;  %v3932_v18 = vpack.c.bf16 %v3908_v46, %v3908_v46  ;;  %v3933_v22 = vpack.c.bf16 %v3909_v48, %v3909_v48 }
 0x69a   : > { %v6301_v33 = vsel %vm5379_vm2, %v3930_v7, 0  ;;  %v6347_v11 = vsel %vm5379_vm2, %v3931_v51, 0  ;;  %9644 = vmatprep.mubr.msk.bf16.mxu1 %vm10479_vm0, %v13350_v50 }
 0x69b   : > { %9637 = vmatpush3.bf16.msra.mxu0 %v6301_v33  ;;  %9643 = vmatpush3.bf16.msra.mxu1 %v6347_v11  ;;  %v6393_v52 = vsel %vm5379_vm2, %v3932_v18, 0  ;;  %v6439_v31 = vsel %vm5379_vm2, %v3933_v22, 0 }
 0x69c   : > { %9648 = vmatprep.subr.bf16.mxu0 %v13350_v50  ;;  %9654 = vmatprep.subr.bf16.mxu1 %v13350_v50 }
 0x69e   : > { %9639 = vmatmul.mubr.msk.bf16.vlgmr.msra.gmra.mrb[92].mxu0 %vm5087_vm4, %v5372_v9 }
 0x69f   : > { %9649 = vmatpush3.bf16.msra.mxu0 %v6393_v52  ;;  %9650 = vmatprep.mubr.msk.bf16.mxu0 %vm10479_vm0, %v13350_v50 }
 0x6a0   : > { %9660 = vmatprep.subr.bf16.mxu0 %v13350_v50 }
 0x6a1   : > { %9645 = vmatmul.mubr.msk.bf16.vlgmr.msra.gmra.mrb[108].mxu1 %vm5087_vm4, %v5373_v45 }
 0x6a2   : > { %9655 = vmatpush3.bf16.msra.mxu1 %v6439_v31  ;;  %9656 = vmatprep.mubr.msk.bf16.mxu1 %vm10479_vm0, %v13350_v50 }
 0x6a4   : > { %v5300_v3 = vpop.xlane.xlu1 %5299 }
 0x6a5   : > { %10078 = vrcp.f32 %v5300_v3 }
 0x6af   : > { %v10079_v16 = vpop.eup %10078 }
 0x6b0   : > { %v5350_v5 = vmul.f32 %v10079_v16, %v12391_v17 }
 0x6b2   : > { %v5374_v56 = vpack.c.bf16 %v5350_v5, %v5350_v5 }
 0x6b4   : > { %9651 = vmatmul.mubr.msk.bf16.vlgmr.msra.gmra.mrb[96].mxu0 %vm5087_vm4, %v5374_v56 }
 0x6b5   : > { %9676 = vmatprep.mubr.msk.bf16.mxu0 %vm10479_vm0, %v13350_v50 }
 0x6b6   : > { %v5303_v37 = vpop.xlane.xlu0 %5302 }
 0x6b7   : > { %10080 = vrcp.f32 %v5303_v37 }
 0x6c1   : > { %v10081_v34 = vpop.eup %10080 }
 0x6c2   : > { %v5351_v55 = vmul.f32 %v10081_v34, %v12426_v10 }
 0x6c4   : > { %v5375_v49 = vpack.c.bf16 %v5351_v55, %v5351_v55 }
 0x6c6   : > { %9657 = vmatmul.mubr.msk.bf16.vlgmr.msra.gmra.mrb[112].mxu1 %vm5087_vm4, %v5375_v49 }
 0x6c7   : > { %7867 = vmatprep.mubr.bf16.mxu1 %v13360_v8 }
 0x6c8   : > { %v5463_v26 = vpop.f32.mrb[68].mxu1 }
 0x6c9   : > { %v9526_v59 = vpop.f32.mrb[69].mxu1 }
 0x6ca   : > { %v5417_v62 = vpop.f32.mrb[52].mxu0  ;;  %v5466_v38 = vpop.f32.mrb[70].mxu1 }
 0x6cb   : > { %v9520_v17 = vpop.f32.mrb[53].mxu0  ;;  %v9527_v41 = vpop.f32.mrb[71].mxu1 }
 0x6cc   : > { %v5420_v60 = vpop.f32.mrb[54].mxu0 }
 0x6cd   : > { %v9521_v53 = vpop.f32.mrb[55].mxu0 }
 0x6d2   : > { %v5509_v14 = vpop.f32.mrb[56].mxu0 }
 0x6d3   : > { %v6481_v29 = vcombine.low %v5417_v62, %v5509_v14  ;;  %v6482_v61 = vcombine.high %v5417_v62, %v5509_v14  ;;  %v9532_v25 = vpop.f32.mrb[57].mxu0 }
 0x6d4   : > { %v5512_v24 = vpop.f32.mrb[58].mxu0  ;;  %v9886_v25 = vld [vmem:[%s10903_s15] sm:$0xff]  }
 0x6d5   : > { %v9533_v44 = vpop.f32.mrb[59].mxu0  ;;  %v6489_v0 = vrot.slane %v6481_v29, %v11124_v23  ;;  %v6496_v40 = vrot.slane %v6482_v61, %v11124_v23  ;;  %9661 = vmatpush3.bf16.msra.mxu0 %v9886_v25  ;;  %v9888_v24 = vld [vmem:[%s10903_s15 + $0x10] sm:$0xff]  }
 0x6d6   : > { %9662 = vmatprep.subr.bf16.mxu0 %v13350_v50 }
 0x6d7   : > { %v5555_v30 = vpop.f32.mrb[72].mxu1 }
 0x6d8   : > { %v6497_v10 = vcombine.low %v5463_v26, %v5555_v30  ;;  %v6498_v57 = vcombine.high %v5463_v26, %v5555_v30  ;;  %v9538_v42 = vpop.f32.mrb[73].mxu1  ;;  %v9887_v30 = vld [vmem:[%s10903_s15 + $0x8] sm:$0xff]  }
 0x6d9   : > { %v5558_v19 = vpop.f32.mrb[74].mxu1  ;;  %9663 = vmatpush3.bf16.msra.mxu0 %v9887_v30 }
 0x6da   : > { %v6505_v20 = vrot.slane %v6497_v10, %v11124_v23  ;;  %v6512_v15 = vrot.slane %v6498_v57, %v11124_v23  ;;  %v9539_v63 = vpop.f32.mrb[75].mxu1  ;;  %v12580_v13 = vpop.f32.mrb[60].mxu0  ;;  %9664 = vmatprep.subr.bf16.mxu0 %v13350_v50 }
 0x6db   : > { %v9544_v12 = vpop.f32.mrb[61].mxu0 }
 0x6dc   : > { %v6513_v21 = vcombine.low %v6489_v0, %v6505_v20  ;;  %v6514_v28 = vcombine.high %v6489_v0, %v6505_v20  ;;  %v6529_v1 = vcombine.low %v6496_v40, %v6512_v15  ;;  %v6530_v39 = vcombine.high %v6496_v40, %v6512_v15  ;;  %v5604_v36 = vpop.f32.mrb[62].mxu0  ;;  %v9889_v40 = vld [vmem:[%s10903_s15 + $0x18] sm:$0xff]   ;;  %v9890_v20 = vld [vmem:[%s10903_s15 + $0x20] sm:$0xff]  }
 0x6dd   : > { %v9545_v7 = vpop.f32.mrb[63].mxu0  ;;  %9665 = vmatpush3.bf16.msra.mxu0 %v9888_v24 }
 0x6de   : > { %v6521_v32 = vrot.slane %v6513_v21, %v11134_v35  ;;  %v6528_v6 = vrot.slane %v6514_v28, %v11134_v35  ;;  %v6537_v54 = vrot.slane %v6529_v1, %v11134_v35  ;;  %v6544_v2 = vrot.slane %v6530_v39, %v11134_v35  ;;  %9666 = vmatprep.subr.bf16.mxu0 %v13350_v50  ;;  %v9891_v28 = vld [vmem:[%s10903_s15 + $0x28] sm:$0xff]  }
 0x6e0   : > { %v6889_v4 = vcombine.low %v6521_v32, %v6528_v6  ;;  %v9060_v27 = vcombine.high %v6521_v32, %v6528_v6  ;;  %v6905_v43 = vcombine.low %v6537_v54, %v6544_v2  ;;  %v9061_v46 = vcombine.high %v6537_v54, %v6544_v2 }
 0x6e1   : > { %9667 = vmatpush3.bf16.msra.mxu0 %v9889_v40 }
 0x6e2   : > { %v6896_v51 = vrot.slane %v6889_v4, %v11124_v23  ;;  %v6904_v48 = vrot.slane %v9060_v27, %v11124_v23  ;;  %v6912_v33 = vrot.slane %v6905_v43, %v11124_v23  ;;  %v6920_v11 = vrot.slane %v9061_v46, %v11124_v23  ;;  %v5693_v52 = vpop.f32.mrb[64].mxu0  ;;  %9668 = vmatprep.subr.bf16.mxu0 %v13350_v50 }
 0x6e3   : > { %v6549_v5 = vcombine.low %v12580_v13, %v5693_v52  ;;  %v6550_v56 = vcombine.high %v12580_v13, %v5693_v52  ;;  %v9556_v37 = vpop.f32.mrb[65].mxu0 }
 0x6e4   : > { %v6922_v18 = vcombine.high %v6896_v51, %v6904_v48  ;;  %v6938_v58 = vcombine.high %v6912_v33, %v6920_v11  ;;  %v6921_v9 = vcombine.low %v6896_v51, %v6904_v48  ;;  %v6937_v22 = vcombine.low %v6912_v33, %v6920_v11  ;;  %v5696_v34 = vpop.f32.mrb[66].mxu0 }
 0x6e5   : > { %v9557_v59 = vpop.f32.mrb[67].mxu0  ;;  %9669 = vmatpush3.bf16.msra.mxu0 %v9890_v20  ;;  %v6557_v13 = vrot.slane %v6549_v5, %v11124_v23  ;;  %v6564_v12 = vrot.slane %v6550_v56, %v11124_v23 }
 0x6e6   : > { %v12587_v45 = vrot.slane %v6922_v18, %v11134_v35  ;;  %v12590_v31 = vrot.slane %v6938_v58, %v11134_v35  ;;  %v12593_v3 = vrot.slane %v6921_v9, %v11134_v35  ;;  %v12596_v16 = vrot.slane %v6937_v22, %v11134_v35  ;;  %9670 = vmatprep.subr.bf16.mxu0 %v13350_v50 }
 0x6e8   : > { %v6955_v55 = vcombine.low %v12587_v45, %v12590_v31  ;;  %v6954_v49 = vcombine.high %v12593_v3, %v12596_v16  ;;  %v6956_v26 = vcombine.high %v12587_v45, %v12590_v31  ;;  %v6953_v62 = vcombine.low %v12593_v3, %v12596_v16 }
 0x6e9   : > { %9671 = vmatpush3.bf16.msra.mxu0 %v9891_v28 }
 0x6ea   : > { %v12608_v41 = vpop.f32.mrb[68].mxu0  ;;  %9672 = vmatprep.subr.bf16.mxu0 %v13350_v50 }
 0x6eb   : > { %v9568_v14 = vpop.f32.mrb[69].mxu0 }
 0x6ec   : > { %v5647_v17 = vpop.f32.mrb[76].mxu1  ;;  %v5788_v29 = vpop.f32.mrb[70].mxu0  ;;  %v9892_v14 = vld [vmem:[%s10903_s15 + $0x30] sm:$0xff]  }
 0x6ed   : > { %v9550_v38 = vpop.f32.mrb[77].mxu1  ;;  %v9569_v61 = vpop.f32.mrb[71].mxu0  ;;  %9673 = vmatpush3.bf16.msra.mxu0 %v9892_v14 }
 0x6ee   : > { %v5650_v60 = vpop.f32.mrb[78].mxu1  ;;  %9674 = vmatprep.subr.bf16.mxu0 %v13350_v50 }
 0x6ef   : > { %v9551_v53 = vpop.f32.mrb[79].mxu1 }
 0x705   : > { %v12616_v10 = vpop.f32.mrb[72].mxu0 }
 0x706   : > { %v6617_v57 = vcombine.low %v12608_v41, %v12616_v10  ;;  %v6618_v42 = vcombine.high %v12608_v41, %v12616_v10  ;;  %v9580_v44 = vpop.f32.mrb[73].mxu0 }
 0x707   : > { %v5880_v19 = vpop.f32.mrb[74].mxu0 }
 0x708   : > { %v9581_v0 = vpop.f32.mrb[75].mxu0  ;;  %v6625_v45 = vrot.slane %v6617_v57, %v11124_v23  ;;  %v6632_v31 = vrot.slane %v6618_v42, %v11124_v23 }
 0x710   : > { %v12625_v15 = vpop.f32.mrb[76].mxu0 }
 0x711   : > { %v9592_v63 = vpop.f32.mrb[77].mxu0 }
 0x712   : > { %v5972_v32 = vpop.f32.mrb[78].mxu0 }
 0x713   : > { %v9593_v54 = vpop.f32.mrb[79].mxu0 }
 0x714   : > { %v5739_v21 = vpop.f32.mrb[80].mxu1 }
 0x715   : > { %v6565_v1 = vcombine.low %v5647_v17, %v5739_v21  ;;  %v6566_v39 = vcombine.high %v5647_v17, %v5739_v21  ;;  %v9562_v6 = vpop.f32.mrb[81].mxu1 }
 0x716   : > { %v5742_v2 = vpop.f32.mrb[82].mxu1 }
 0x717   : > { %v6573_v4 = vrot.slane %v6565_v1, %v11124_v23  ;;  %v6580_v27 = vrot.slane %v6566_v39, %v11124_v23  ;;  %v9563_v43 = vpop.f32.mrb[83].mxu1 }
 0x718   : > { %v12638_v58 = vpop.f32.mrb[80].mxu0 }
 0x719   : > { %v6581_v46 = vcombine.low %v6557_v13, %v6573_v4  ;;  %v6582_v36 = vcombine.high %v6557_v13, %v6573_v4  ;;  %v6597_v7 = vcombine.low %v6564_v12, %v6580_v27  ;;  %v6598_v51 = vcombine.high %v6564_v12, %v6580_v27  ;;  %v9604_v52 = vpop.f32.mrb[81].mxu0  ;;  %v9893_v12 = vld [vmem:[%s10903_s15 + $0x38] sm:$0xff]  }
 0x71a   : > { %v6685_v9 = vcombine.low %v12625_v15, %v12638_v58  ;;  %v6686_v22 = vcombine.high %v12625_v15, %v12638_v58  ;;  %v6064_v17 = vpop.f32.mrb[82].mxu0  ;;  %9675 = vmatpush3.bf16.msra.mxu0 %v9893_v12 }
 0x71b   : > { %v6589_v48 = vrot.slane %v6581_v46, %v11134_v35  ;;  %v6596_v33 = vrot.slane %v6582_v36, %v11134_v35  ;;  %v6605_v11 = vrot.slane %v6597_v7, %v11134_v35  ;;  %v6612_v18 = vrot.slane %v6598_v51, %v11134_v35  ;;  %v9605_v60 = vpop.f32.mrb[83].mxu0 }
 0x71c   : > { %v5831_v5 = vpop.f32.mrb[84].mxu1 }
 0x71d   : > { %v6957_v56 = vcombine.low %v6589_v48, %v6596_v33  ;;  %v9062_v37 = vcombine.high %v6589_v48, %v6596_v33  ;;  %v6973_v34 = vcombine.low %v6605_v11, %v6612_v18  ;;  %v9063_v59 = vcombine.high %v6605_v11, %v6612_v18  ;;  %v9574_v38 = vpop.f32.mrb[85].mxu1 }
 0x71e   : > { %v5834_v53 = vpop.f32.mrb[86].mxu1 }
 0x71f   : > { %v6964_v29 = vrot.slane %v6957_v56, %v11124_v23  ;;  %v6972_v61 = vrot.slane %v9062_v37, %v11124_v23  ;;  %v6980_v25 = vrot.slane %v6973_v34, %v11124_v23  ;;  %v6988_v30 = vrot.slane %v9063_v59, %v11124_v23  ;;  %v9575_v24 = vpop.f32.mrb[87].mxu1 }
 0x721   : > { %v6990_v44 = vcombine.high %v6964_v29, %v6972_v61  ;;  %v7006_v19 = vcombine.high %v6980_v25, %v6988_v30  ;;  %v6989_v0 = vcombine.low %v6964_v29, %v6972_v61  ;;  %v7005_v40 = vcombine.low %v6980_v25, %v6988_v30 }
 0x723   : > { %v7004_v20 = vrot.slane %v6990_v44, %v11134_v35  ;;  %v7020_v63 = vrot.slane %v7006_v19, %v11134_v35  ;;  %v12653_v21 = vrot.slane %v6989_v0, %v11134_v35  ;;  %v12656_v28 = vrot.slane %v7005_v40, %v11134_v35 }
 0x725   : > { %v7023_v1 = vcombine.low %v7004_v20, %v7020_v63  ;;  %v7022_v39 = vcombine.high %v12653_v21, %v12656_v28  ;;  %v7024_v32 = vcombine.high %v7004_v20, %v7020_v63  ;;  %v7021_v6 = vcombine.low %v12653_v21, %v12656_v28 }
 0x727   : > { %v9814_v54 = vpack.i.bf16 %v7023_v1, %v6955_v55  ;;  %v9809_v2 = vpack.i.bf16 %v7022_v39, %v6954_v49  ;;  %v9819_v13 = vpack.i.bf16 %v7024_v32, %v6956_v26 }
 0x729   : > { %9815 = vrot.lane.b32.xlu1 %v9814_v54, %s10480_s5  ;;  %9810 = vrot.lane.b32.xlu0 %v9809_v2, %s10482_s20 }
 0x72d   : > { %9820 = vrot.lane.b32.xlu1 %v9819_v13, %s10481_s11 }
 0x73b   : > { %v12675_v4 = vpop.f32.mrb[84].mxu0 }
 0x73c   : > { %v9616_v27 = vpop.f32.mrb[85].mxu0 }
 0x73d   : > { %v6156_v55 = vpop.f32.mrb[86].mxu0 }
 0x73e   : > { %v9617_v43 = vpop.f32.mrb[87].mxu0 }
 0x73f   : > { %v5923_v46 = vpop.f32.mrb[88].mxu1 }
 0x740   : > { %v6633_v36 = vcombine.low %v5831_v5, %v5923_v46  ;;  %v6634_v49 = vcombine.high %v5831_v5, %v5923_v46  ;;  %v9586_v7 = vpop.f32.mrb[89].mxu1 }
 0x741   : > { %v5926_v51 = vpop.f32.mrb[90].mxu1 }
 0x742   : > { %v6641_v26 = vrot.slane %v6633_v36, %v11124_v23  ;;  %v6648_v48 = vrot.slane %v6634_v49, %v11124_v23  ;;  %v9587_v33 = vpop.f32.mrb[91].mxu1  ;;  %v6693_v51 = vrot.slane %v6685_v9, %v11124_v23 }
 0x744   : > { %v6649_v11 = vcombine.low %v6625_v45, %v6641_v26  ;;  %v6650_v18 = vcombine.high %v6625_v45, %v6641_v26  ;;  %v6665_v52 = vcombine.low %v6632_v31, %v6648_v48  ;;  %v6666_v5 = vcombine.high %v6632_v31, %v6648_v48 }
 0x745   : > { %v6700_v45 = vrot.slane %v6686_v22, %v11124_v23 }
 0x746   : > { %v6657_v56 = vrot.slane %v6649_v11, %v11134_v35  ;;  %v6664_v37 = vrot.slane %v6650_v18, %v11134_v35  ;;  %v6673_v57 = vrot.slane %v6665_v52, %v11134_v35  ;;  %v6680_v34 = vrot.slane %v6666_v5, %v11134_v35 }
 0x747   : > { %v6015_v59 = vpop.f32.mrb[92].mxu1 }
 0x748   : > { %v7025_v41 = vcombine.low %v6657_v56, %v6664_v37  ;;  %v9064_v10 = vcombine.high %v6657_v56, %v6664_v37  ;;  %v7041_v42 = vcombine.low %v6673_v57, %v6680_v34  ;;  %v9065_v17 = vcombine.high %v6673_v57, %v6680_v34  ;;  %v9598_v38 = vpop.f32.mrb[93].mxu1 }
 0x749   : > { %v6018_v60 = vpop.f32.mrb[94].mxu1 }
 0x74a   : > { %v7032_v53 = vrot.slane %v7025_v41, %v11124_v23  ;;  %v7040_v14 = vrot.slane %v9064_v10, %v11124_v23  ;;  %v7048_v29 = vrot.slane %v7041_v42, %v11124_v23  ;;  %v7056_v61 = vrot.slane %v9065_v17, %v11124_v23  ;;  %v9599_v25 = vpop.f32.mrb[95].mxu1 }
 0x74b   : > { %v12695_v30 = vpop.f32.mrb[88].mxu0 }
 0x74c   : > { %v7058_v24 = vcombine.high %v7032_v53, %v7040_v14  ;;  %v7074_v44 = vcombine.high %v7048_v29, %v7056_v61  ;;  %v7057_v19 = vcombine.low %v7032_v53, %v7040_v14  ;;  %v7073_v0 = vcombine.low %v7048_v29, %v7056_v61  ;;  %v9628_v63 = vpop.f32.mrb[89].mxu0 }
 0x74d   : > { %v6753_v40 = vcombine.low %v12675_v4, %v12695_v30  ;;  %v6754_v20 = vcombine.high %v12675_v4, %v12695_v30  ;;  %v6248_v1 = vpop.f32.mrb[90].mxu0 }
 0x74e   : > { %v12702_v39 = vrot.slane %v7058_v24, %v11134_v35  ;;  %v12705_v32 = vrot.slane %v7074_v44, %v11134_v35  ;;  %v12708_v54 = vrot.slane %v7057_v19, %v11134_v35  ;;  %v12711_v2 = vrot.slane %v7073_v0, %v11134_v35  ;;  %v9629_v13 = vpop.f32.mrb[91].mxu0 }
 0x74f   : > { %v6761_v13 = vrot.slane %v6753_v40, %v11124_v23 }
 0x750   : > { %v7091_v12 = vcombine.low %v12702_v39, %v12705_v32  ;;  %v7090_v4 = vcombine.high %v12708_v54, %v12711_v2  ;;  %v7092_v27 = vcombine.high %v12702_v39, %v12705_v32  ;;  %v7089_v55 = vcombine.low %v12708_v54, %v12711_v2 }
 0x75c   : > { %v6107_v43 = vpop.f32.mrb[96].mxu1 }
 0x75d   : > { %v6701_v46 = vcombine.low %v6015_v59, %v6107_v43  ;;  %v6702_v36 = vcombine.high %v6015_v59, %v6107_v43  ;;  %v9610_v49 = vpop.f32.mrb[97].mxu1  ;;  %v6768_v43 = vrot.slane %v6754_v20, %v11124_v23 }
 0x75e   : > { %v6110_v7 = vpop.f32.mrb[98].mxu1 }
 0x75f   : > { %v6709_v31 = vrot.slane %v6701_v46, %v11124_v23  ;;  %v6716_v26 = vrot.slane %v6702_v36, %v11124_v23  ;;  %v9611_v48 = vpop.f32.mrb[99].mxu1 }
 0x761   : > { %v6717_v33 = vcombine.low %v6693_v51, %v6709_v31  ;;  %v6718_v11 = vcombine.high %v6693_v51, %v6709_v31  ;;  %v6733_v18 = vcombine.low %v6700_v45, %v6716_v26  ;;  %v6734_v52 = vcombine.high %v6700_v45, %v6716_v26 }
 0x763   : > { %v6725_v5 = vrot.slane %v6717_v33, %v11134_v35  ;;  %v6732_v56 = vrot.slane %v6718_v11, %v11134_v35  ;;  %v6741_v9 = vrot.slane %v6733_v18, %v11134_v35  ;;  %v6748_v37 = vrot.slane %v6734_v52, %v11134_v35 }
 0x764   : > { %v6199_v57 = vpop.f32.mrb[100].mxu1 }
 0x765   : > { %v7093_v15 = vcombine.low %v6725_v5, %v6732_v56  ;;  %v9066_v58 = vcombine.high %v6725_v5, %v6732_v56  ;;  %v7109_v22 = vcombine.low %v6741_v9, %v6748_v37  ;;  %v9067_v34 = vcombine.high %v6741_v9, %v6748_v37  ;;  %v9622_v59 = vpop.f32.mrb[101].mxu1 }
 0x766   : > { %v6202_v41 = vpop.f32.mrb[102].mxu1 }
 0x767   : > { %v7100_v10 = vrot.slane %v7093_v15, %v11124_v23  ;;  %v7108_v42 = vrot.slane %v9066_v58, %v11124_v23  ;;  %v7116_v17 = vrot.slane %v7109_v22, %v11124_v23  ;;  %v7124_v38 = vrot.slane %v9067_v34, %v11124_v23  ;;  %v9623_v60 = vpop.f32.mrb[103].mxu1 }
 0x769   : > { %v7126_v53 = vcombine.high %v7100_v10, %v7108_v42  ;;  %v7142_v14 = vcombine.high %v7116_v17, %v7124_v38  ;;  %v7125_v29 = vcombine.low %v7100_v10, %v7108_v42  ;;  %v7141_v61 = vcombine.low %v7116_v17, %v7124_v38 }
 0x76b   : > { %v7140_v25 = vrot.slane %v7126_v53, %v11134_v35  ;;  %v7156_v30 = vrot.slane %v7142_v14, %v11134_v35  ;;  %v12742_v24 = vrot.slane %v7125_v29, %v11134_v35  ;;  %v12745_v44 = vrot.slane %v7141_v61, %v11134_v35 }
 0x76c   : > { %v6291_v19 = vpop.f32.mrb[104].mxu1 }
 0x76d   : > { %v6769_v0 = vcombine.low %v6199_v57, %v6291_v19  ;;  %v6770_v63 = vcombine.high %v6199_v57, %v6291_v19  ;;  %v9634_v1 = vpop.f32.mrb[105].mxu1  ;;  %v7159_v39 = vcombine.low %v7140_v25, %v7156_v30  ;;  %v7158_v32 = vcombine.high %v12742_v24, %v12745_v44 }
 0x76e   : > { %v6294_v46 = vpop.f32.mrb[106].mxu1  ;;  %v7160_v36 = vcombine.high %v7140_v25, %v7156_v30  ;;  %v7157_v49 = vcombine.low %v12742_v24, %v12745_v44 }
 0x76f   : > { %v6777_v7 = vrot.slane %v6769_v0, %v11124_v23  ;;  %v6784_v51 = vrot.slane %v6770_v63, %v11124_v23  ;;  %v9635_v45 = vpop.f32.mrb[107].mxu1  ;;  %v9829_v31 = vpack.i.bf16 %v7159_v39, %v7091_v12  ;;  %v9824_v26 = vpack.i.bf16 %v7158_v32, %v7090_v4 }
 0x770   : > { %v9834_v48 = vpack.i.bf16 %v7160_v36, %v7092_v27 }
 0x771   : > { %v6785_v33 = vcombine.low %v6761_v13, %v6777_v7  ;;  %v6786_v11 = vcombine.high %v6761_v13, %v6777_v7  ;;  %v6801_v18 = vcombine.low %v6768_v43, %v6784_v51  ;;  %v6802_v52 = vcombine.high %v6768_v43, %v6784_v51  ;;  %9830 = vrot.lane.b32.xlu0 %v9829_v31, %s10480_s5  ;;  %v6337_v40 = vpop.f32.mrb[92].mxu0 }
 0x772   : > { %9825 = vrot.lane.b32.xlu1 %v9824_v26, %s10482_s20  ;;  %v9640_v20 = vpop.f32.mrb[93].mxu0 }
 0x773   : > { %v6793_v5 = vrot.slane %v6785_v33, %v11134_v35  ;;  %v6800_v56 = vrot.slane %v6786_v11, %v11134_v35  ;;  %v6809_v9 = vrot.slane %v6801_v18, %v11134_v35  ;;  %v6816_v12 = vrot.slane %v6802_v52, %v11134_v35  ;;  %v6340_v4 = vpop.f32.mrb[94].mxu0 }
 0x774   : > { %v9641_v27 = vpop.f32.mrb[95].mxu0  ;;  %v6383_v37 = vpop.f32.mrb[108].mxu1 }
 0x775   : > { %v7161_v57 = vcombine.low %v6793_v5, %v6800_v56  ;;  %v9068_v15 = vcombine.high %v6793_v5, %v6800_v56  ;;  %v7177_v58 = vcombine.low %v6809_v9, %v6816_v12  ;;  %v9069_v22 = vcombine.high %v6809_v9, %v6816_v12  ;;  %v9646_v34 = vpop.f32.mrb[109].mxu1 }
 0x776   : > { %9835 = vrot.lane.b32.xlu1 %v9834_v48, %s10481_s11  ;;  %v6386_v59 = vpop.f32.mrb[110].mxu1 }
 0x777   : > { %v7168_v41 = vrot.slane %v7161_v57, %v11124_v23  ;;  %v7176_v10 = vrot.slane %v9068_v15, %v11124_v23  ;;  %v7184_v42 = vrot.slane %v7177_v58, %v11124_v23  ;;  %v7192_v17 = vrot.slane %v9069_v22, %v11124_v23  ;;  %v9647_v38 = vpop.f32.mrb[111].mxu1 }
 0x779   : > { %v7194_v60 = vcombine.high %v7168_v41, %v7176_v10  ;;  %v7210_v53 = vcombine.high %v7184_v42, %v7192_v17  ;;  %v7193_v14 = vcombine.low %v7168_v41, %v7176_v10  ;;  %v7209_v29 = vcombine.low %v7184_v42, %v7192_v17 }
 0x77b   : > { %v12767_v61 = vrot.slane %v7194_v60, %v11134_v35  ;;  %v12770_v25 = vrot.slane %v7210_v53, %v11134_v35  ;;  %v12773_v30 = vrot.slane %v7193_v14, %v11134_v35  ;;  %v12776_v19 = vrot.slane %v7209_v29, %v11134_v35 }
 0x77d   : > { %v7227_v0 = vcombine.low %v12767_v61, %v12770_v25  ;;  %v7226_v63 = vcombine.high %v12773_v30, %v12776_v19  ;;  %v7228_v1 = vcombine.high %v12767_v61, %v12770_v25  ;;  %v7225_v39 = vcombine.low %v12773_v30, %v12776_v19  ;;  %v9072_v30 = vld [vmem:[%s13361_s16] ss:$0 sm:$0xff] }
 0x787   : > { %v6429_v32 = vpop.f32.mrb[96].mxu0 }
 0x788   : > { %v6821_v13 = vcombine.low %v6337_v40, %v6429_v32  ;;  %v6822_v43 = vcombine.high %v6337_v40, %v6429_v32  ;;  %v9652_v46 = vpop.f32.mrb[97].mxu0 }
 0x789   : > { %v6432_v36 = vpop.f32.mrb[98].mxu0 }
 0x78a   : > { %v9653_v7 = vpop.f32.mrb[99].mxu0  ;;  %v6829_v4 = vrot.slane %v6821_v13, %v11124_v23  ;;  %v6836_v21 = vrot.slane %v6822_v43, %v11124_v23 }
 0x799   : > { %v6475_v40 = vpop.f32.mrb[112].mxu1 }
 0x79a   : > { %v6837_v56 = vcombine.low %v6383_v37, %v6475_v40  ;;  %v6838_v9 = vcombine.high %v6383_v37, %v6475_v40  ;;  %v9658_v12 = vpop.f32.mrb[113].mxu1 }
 0x79b   : > { %v9816_v51 = vpop.permute.xlu1 %9815  ;;  %v9811_v45 = vpop.permute.xlu0 %9810 }
 0x79c   : > { %v9813_v31 = vunpack.i.h.bf16 %v9811_v45  ;;  %v9812_v26 = vunpack.i.l.bf16 %v9811_v45  ;;  %v9818_v48 = vunpack.i.h.bf16 %v9816_v51  ;;  %v9817_v33 = vunpack.i.l.bf16 %v9816_v51  ;;  %v6478_v3 = vpop.f32.mrb[114].mxu1 }
 0x79d   : > { %v6845_v27 = vrot.slane %v6837_v56, %v11124_v23  ;;  %v6852_v57 = vrot.slane %v6838_v9, %v11124_v23  ;;  %v9659_v15 = vpop.f32.mrb[115].mxu1 }
 0x79e   : > { %v7370_v11 = vsel %vm3934_vm1, %v7021_v6, %v9813_v31  ;;  %v7369_v18 = vsel %vm3934_vm1, %v6953_v62, %v9812_v26 }
 0x79f   : > { %v9821_v52 = vpop.permute.xlu1 %9820  ;;  %v7376_v28 = vsel %vm7375_vm5, %v7369_v18, %v9817_v33  ;;  %v7377_v6 = vsel %vm7375_vm5, %v7370_v11, %v9818_v48  ;;  %v6853_v58 = vcombine.low %v6829_v4, %v6845_v27  ;;  %v6854_v22 = vcombine.high %v6829_v4, %v6845_v27 }
 0x7a0   : > { %v9823_v20 = vunpack.i.h.bf16 %v9821_v52  ;;  %v9822_v5 = vunpack.i.l.bf16 %v9821_v52  ;;  %v6869_v34 = vcombine.low %v6836_v21, %v6852_v57  ;;  %v6870_v59 = vcombine.high %v6836_v21, %v6852_v57 }
 0x7a1   : > { %v6861_v41 = vrot.slane %v6853_v58, %v11134_v35  ;;  %v6868_v10 = vrot.slane %v6854_v22, %v11134_v35 }
 0x7a2   : > { %v7383_v16 = vsel %vm7382_vm6, %v7376_v28, %v9822_v5  ;;  %v7384_v62 = vsel %vm7382_vm6, %v7377_v6, %v9823_v20  ;;  %v6877_v42 = vrot.slane %v6869_v34, %v11134_v35  ;;  %v6884_v17 = vrot.slane %v6870_v59, %v11134_v35 }
 0x7a3   : > { %v7389_v37 = vpack.c.bf16 %v7384_v62, %v7383_v16  ;;  %v7229_v38 = vcombine.low %v6861_v41, %v6868_v10  ;;  %v9070_v60 = vcombine.high %v6861_v41, %v6868_v10 }
 0x7a4   : > { %v7245_v53 = vcombine.low %v6877_v42, %v6884_v17  ;;  %v9071_v14 = vcombine.high %v6877_v42, %v6884_v17  ;;  %v10142_v42 = vld [vmem:[#allocation2] sm:$0xff] }
 0x7a5   : > { %9677 = vmatmul.mubr.bf16.vlgmr.msra.gmra.mrb[100].mxu0 %v7389_v37  ;;  %v7236_v29 = vrot.slane %v7229_v38, %v11124_v23  ;;  %v7244_v32 = vrot.slane %v9070_v60, %v11124_v23 }
 0x7a6   : > { %9680 = vmatprep.mubr.msk.bf16.mxu0 %vm10479_vm0, %v13350_v50  ;;  %v7252_v13 = vrot.slane %v7245_v53, %v11124_v23  ;;  %v7260_v43 = vrot.slane %v9071_v14, %v11124_v23  ;;  %v10143_v53 = vld [vmem:[#allocation2 + $0x8] sm:$0xff] }
 0x7a7   : > { %v7262_v46 = vcombine.high %v7236_v29, %v7244_v32  ;;  %v7261_v7 = vcombine.low %v7236_v29, %v7244_v32 }
 0x7a8   : > { %v7278_v36 = vcombine.high %v7252_v13, %v7260_v43  ;;  %v7277_v51 = vcombine.low %v7252_v13, %v7260_v43 }
 0x7a9   : > { %v7276_v45 = vrot.slane %v7262_v46, %v11134_v35  ;;  %v7269_v26 = vrot.slane %v7261_v7, %v11134_v35  ;;  %v10144_v46 = vld [vmem:[#allocation2 + $0x10] sm:$0xff] }
 0x7aa   : > { %v7292_v31 = vrot.slane %v7278_v36, %v11134_v35  ;;  %v7285_v48 = vrot.slane %v7277_v51, %v11134_v35 }
 0x7ac   : > { %v7295_v33 = vcombine.low %v7276_v45, %v7292_v31  ;;  %v7294_v11 = vcombine.high %v7269_v26, %v7285_v48  ;;  %v7296_v18 = vcombine.high %v7276_v45, %v7292_v31  ;;  %v7293_v52 = vcombine.low %v7269_v26, %v7285_v48  ;;  %v10145_v45 = vld [vmem:[#allocation2 + $0x18] sm:$0xff] }
 0x7ae   : > { %v9844_v23 = vpack.i.bf16 %v7295_v33, %v7227_v0  ;;  %v9839_v40 = vpack.i.bf16 %v7294_v11, %v7226_v63  ;;  %v9849_v20 = vpack.i.bf16 %v7296_v18, %v7228_v1  ;;  %v10146_v18 = vld [vmem:[#allocation2 + $0x20] sm:$0xff] }
 0x7b0   : > { %9845 = vrot.lane.b32.xlu1 %v9844_v23, %s10480_s5  ;;  %9840 = vrot.lane.b32.xlu0 %v9839_v40, %s10482_s20 }
 0x7b4   : > { %9850 = vrot.lane.b32.xlu0 %v9849_v20, %s10481_s11  ;;  %v10147_v20 = vld [vmem:[#allocation2 + $0x28] sm:$0xff] }
 0x7e3   : > { %v9831_v35 = vpop.permute.xlu0 %9830 }
 0x7e4   : > { %v9826_v5 = vpop.permute.xlu1 %9825  ;;  %v9833_v12 = vunpack.i.h.bf16 %v9831_v35  ;;  %v9832_v0 = vunpack.i.l.bf16 %v9831_v35 }
 0x7e5   : > { %v9828_v56 = vunpack.i.h.bf16 %v9826_v5  ;;  %v9827_v9 = vunpack.i.l.bf16 %v9826_v5 }
 0x7e7   : > { %v7371_v63 = vsel %vm3934_vm1, %v7089_v55, %v9827_v9  ;;  %v7372_v61 = vsel %vm3934_vm1, %v7157_v49, %v9828_v56 }
 0x7e8   : > { %v9836_v25 = vpop.permute.xlu1 %9835  ;;  %v7379_v21 = vsel %vm7375_vm5, %v7372_v61, %v9833_v12  ;;  %v7378_v28 = vsel %vm7375_vm5, %v7371_v63, %v9832_v0 }
 0x7e9   : > { %v9838_v1 = vunpack.i.h.bf16 %v9836_v25  ;;  %v9837_v4 = vunpack.i.l.bf16 %v9836_v25 }
 0x7eb   : > { %v7385_v6 = vsel %vm7382_vm6, %v7378_v28, %v9837_v4  ;;  %v7386_v3 = vsel %vm7382_vm6, %v7379_v21, %v9838_v1  ;;  %v9894_v1 = vld [vmem:[%s10905_s28] ss:$16 sps:$4 sm:$0xff]   ;;  %v9896_v4 = vld [vmem:[%s10905_s28 + $0x4] ss:$16 sps:$4 sm:$0xff]   ;;  %v9897_v21 = vld [vmem:[%s10905_s28 + $0x8] ss:$16 sps:$4 sm:$0xff]  }
 0x7ec   : > { %v7390_v16 = vpack.c.bf16 %v7386_v3, %v7385_v6  ;;  %v9899_v28 = vld [vmem:[%s10905_s28 + $0xc] ss:$16 sps:$4 sm:$0xff]   ;;  %7835 = vmatprep.subr.bf16.mxu1 %v9896_v4  ;;  %v9902_v6 = vld [vmem:[%s10905_s28 + $0x24] ss:$16 sps:$4 sm:$0xff]   ;;  %v9900_v3 = vld [vmem:[%s10905_s28 + $0x20] ss:$16 sps:$4 sm:$0xff]  }
 0x7ed   : > { %7898 = vmatprep.subr.bf16.mxu0 %v9899_v28  ;;  %7836 = vmatpush1.bf16.msra.mxu1 %v9894_v1  ;;  %v12934_v4 = vld [vmem:[%s800_s9] ss:$0 sm:$0xff] }
 0x7ee   : > { %9681 = vmatmul.mubr.bf16.gmra.mrb[104].mxu0 %v7390_v16  ;;  %v9905_v16 = vld [vmem:[%s10905_s28 + $0x2c] ss:$16 sps:$4 sm:$0xff]   ;;  %7837 = vmatprep.subr.bf16.mxu1 %v9902_v6 }
 0x7ef   : > { %9684 = vmatprep.mubr.msk.bf16.mxu0 %vm10479_vm0, %v13350_v50  ;;  %7899 = vmatpush1.bf16.msra.mxu0 %v9897_v21 }
 0x7f0   : > { %7900 = vmatprep.subr.bf16.mxu0 %v9905_v16  ;;  %v12944_v16 = vld [vmem:[%s803_s4] ss:$0 sm:$0xff] }
 0x7f1   : > { %7838 = vmatpush1.bf16.msra.mxu1 %v9900_v3 }
 0x822   : > { %v9846_v54 = vpop.permute.xlu1 %9845  ;;  %v9841_v2 = vpop.permute.xlu0 %9840 }
 0x823   : > { %v9843_v55 = vunpack.i.h.bf16 %v9841_v2  ;;  %v9842_v24 = vunpack.i.l.bf16 %v9841_v2  ;;  %v9848_v44 = vunpack.i.h.bf16 %v9846_v54  ;;  %v9847_v49 = vunpack.i.l.bf16 %v9846_v54  ;;  %v9903_v54 = vld [vmem:[%s10905_s28 + $0x28] ss:$16 sps:$4 sm:$0xff]   ;;  %v9906_v2 = vld [vmem:[%s10905_s28 + $0x40] ss:$16 sps:$4 sm:$0xff]  }
 0x824   : > { %7901 = vmatpush1.bf16.msra.mxu0 %v9903_v54 }
 0x825   : > { %v7374_v62 = vsel %vm3934_vm1, %v7293_v52, %v9843_v55  ;;  %v7373_v27 = vsel %vm3934_vm1, %v7225_v39, %v9842_v24  ;;  %v9908_v55 = vld [vmem:[%s10905_s28 + $0x44] ss:$16 sps:$4 sm:$0xff]   ;;  %v9909_v24 = vld [vmem:[%s10905_s28 + $0x48] ss:$16 sps:$4 sm:$0xff]  }
 0x826   : > { %v9851_v57 = vpop.permute.xlu0 %9850  ;;  %v7380_v58 = vsel %vm7375_vm5, %v7373_v27, %v9847_v49  ;;  %v7381_v50 = vsel %vm7375_vm5, %v7374_v62, %v9848_v44  ;;  %v9911_v44 = vld [vmem:[%s10905_s28 + $0x4c] ss:$16 sps:$4 sm:$0xff]   ;;  %7839 = vmatprep.subr.bf16.mxu1 %v9908_v55  ;;  %v9914_v49 = vld [vmem:[%s10905_s28 + $0x64] ss:$16 sps:$4 sm:$0xff]   ;;  %v9912_v62 = vld [vmem:[%s10905_s28 + $0x60] ss:$16 sps:$4 sm:$0xff]  }
 0x827   : > { %v9853_v15 = vunpack.i.h.bf16 %v9851_v57  ;;  %v9852_v37 = vunpack.i.l.bf16 %v9851_v57  ;;  %7902 = vmatprep.subr.bf16.mxu0 %v9911_v44  ;;  %7840 = vmatpush1.bf16.msra.mxu1 %v9906_v2  ;;  %v9917_v27 = vld [vmem:[%s10905_s28 + $0x6c] ss:$16 sps:$4 sm:$0xff]   ;;  %v9915_v57 = vld [vmem:[%s10905_s28 + $0x68] ss:$16 sps:$4 sm:$0xff]  }
 0x828   : > { %7903 = vmatpush1.bf16.msra.mxu0 %v9909_v24  ;;  %7841 = vmatprep.subr.bf16.mxu1 %v9914_v49 }
 0x829   : > { %v7387_v22 = vsel %vm7382_vm6, %v7380_v58, %v9852_v37  ;;  %v7388_v34 = vsel %vm7382_vm6, %v7381_v50, %v9853_v15  ;;  %v9920_v15 = vld [vmem:[%s10905_s28 + $0x84] ss:$16 sps:$4 sm:$0xff]   ;;  %7904 = vmatprep.subr.bf16.mxu0 %v9917_v27  ;;  %v9923_v37 = vld [vmem:[%s10905_s28 + $0x8c] ss:$16 sps:$4 sm:$0xff]   ;;  %v9918_v58 = vld [vmem:[%s10905_s28 + $0x80] ss:$16 sps:$4 sm:$0xff]  }
 0x82a   : > { %v7391_v59 = vpack.c.bf16 %v7388_v34, %v7387_v22  ;;  %v9921_v50 = vld [vmem:[%s10905_s28 + $0x88] ss:$16 sps:$4 sm:$0xff]   ;;  %v9926_v22 = vld [vmem:[%s10905_s28 + $0xa4] ss:$16 sps:$4 sm:$0xff]   ;;  %v9929_v34 = vld [vmem:[%s10905_s28 + $0xac] ss:$16 sps:$4 sm:$0xff]  }
 0x82b   : > { %7842 = vmatpush1.bf16.msra.mxu1 %v9912_v62 }
 0x82c   : > { %9685 = vmatmul.mubr.bf16.gmra.mrb[108].mxu0 %v7391_v59  ;;  %7843 = vmatprep.subr.bf16.mxu1 %v9920_v15  ;;  %v9924_v59 = vld [vmem:[%s10905_s28 + $0xa0] ss:$16 sps:$4 sm:$0xff]  }
 0x82d   : > { %7930 = vmatprep.mubr.bf16.mxu0 %v13360_v8  ;;  %7905 = vmatpush1.bf16.msra.mxu0 %v9915_v57 }
 0x82e   : > { %7906 = vmatprep.subr.bf16.mxu0 %v9923_v37 }
 0x82f   : > { %7844 = vmatpush1.bf16.msra.mxu1 %v9918_v58 }
 0x830   : > { %7845 = vmatprep.subr.bf16.mxu1 %v9926_v22 }
 0x831   : > { %7907 = vmatpush1.bf16.msra.mxu0 %v9921_v50 }
 0x832   : > { %7908 = vmatprep.subr.bf16.mxu0 %v9929_v34 }
 0x833   : > { %7846 = vmatpush1.bf16.msra.mxu1 %v9924_v59 }
 0x878   : > { %v7497_v19 = vpop.f32.mrb[100].mxu0 }
 0x879   : > { %v7498_v39 = vadd.f32 %v9072_v30, %v7497_v19  ;;  %v9678_v41 = vpop.f32.mrb[101].mxu0  ;;  %v9932_v19 = vld [vmem:[%s10905_s28 + $0xc4] ss:$16 sps:$4 sm:$0xff]  }
 0x87a   : > { %v7500_v10 = vpop.f32.mrb[102].mxu0  ;;  %v9930_v41 = vld [vmem:[%s10905_s28 + $0xc0] ss:$16 sps:$4 sm:$0xff]   ;;  %7847 = vmatprep.subr.bf16.mxu1 %v9932_v19 }
 0x87b   : > { %v12857_v17 = vadd.f32 %v10142_v42, %v7498_v39  ;;  %v7501_v38 = vadd.f32 %v9072_v30, %v7500_v10  ;;  %v9679_v60 = vpop.f32.mrb[103].mxu0  ;;  %v9935_v39 = vld [vmem:[%s10905_s28 + $0xcc] ss:$16 sps:$4 sm:$0xff]   ;;  %v9933_v10 = vld [vmem:[%s10905_s28 + $0xc8] ss:$16 sps:$4 sm:$0xff]   ;;  %7848 = vmatpush1.bf16.msra.mxu1 %v9930_v41  ;;  %v9942_v19 = vld [vmem:[%s10943_s17 + $0x40] sm:$0xff]  }
 0x87c   : > { %v9938_v42 = vld [vmem:[%s10905_s28 + $0xe4] ss:$16 sps:$4 sm:$0xff]   ;;  %v9936_v60 = vld [vmem:[%s10905_s28 + $0xe0] ss:$16 sps:$4 sm:$0xff]  }
 0x87d   : > { %v12859_v14 = vadd.f32 %v10143_v53, %v7501_v38  ;;  %7528 = vadd.xlane.f32.xlu1 %v12857_v17  ;;  %v9941_v38 = vld [vmem:[%s10905_s28 + $0xec] ss:$16 sps:$4 sm:$0xff]   ;;  %7849 = vmatprep.subr.bf16.mxu1 %v9938_v42  ;;  %v9939_v53 = vld [vmem:[%s10905_s28 + $0xe8] ss:$16 sps:$4 sm:$0xff]   ;;  %v9944_v41 = vld [vmem:[%s10943_s17] sm:$0xff]  }
 0x87e   : > { %v9946_v42 = vld [vmem:[%s10943_s17 + $0x48] sm:$0xff]  }
 0x87f   : > { %7530 = vadd.xlane.f32.xlu0 %v12859_v14  ;;  %7850 = vmatpush1.bf16.msra.mxu1 %v9936_v60  ;;  %v9948_v60 = vld [vmem:[%s10943_s17 + $0x8] sm:$0xff]  }
 0x880   : > { %9276 = vmatprep.subr.bf16.mxu1 %v9942_v19 }
 0x8c1   : > { %v7505_v29 = vpop.f32.mrb[104].mxu0 }
 0x8c2   : > { %v7506_v32 = vadd.f32 %v9072_v30, %v7505_v29  ;;  %v9682_v13 = vpop.f32.mrb[105].mxu0 }
 0x8c3   : > { %v7508_v43 = vpop.f32.mrb[106].mxu0 }
 0x8c4   : > { %v12863_v36 = vadd.f32 %v10144_v46, %v7506_v32  ;;  %v7509_v7 = vadd.f32 %v9072_v30, %v7508_v43  ;;  %v9683_v51 = vpop.f32.mrb[107].mxu0 }
 0x8c6   : > { %7532 = vadd.xlane.f32.xlu0 %v12863_v36  ;;  %v12866_v31 = vadd.f32 %v10145_v45, %v7509_v7 }
 0x8ca   : > { %7534 = vadd.xlane.f32.xlu0 %v12866_v31 }
 0x8ff   : > { %v7513_v26 = vpop.f32.mrb[108].mxu0 }
 0x900   : > { %v7514_v48 = vadd.f32 %v9072_v30, %v7513_v26  ;;  %v9686_v33 = vpop.f32.mrb[109].mxu0 }
 0x901   : > { %v7516_v11 = vpop.f32.mrb[110].mxu0 }
 0x902   : > { %v12869_v52 = vadd.f32 %v10146_v18, %v7514_v48  ;;  %v7517_v23 = vadd.f32 %v9072_v30, %v7516_v11  ;;  %v9687_v40 = vpop.f32.mrb[111].mxu0  ;;  %v9927_v30 = vld [vmem:[%s10905_s28 + $0xa8] ss:$16 sps:$4 sm:$0xff]  }
 0x903   : > { %7909 = vmatpush1.bf16.msra.mxu0 %v9927_v30 }
 0x904   : > { %v12871_v35 = vadd.f32 %v10147_v20, %v7517_v23  ;;  %7536 = vadd.xlane.f32.xlu1 %v12869_v52  ;;  %7910 = vmatprep.subr.bf16.mxu0 %v9935_v39  ;;  %v9943_v39 = vld [vmem:[%s10943_s17 + $0xc0] sm:$0xff]  }
 0x906   : > { %7538 = vadd.xlane.f32.xlu0 %v12871_v35 }
 0x907   : > { %7911 = vmatpush1.bf16.msra.mxu0 %v9933_v10  ;;  %v9945_v10 = vld [vmem:[%s10943_s17 + $0x80] sm:$0xff]  }
 0x908   : > { %7912 = vmatprep.subr.bf16.mxu0 %v9941_v38  ;;  %v9947_v38 = vld [vmem:[%s10943_s17 + $0xc8] sm:$0xff]  }
 0x90a   : > { %v7529_v5 = vpop.xlane.xlu1 %7528 }
 0x90b   : > { %v7540_v56 = vmul.f32 0.0078125, %v7529_v5  ;;  %7913 = vmatpush1.bf16.msra.mxu0 %v9939_v53  ;;  %v9949_v53 = vld [vmem:[%s10943_s17 + $0x88] sm:$0xff]  }
 0x90c   : > { %v7531_v9 = vpop.xlane.xlu0 %7530  ;;  %9310 = vmatprep.subr.bf16.mxu0 %v9943_v39 }
 0x90d   : > { %v12876_v12 = vsub.f32 %v12857_v17, %v7540_v56  ;;  %v7541_v0 = vmul.f32 0.0078125, %v7531_v9 }
 0x90f   : > { %v12879_v63 = vsub.f32 %v12859_v14, %v7541_v0  ;;  %v7552_v61 = vmul.f32 %v12876_v12, %v12876_v12 }
 0x911   : > { %7558 = vadd.xlane.f32.xlu1 %v7552_v61  ;;  %v7553_v25 = vmul.f32 %v12879_v63, %v12879_v63 }
 0x913   : > { %7560 = vadd.xlane.f32.xlu0 %v7553_v25 }
 0x953   : > { %v7533_v29 = vpop.xlane.xlu0 %7532 }
 0x954   : > { %v7542_v32 = vmul.f32 0.0078125, %v7533_v29  ;;  %v9951_v29 = vld [vmem:[%s10943_s17 + $0xd0] sm:$0xff]  }
 0x956   : > { %v7548_v13 = vsub.f32 %v12863_v36, %v7542_v32  ;;  %v9952_v32 = vld [vmem:[%s10943_s17 + $0x10] sm:$0xff]  }
 0x957   : > { %v7535_v43 = vpop.xlane.xlu0 %7534 }
 0x958   : > { %v7543_v46 = vmul.f32 0.0078125, %v7535_v43  ;;  %v7554_v7 = vmul.f32 %v7548_v13, %v7548_v13 }
 0x95a   : > { %v7549_v51 = vsub.f32 %v12866_v31, %v7543_v46  ;;  %7562 = vadd.xlane.f32.xlu1 %v7554_v7  ;;  %v9954_v46 = vld [vmem:[%s10943_s17 + $0x58] sm:$0xff]  }
 0x95b   : > { %v9955_v7 = vld [vmem:[%s10943_s17 + $0xd8] sm:$0xff]  }
 0x95c   : > { %v7555_v45 = vmul.f32 %v7549_v51, %v7549_v51 }
 0x95e   : > { %7564 = vadd.xlane.f32.xlu0 %v7555_v45  ;;  %v9956_v45 = vld [vmem:[%s10943_s17 + $0x18] sm:$0xff]  }
 0x991   : > { %v7537_v26 = vpop.xlane.xlu1 %7536 }
 0x992   : > { %v7544_v48 = vmul.f32 0.0078125, %v7537_v26  ;;  %v9957_v26 = vld [vmem:[%s10943_s17 + $0x98] sm:$0xff]  }
 0x993   : > { %v7539_v33 = vpop.xlane.xlu0 %7538 }
 0x994   : > { %v12920_v11 = vsub.f32 %v12869_v52, %v7544_v48  ;;  %v7545_v18 = vmul.f32 0.0078125, %v7539_v33 }
 0x996   : > { %v12923_v23 = vsub.f32 %v12871_v35, %v7545_v18  ;;  %v7556_v40 = vmul.f32 %v12920_v11, %v12920_v11 }
 0x998   : > { %7566 = vadd.xlane.f32.xlu1 %v7556_v40  ;;  %v7557_v20 = vmul.f32 %v12923_v23, %v12923_v23  ;;  %v9958_v40 = vld [vmem:[%s10943_s17 + $0x60] sm:$0xff]  }
 0x99a   : > { %7568 = vadd.xlane.f32.xlu0 %v7557_v20  ;;  %v9959_v20 = vld [vmem:[%s10943_s17 + $0xe0] sm:$0xff]  }
 0x99e   : > { %v7559_v5 = vpop.xlane.xlu1 %7558 }
 0x99f   : > { %v7570_v56 = vmul.f32 0.0078125, %v7559_v5 }
 0x9a0   : > { %v7561_v9 = vpop.xlane.xlu0 %7560 }
 0x9a1   : > { %v7576_v0 = vadd.f32 1e-05, %v7570_v56  ;;  %v7571_v61 = vmul.f32 0.0078125, %v7561_v9  ;;  %v9960_v56 = vld [vmem:[%s10943_s17 + $0x20] sm:$0xff]  }
 0x9a2   : > { %v9961_v9 = vld [vmem:[%s10943_s17 + $0xa0] sm:$0xff]  }
 0x9a3   : > { %10082 = vrsqrt.f32 %v7576_v0  ;;  %v7577_v25 = vadd.f32 1e-05, %v7571_v61  ;;  %v9962_v0 = vld [vmem:[%s10943_s17 + $0x68] sm:$0xff]  }
 0x9a4   : > { %v9963_v61 = vld [vmem:[%s10943_s17 + $0xe8] sm:$0xff]  }
 0x9a5   : > { %10084 = vrsqrt.f32 %v7577_v25  ;;  %v9964_v25 = vld [vmem:[%s10943_s17 + $0x28] sm:$0xff]  }
 0x9ad   : > { %v10083_v1 = vpop.eup %10082 }
 0x9ae   : > { %v7588_v21 = vmul.f32 %v10083_v1, %v12876_v12  ;;  %v9965_v1 = vld [vmem:[%s10943_s17 + $0xa8] sm:$0xff]  }
 0x9af   : > { %v10085_v28 = vpop.eup %10084 }
 0x9b0   : > { %v7589_v6 = vmul.f32 %v10085_v28, %v12879_v63  ;;  %v7600_v3 = vmul.f32 %v12934_v4, %v7588_v21  ;;  %v9966_v21 = vld [vmem:[%s10943_s17 + $0x70] sm:$0xff]  }
 0x9b1   : > { %v9967_v28 = vld [vmem:[%s10943_s17 + $0xf0] sm:$0xff]  }
 0x9b2   : > { %v7601_v54 = vmul.f32 %v12934_v4, %v7589_v6  ;;  %v7612_v2 = vadd.f32 %v12944_v16, %v7600_v3  ;;  %v9968_v6 = vld [vmem:[%s10943_s17 + $0x30] sm:$0xff]  }
 0x9b3   : > { %v9969_v3 = vld [vmem:[%s10943_s17 + $0xb0] sm:$0xff]  }
 0x9b4   : > { %v7613_v55 = vadd.f32 %v12944_v16, %v7601_v54  ;;  %v9970_v54 = vld [vmem:[%s10943_s17 + $0x78] sm:$0xff]  }
 0x9b6   : > { %v7618_v24 = vpack.c.bf16 %v7613_v55, %v7612_v2  ;;  %v9971_v2 = vld [vmem:[%s10943_s17 + $0xf8] sm:$0xff]  }
 0x9b8   : > { %7868 = vmatmul.mubr.bf16.vlgmr.msra.gmra.mrb[116].mxu1 %v7618_v24  ;;  %7931 = vmatmul.mubr.bf16.vlgmr.msra.gmra.mrb[112].mxu0 %v7618_v24  ;;  %v9972_v24 = vld [vmem:[%s10943_s17 + $0x38] sm:$0xff]  }
 0x9b9   : > { %7877 = vmatprep.mubr.bf16.mxu1 %v13360_v8  ;;  %7940 = vmatprep.mubr.bf16.mxu0 %v13360_v8 }
 0x9ba   : > { %9277 = vmatpush3.bf16.msra.mxu1 %v9944_v41  ;;  %9311 = vmatpush3.bf16.msra.mxu0 %v9945_v10 }
 0x9bb   : > { %9278 = vmatprep.subr.bf16.mxu1 %v9946_v42  ;;  %9312 = vmatprep.subr.bf16.mxu0 %v9947_v38 }
 0x9be   : > { %9279 = vmatpush3.bf16.msra.mxu1 %v9948_v60  ;;  %9313 = vmatpush3.bf16.msra.mxu0 %v9949_v53 }
 0x9bf   : > { %9314 = vmatprep.subr.bf16.mxu0 %v9951_v29 }
 0x9e7   : > { %v7563_v12 = vpop.xlane.xlu1 %7562 }
 0x9e8   : > { %v7572_v63 = vmul.f32 0.0078125, %v7563_v12  ;;  %v9973_v12 = vld [vmem:[%s10943_s17 + $0xb8] sm:$0xff]  }
 0x9ea   : > { %v7578_v44 = vadd.f32 1e-05, %v7572_v63 }
 0x9eb   : > { %v7565_v49 = vpop.xlane.xlu0 %7564 }
 0x9ec   : > { %10086 = vrsqrt.f32 %v7578_v44  ;;  %v7573_v62 = vmul.f32 0.0078125, %v7565_v49 }
 0x9ee   : > { %v7579_v27 = vadd.f32 1e-05, %v7573_v62 }
 0x9f0   : > { %10088 = vrsqrt.f32 %v7579_v27 }
 0x9f6   : > { %v10087_v57 = vpop.eup %10086 }
 0x9f7   : > { %v7590_v15 = vmul.f32 %v10087_v57, %v7548_v13  ;;  %v9953_v13 = vld [vmem:[%s10943_s17 + $0x90] sm:$0xff]  }
 0x9f8   : > { %9315 = vmatpush3.bf16.msra.mxu0 %v9953_v13 }
 0x9f9   : > { %v7602_v50 = vmul.f32 %v12934_v4, %v7590_v15  ;;  %9316 = vmatprep.subr.bf16.mxu0 %v9955_v7 }
 0x9fa   : > { %v10089_v37 = vpop.eup %10088 }
 0x9fb   : > { %v7591_v58 = vmul.f32 %v10089_v37, %v7549_v51  ;;  %v7614_v34 = vadd.f32 %v12944_v16, %v7602_v50  ;;  %v13364_v50 = vsub.s32 0, %v11026_v47 }
 0x9fc   : > { %9317 = vmatpush3.bf16.msra.mxu0 %v9957_v26 }
 0x9fd   : > { %v7603_v22 = vmul.f32 %v12934_v4, %v7591_v58  ;;  %9318 = vmatprep.subr.bf16.mxu0 %v9959_v20  ;;  %v7653_v58 = vld [vmem:[%s10937_s22] sm:$0xf] }
 0x9ff   : > { %v7615_v59 = vadd.f32 %v12944_v16, %v7603_v22  ;;  %v12999_v22 = vrot.slane %v7653_v58, %v13364_v50 }
 0xa00   : > { %9319 = vmatpush3.bf16.msra.mxu0 %v9961_v9 }
 0xa01   : > { %v7619_v30 = vpack.c.bf16 %v7615_v59, %v7614_v34  ;;  %9320 = vmatprep.subr.bf16.mxu0 %v9963_v61 }
 0xa03   : > { %7878 = vmatmul.mubr.bf16.gmra.mrb[120].mxu1 %v7619_v30  ;;  %7941 = vmatmul.mubr.bf16.gmra.mrb[116].mxu0 %v7619_v30 }
 0xa04   : > { %7887 = vmatprep.mubr.bf16.mxu1 %v13360_v8  ;;  %7950 = vmatprep.mubr.bf16.mxu0 %v13360_v8  ;;  %v9950_v8 = vld [vmem:[%s10943_s17 + $0x50] sm:$0xff]  }
 0xa05   : > { %9280 = vmatprep.subr.bf16.mxu1 %v9950_v8  ;;  %9321 = vmatpush3.bf16.msra.mxu0 %v9965_v1 }
 0xa06   : > { %9281 = vmatpush3.bf16.msra.mxu1 %v9952_v32  ;;  %9322 = vmatprep.subr.bf16.mxu0 %v9967_v28 }
 0xa07   : > { %9282 = vmatprep.subr.bf16.mxu1 %v9954_v46 }
 0xa09   : > { %9323 = vmatpush3.bf16.msra.mxu0 %v9969_v3 }
 0xa0a   : > { %9283 = vmatpush3.bf16.msra.mxu1 %v9956_v45  ;;  %9324 = vmatprep.subr.bf16.mxu0 %v9971_v2 }
 0xa0b   : > { %9284 = vmatprep.subr.bf16.mxu1 %v9958_v40 }
 0xa0d   : > { %9325 = vmatpush3.bf16.msra.mxu0 %v9973_v12 }
 0xa0e   : > { %9285 = vmatpush3.bf16.msra.mxu1 %v9960_v56 }
 0xa0f   : > { %9286 = vmatprep.subr.bf16.mxu1 %v9962_v0 }
 0xa12   : > { %9287 = vmatpush3.bf16.msra.mxu1 %v9964_v25 }
 0xa13   : > { %9288 = vmatprep.subr.bf16.mxu1 %v9966_v21 }
 0xa16   : > { %9289 = vmatpush3.bf16.msra.mxu1 %v9968_v6 }
 0xa17   : > { %9290 = vmatprep.subr.bf16.mxu1 %v9970_v54 }
 0xa1a   : > { %9291 = vmatpush3.bf16.msra.mxu1 %v9972_v24 }
 0xa25   : > { %v7567_v43 = vpop.xlane.xlu1 %7566 }
 0xa26   : > { %v7574_v51 = vmul.f32 0.0078125, %v7567_v43 }
 0xa27   : > { %v7569_v48 = vpop.xlane.xlu0 %7568 }
 0xa28   : > { %v7580_v33 = vadd.f32 1e-05, %v7574_v51  ;;  %v7575_v18 = vmul.f32 0.0078125, %v7569_v48 }
 0xa2a   : > { %10090 = vrsqrt.f32 %v7580_v33  ;;  %v7581_v5 = vadd.f32 1e-05, %v7575_v18 }
 0xa2c   : > { %10092 = vrsqrt.f32 %v7581_v5 }
 0xa34   : > { %v10091_v55 = vpop.eup %10090 }
 0xa35   : > { %v7592_v63 = vmul.f32 %v10091_v55, %v12920_v11  ;;  %v7669_v11 = vsub.s32 3, %v11026_v47 }
 0xa36   : > { %v10093_v44 = vpop.eup %10092 }
 0xa37   : > { %v7593_v49 = vmul.f32 %v10093_v44, %v12923_v23  ;;  %v7604_v62 = vmul.f32 %v12934_v4, %v7592_v63  ;;  %v13365_v23 = vsub.s32 2, %v11026_v47  ;;  %v13009_v30 = vrot.slane %v7653_v58, %v7669_v11 }
 0xa39   : > { %v7605_v27 = vmul.f32 %v12934_v4, %v7593_v49  ;;  %v7616_v57 = vadd.f32 %v12944_v16, %v7604_v62  ;;  %v13003_v34 = vrot.slane %v7653_v58, %v13365_v23  ;;  %v13366_v4 = vsub.s32 1, %v11026_v47 }
 0xa3b   : > { %v7617_v15 = vadd.f32 %v12944_v16, %v7605_v27  ;;  %v13007_v59 = vrot.slane %v7653_v58, %v13366_v4 }
 0xa3d   : > { %v7620_v37 = vpack.c.bf16 %v7617_v15, %v7616_v57 }
 0xa3f   : > { %7888 = vmatmul.mubr.bf16.gmra.mrb[124].mxu1 %v7620_v37  ;;  %7951 = vmatmul.mubr.bf16.gmra.mrb[120].mxu0 %v7620_v37 }
 0xa8b   : > { %v7869_v16 = vpop.f32.mrb[116].mxu1  ;;  %v7932_v19 = vpop.f32.mrb[112].mxu0 }
 0xa8c   : > { %v13012_v39 = vadd.f32 %v7869_v16, %v12999_v22  ;;  %v13015_v41 = vadd.f32 %v7932_v19, %v13003_v34  ;;  %v7871_v10 = vpop.f32.mrb[117].mxu1  ;;  %v7934_v42 = vpop.f32.mrb[113].mxu0 }
 0xa8d   : > { %v13018_v38 = vadd.f32 %v7871_v10, %v13007_v59  ;;  %v13021_v60 = vadd.f32 %v7934_v42, %v13009_v30  ;;  %v7873_v47 = vpop.f32.mrb[118].mxu1  ;;  %v7936_v53 = vpop.f32.mrb[114].mxu0 }
 0xa8e   : > { %v7961_v8 = vmul.f32 %v13012_v39, %v13012_v39  ;;  %v7963_v29 = vmul.f32 %v13015_v41, %v13015_v41  ;;  %v13028_v32 = vadd.f32 %v7873_v47, %v12999_v22  ;;  %v13031_v13 = vadd.f32 %v7936_v53, %v13003_v34  ;;  %v7875_v43 = vpop.f32.mrb[119].mxu1  ;;  %v7938_v46 = vpop.f32.mrb[115].mxu0 }
 0xa8f   : > { %v7962_v7 = vmul.f32 %v13018_v38, %v13018_v38  ;;  %v7964_v51 = vmul.f32 %v13021_v60, %v13021_v60  ;;  %v13038_v45 = vadd.f32 %v7875_v43, %v13007_v59  ;;  %v13041_v26 = vadd.f32 %v7938_v46, %v13009_v30 }
 0xa90   : > { %v7985_v48 = vmul.f32 %v7961_v8, %v13012_v39  ;;  %v7987_v33 = vmul.f32 %v7963_v29, %v13015_v41  ;;  %v7965_v18 = vmul.f32 %v13028_v32, %v13028_v32  ;;  %v7967_v40 = vmul.f32 %v13031_v13, %v13031_v13 }
 0xa91   : > { %v7986_v20 = vmul.f32 %v7962_v7, %v13018_v38  ;;  %v7988_v5 = vmul.f32 %v7964_v51, %v13021_v60  ;;  %v7966_v56 = vmul.f32 %v13038_v45, %v13038_v45  ;;  %v7968_v9 = vmul.f32 %v13041_v26, %v13041_v26 }
 0xa92   : > { %v8009_v0 = vmul.f32 0.044715, %v7985_v48  ;;  %v8011_v61 = vmul.f32 0.044715, %v7987_v33  ;;  %v7989_v25 = vmul.f32 %v7965_v18, %v13028_v32  ;;  %v7991_v1 = vmul.f32 %v7967_v40, %v13031_v13 }
 0xa93   : > { %v8010_v21 = vmul.f32 0.044715, %v7986_v20  ;;  %v8012_v28 = vmul.f32 0.044715, %v7988_v5  ;;  %v7990_v6 = vmul.f32 %v7966_v56, %v13038_v45  ;;  %v7992_v3 = vmul.f32 %v7968_v9, %v13041_v26 }
 0xa94   : > { %v8033_v54 = vadd.f32 %v8009_v0, %v13012_v39  ;;  %v8035_v2 = vadd.f32 %v8011_v61, %v13015_v41  ;;  %v8013_v55 = vmul.f32 0.044715, %v7989_v25  ;;  %v8015_v24 = vmul.f32 0.044715, %v7991_v1 }
 0xa95   : > { %v8034_v12 = vadd.f32 %v8010_v21, %v13018_v38  ;;  %v8036_v63 = vadd.f32 %v8012_v28, %v13021_v60  ;;  %v8014_v44 = vmul.f32 0.044715, %v7990_v6  ;;  %v8016_v49 = vmul.f32 0.044715, %v7992_v3 }
 0xa96   : > { %v8057_v62 = vmul.f32 0.7978846, %v8033_v54  ;;  %v8059_v27 = vmul.f32 0.7978846, %v8035_v2  ;;  %v8037_v57 = vadd.f32 %v8013_v55, %v13028_v32  ;;  %v8039_v15 = vadd.f32 %v8015_v24, %v13031_v13 }
 0xa97   : > { %v8058_v37 = vmul.f32 0.7978846, %v8034_v12  ;;  %v8060_v58 = vmul.f32 0.7978846, %v8036_v63  ;;  %v8038_v11 = vadd.f32 %v8014_v44, %v13038_v45  ;;  %v8040_v50 = vadd.f32 %v8016_v49, %v13041_v26 }
 0xa98   : > { %10094 = vtanh.f32 %v8057_v62  ;;  %v8061_v23 = vmul.f32 0.7978846, %v8037_v57  ;;  %v8063_v4 = vmul.f32 0.7978846, %v8039_v15 }
 0xa99   : > { %10096 = vtanh.f32 %v8059_v27  ;;  %v8062_v16 = vmul.f32 0.7978846, %v8038_v11  ;;  %v8064_v19 = vmul.f32 0.7978846, %v8040_v50 }
 0xa9a   : > { %10098 = vtanh.f32 %v8058_v37 }
 0xa9b   : > { %10100 = vtanh.f32 %v8060_v58 }
 0xa9c   : > { %10102 = vtanh.f32 %v8061_v23 }
 0xa9d   : > { %10104 = vtanh.f32 %v8063_v4 }
 0xa9e   : > { %10106 = vtanh.f32 %v8062_v16 }
 0xa9f   : > { %10108 = vtanh.f32 %v8064_v19 }
 0xaa2   : > { %v10095_v10 = vpop.eup %10094 }
 0xaa3   : > { %v10097_v42 = vpop.eup %10096  ;;  %v8105_v47 = vadd.f32 1.0, %v10095_v10 }
 0xaa4   : > { %v10099_v53 = vpop.eup %10098  ;;  %v8107_v8 = vadd.f32 1.0, %v10097_v42 }
 0xaa5   : > { %v10101_v29 = vpop.eup %10100  ;;  %v8106_v43 = vadd.f32 1.0, %v10099_v53  ;;  %v8129_v48 = vmul.f32 0.5, %v8105_v47 }
 0xaa6   : > { %v10103_v46 = vpop.eup %10102  ;;  %v8108_v7 = vadd.f32 1.0, %v10101_v29  ;;  %v8131_v40 = vmul.f32 0.5, %v8107_v8 }
 0xaa7   : > { %v10105_v51 = vpop.eup %10104  ;;  %v8109_v33 = vadd.f32 1.0, %v10103_v46  ;;  %v8130_v0 = vmul.f32 0.5, %v8106_v43  ;;  %v8153_v21 = vmul.f32 %v8129_v48, %v13012_v39 }
 0xaa8   : > { %v10107_v18 = vpop.eup %10106  ;;  %v8111_v20 = vadd.f32 1.0, %v10105_v51  ;;  %v8132_v1 = vmul.f32 0.5, %v8108_v7  ;;  %v8155_v3 = vmul.f32 %v8131_v40, %v13015_v41 }
 0xaa9   : > { %v10109_v5 = vpop.eup %10108  ;;  %v8133_v56 = vmul.f32 0.5, %v8109_v33  ;;  %v8110_v9 = vadd.f32 1.0, %v10107_v18  ;;  %v8154_v24 = vmul.f32 %v8130_v0, %v13018_v38 }
 0xaaa   : > { %v8135_v61 = vmul.f32 0.5, %v8111_v20  ;;  %v8112_v25 = vadd.f32 1.0, %v10109_v5  ;;  %v8156_v44 = vmul.f32 %v8132_v1, %v13021_v60 }
 0xaab   : > { %v8157_v28 = vmul.f32 %v8133_v56, %v13028_v32  ;;  %v8134_v6 = vmul.f32 0.5, %v8110_v9 }
 0xaac   : > { %v8159_v54 = vmul.f32 %v8135_v61, %v13031_v13  ;;  %v8136_v2 = vmul.f32 0.5, %v8112_v25 }
 0xaad   : > { %v8177_v55 = vpack.c.bf16 %v8157_v28, %v8153_v21  ;;  %v8158_v12 = vmul.f32 %v8134_v6, %v13038_v45 }
 0xaae   : > { %v8179_v63 = vpack.c.bf16 %v8159_v54, %v8155_v3  ;;  %v8160_v49 = vmul.f32 %v8136_v2, %v13041_v26 }
 0xaaf   : > { %v8178_v62 = vpack.c.bf16 %v8158_v12, %v8154_v24 }
 0xab0   : > { %v8180_v39 = vpack.c.bf16 %v8160_v49, %v8156_v44 }
 0xab1   : > { %8484 = vmatprep.mubr.bf16.mxu1 %v8178_v62 }
 0xab2   : > { %8541 = vmatprep.mubr.bf16.mxu0 %v8180_v39  ;;  %8485 = vmatmul.mubr.bf16.vlgmr.msra.gmra.mrb[128].mxu1 %v8177_v55 }
 0xab3   : > { %8542 = vmatmul.mubr.bf16.vlgmr.msra.gmra.mrb[124].mxu0 %v8179_v63 }
 0xad6   : > { %v7879_v41 = vpop.f32.mrb[120].mxu1  ;;  %v7942_v32 = vpop.f32.mrb[116].mxu0 }
 0xad7   : > { %v13076_v13 = vadd.f32 %v7879_v41, %v12999_v22  ;;  %v13079_v38 = vadd.f32 %v7942_v32, %v13003_v34  ;;  %v7881_v45 = vpop.f32.mrb[121].mxu1  ;;  %v7944_v27 = vpop.f32.mrb[117].mxu0 }
 0xad8   : > { %v13082_v60 = vadd.f32 %v7881_v45, %v13007_v59  ;;  %v13085_v26 = vadd.f32 %v7944_v27, %v13009_v30  ;;  %v7883_v57 = vpop.f32.mrb[122].mxu1  ;;  %v7946_v15 = vpop.f32.mrb[118].mxu0 }
 0xad9   : > { %v7969_v37 = vmul.f32 %v13076_v13, %v13076_v13  ;;  %v7971_v58 = vmul.f32 %v13079_v38, %v13079_v38  ;;  %v13092_v11 = vadd.f32 %v7883_v57, %v12999_v22  ;;  %v13095_v50 = vadd.f32 %v7946_v15, %v13003_v34  ;;  %v7885_v23 = vpop.f32.mrb[123].mxu1  ;;  %v7948_v4 = vpop.f32.mrb[119].mxu0 }
 0xada   : > { %v7970_v16 = vmul.f32 %v13082_v60, %v13082_v60  ;;  %v7972_v19 = vmul.f32 %v13085_v26, %v13085_v26  ;;  %v13102_v10 = vadd.f32 %v7885_v23, %v13007_v59  ;;  %v13105_v42 = vadd.f32 %v7948_v4, %v13009_v30 }
 0xadb   : > { %v7993_v47 = vmul.f32 %v7969_v37, %v13076_v13  ;;  %v7995_v53 = vmul.f32 %v7971_v58, %v13079_v38  ;;  %v7973_v8 = vmul.f32 %v13092_v11, %v13092_v11  ;;  %v7975_v29 = vmul.f32 %v13095_v50, %v13095_v50 }
 0xadc   : > { %v7994_v43 = vmul.f32 %v7970_v16, %v13082_v60  ;;  %v7996_v46 = vmul.f32 %v7972_v19, %v13085_v26  ;;  %v7974_v7 = vmul.f32 %v13102_v10, %v13102_v10  ;;  %v7976_v51 = vmul.f32 %v13105_v42, %v13105_v42 }
 0xadd   : > { %v8017_v48 = vmul.f32 0.044715, %v7993_v47  ;;  %v8019_v33 = vmul.f32 0.044715, %v7995_v53  ;;  %v7997_v18 = vmul.f32 %v7973_v8, %v13092_v11  ;;  %v7999_v40 = vmul.f32 %v7975_v29, %v13095_v50 }
 0xade   : > { %v8018_v20 = vmul.f32 0.044715, %v7994_v43  ;;  %v8020_v5 = vmul.f32 0.044715, %v7996_v46  ;;  %v7998_v56 = vmul.f32 %v7974_v7, %v13102_v10  ;;  %v8000_v9 = vmul.f32 %v7976_v51, %v13105_v42 }
 0xadf   : > { %v8041_v0 = vadd.f32 %v8017_v48, %v13076_v13  ;;  %v8043_v61 = vadd.f32 %v8019_v33, %v13079_v38  ;;  %v8021_v25 = vmul.f32 0.044715, %v7997_v18  ;;  %v8023_v1 = vmul.f32 0.044715, %v7999_v40 }
 0xae0   : > { %v8042_v21 = vadd.f32 %v8018_v20, %v13082_v60  ;;  %v8044_v28 = vadd.f32 %v8020_v5, %v13085_v26  ;;  %v8022_v6 = vmul.f32 0.044715, %v7998_v56  ;;  %v8024_v3 = vmul.f32 0.044715, %v8000_v9 }
 0xae1   : > { %v8065_v54 = vmul.f32 0.7978846, %v8041_v0  ;;  %v8067_v2 = vmul.f32 0.7978846, %v8043_v61  ;;  %v8045_v55 = vadd.f32 %v8021_v25, %v13092_v11  ;;  %v8047_v24 = vadd.f32 %v8023_v1, %v13095_v50 }
 0xae2   : > { %v8066_v12 = vmul.f32 0.7978846, %v8042_v21  ;;  %v8068_v63 = vmul.f32 0.7978846, %v8044_v28  ;;  %v8046_v44 = vadd.f32 %v8022_v6, %v13102_v10  ;;  %v8048_v49 = vadd.f32 %v8024_v3, %v13105_v42 }
 0xae3   : > { %10110 = vtanh.f32 %v8065_v54  ;;  %v8069_v62 = vmul.f32 0.7978846, %v8045_v55  ;;  %v8071_v39 = vmul.f32 0.7978846, %v8047_v24 }
 0xae4   : > { %10112 = vtanh.f32 %v8067_v2  ;;  %v8070_v41 = vmul.f32 0.7978846, %v8046_v44  ;;  %v8072_v32 = vmul.f32 0.7978846, %v8048_v49 }
 0xae5   : > { %10114 = vtanh.f32 %v8066_v12 }
 0xae6   : > { %10116 = vtanh.f32 %v8068_v63 }
 0xae7   : > { %10118 = vtanh.f32 %v8069_v62 }
 0xae8   : > { %10120 = vtanh.f32 %v8071_v39 }
 0xae9   : > { %10122 = vtanh.f32 %v8070_v41 }
 0xaea   : > { %10124 = vtanh.f32 %v8072_v32 }
 0xaed   : > { %v10111_v45 = vpop.eup %10110 }
 0xaee   : > { %v10113_v27 = vpop.eup %10112  ;;  %v8113_v57 = vadd.f32 1.0, %v10111_v45 }
 0xaef   : > { %v10115_v15 = vpop.eup %10114  ;;  %v8115_v37 = vadd.f32 1.0, %v10113_v27 }
 0xaf0   : > { %v10117_v58 = vpop.eup %10116  ;;  %v8114_v23 = vadd.f32 1.0, %v10115_v15  ;;  %v8137_v53 = vmul.f32 0.5, %v8113_v57 }
 0xaf1   : > { %v10119_v4 = vpop.eup %10118  ;;  %v8116_v16 = vadd.f32 1.0, %v10117_v58  ;;  %v8139_v43 = vmul.f32 0.5, %v8115_v37 }
 0xaf2   : > { %v10121_v19 = vpop.eup %10120  ;;  %v8117_v47 = vadd.f32 1.0, %v10119_v4  ;;  %v8138_v51 = vmul.f32 0.5, %v8114_v23  ;;  %v8161_v5 = vmul.f32 %v8137_v53, %v13076_v13 }
 0xaf3   : > { %v10123_v8 = vpop.eup %10122  ;;  %v8119_v29 = vadd.f32 1.0, %v10121_v19  ;;  %v8140_v18 = vmul.f32 0.5, %v8116_v16  ;;  %v8163_v0 = vmul.f32 %v8139_v43, %v13079_v38 }
 0xaf4   : > { %v10125_v46 = vpop.eup %10124  ;;  %v8118_v7 = vadd.f32 1.0, %v10123_v8  ;;  %v8141_v48 = vmul.f32 0.5, %v8117_v47  ;;  %v8162_v25 = vmul.f32 %v8138_v51, %v13082_v60 }
 0xaf5   : > { %v8120_v33 = vadd.f32 1.0, %v10125_v46  ;;  %v8143_v40 = vmul.f32 0.5, %v8119_v29  ;;  %v8164_v28 = vmul.f32 %v8140_v18, %v13085_v26 }
 0xaf6   : > { %v8142_v20 = vmul.f32 0.5, %v8118_v7  ;;  %v8165_v56 = vmul.f32 %v8141_v48, %v13092_v11 }
 0xaf7   : > { %v8144_v9 = vmul.f32 0.5, %v8120_v33  ;;  %v8167_v61 = vmul.f32 %v8143_v40, %v13095_v50 }
 0xaf8   : > { %v8166_v1 = vmul.f32 %v8142_v20, %v13102_v10  ;;  %v8181_v21 = vpack.c.bf16 %v8165_v56, %v8161_v5 }
 0xaf9   : > { %v8168_v6 = vmul.f32 %v8144_v9, %v13105_v42  ;;  %v8183_v3 = vpack.c.bf16 %v8167_v61, %v8163_v0 }
 0xafa   : > { %v8182_v54 = vpack.c.bf16 %v8166_v1, %v8162_v25 }
 0xafb   : > { %v8184_v2 = vpack.c.bf16 %v8168_v6, %v8164_v28 }
 0xafc   : > { %8492 = vmatprep.mubr.bf16.mxu1 %v8182_v54 }
 0xafd   : > { %8549 = vmatprep.mubr.bf16.mxu0 %v8184_v2  ;;  %8493 = vmatmul.mubr.bf16.gmra.mrb[132].mxu1 %v8181_v21 }
 0xafe   : > { %8550 = vmatmul.mubr.bf16.gmra.mrb[128].mxu0 %v8183_v3 }
 0xb12   : > { %v7889_v13 = vpop.f32.mrb[124].mxu1  ;;  %v7952_v38 = vpop.f32.mrb[120].mxu0 }
 0xb13   : > { %v13140_v11 = vadd.f32 %v7889_v13, %v12999_v22  ;;  %v13143_v60 = vadd.f32 %v7952_v38, %v13003_v34  ;;  %v7891_v50 = vpop.f32.mrb[125].mxu1  ;;  %v7954_v10 = vpop.f32.mrb[121].mxu0 }
 0xb14   : > { %v13146_v26 = vadd.f32 %v7891_v50, %v13007_v59  ;;  %v13149_v42 = vadd.f32 %v7954_v10, %v13009_v30  ;;  %v7893_v55 = vpop.f32.mrb[126].mxu1  ;;  %v7956_v24 = vpop.f32.mrb[122].mxu0 }
 0xb15   : > { %v7977_v12 = vmul.f32 %v13140_v11, %v13140_v11  ;;  %v7979_v63 = vmul.f32 %v13143_v60, %v13143_v60  ;;  %v13156_v44 = vadd.f32 %v7893_v55, %v12999_v22  ;;  %v13159_v49 = vadd.f32 %v7956_v24, %v13003_v34  ;;  %v7895_v62 = vpop.f32.mrb[127].mxu1  ;;  %v7958_v39 = vpop.f32.mrb[123].mxu0 }
 0xb16   : > { %v7978_v41 = vmul.f32 %v13146_v26, %v13146_v26  ;;  %v7980_v32 = vmul.f32 %v13149_v42, %v13149_v42  ;;  %v13166_v45 = vadd.f32 %v7895_v62, %v13007_v59  ;;  %v13169_v27 = vadd.f32 %v7958_v39, %v13009_v30 }
 0xb17   : > { %v8001_v22 = vmul.f32 %v7977_v12, %v13140_v11  ;;  %v8003_v57 = vmul.f32 %v7979_v63, %v13143_v60  ;;  %v7981_v34 = vmul.f32 %v13156_v44, %v13156_v44  ;;  %v7983_v15 = vmul.f32 %v13159_v49, %v13159_v49 }
 0xb18   : > { %v8002_v37 = vmul.f32 %v7978_v41, %v13146_v26  ;;  %v8004_v58 = vmul.f32 %v7980_v32, %v13149_v42  ;;  %v7982_v59 = vmul.f32 %v13166_v45, %v13166_v45  ;;  %v7984_v30 = vmul.f32 %v13169_v27, %v13169_v27 }
 0xb19   : > { %v8025_v23 = vmul.f32 0.044715, %v8001_v22  ;;  %v8027_v4 = vmul.f32 0.044715, %v8003_v57  ;;  %v8005_v16 = vmul.f32 %v7981_v34, %v13156_v44  ;;  %v8007_v19 = vmul.f32 %v7983_v15, %v13159_v49 }
 0xb1a   : > { %v8026_v47 = vmul.f32 0.044715, %v8002_v37  ;;  %v8028_v53 = vmul.f32 0.044715, %v8004_v58  ;;  %v8006_v8 = vmul.f32 %v7982_v59, %v13166_v45  ;;  %v8008_v29 = vmul.f32 %v7984_v30, %v13169_v27 }
 0xb1b   : > { %v8049_v43 = vadd.f32 %v8025_v23, %v13140_v11  ;;  %v8051_v46 = vadd.f32 %v8027_v4, %v13143_v60  ;;  %v8029_v7 = vmul.f32 0.044715, %v8005_v16  ;;  %v8031_v51 = vmul.f32 0.044715, %v8007_v19 }
 0xb1c   : > { %v8050_v48 = vadd.f32 %v8026_v47, %v13146_v26  ;;  %v8052_v33 = vadd.f32 %v8028_v53, %v13149_v42  ;;  %v8030_v18 = vmul.f32 0.044715, %v8006_v8  ;;  %v8032_v40 = vmul.f32 0.044715, %v8008_v29 }
 0xb1d   : > { %v8073_v20 = vmul.f32 0.7978846, %v8049_v43  ;;  %v8075_v5 = vmul.f32 0.7978846, %v8051_v46  ;;  %v8053_v56 = vadd.f32 %v8029_v7, %v13156_v44  ;;  %v8055_v9 = vadd.f32 %v8031_v51, %v13159_v49 }
 0xb1e   : > { %v8074_v0 = vmul.f32 0.7978846, %v8050_v48  ;;  %v8076_v61 = vmul.f32 0.7978846, %v8052_v33  ;;  %v8054_v25 = vadd.f32 %v8030_v18, %v13166_v45  ;;  %v8056_v1 = vadd.f32 %v8032_v40, %v13169_v27 }
 0xb1f   : > { %10126 = vtanh.f32 %v8073_v20  ;;  %v8077_v21 = vmul.f32 0.7978846, %v8053_v56  ;;  %v8079_v28 = vmul.f32 0.7978846, %v8055_v9 }
 0xb20   : > { %10128 = vtanh.f32 %v8075_v5  ;;  %v8078_v6 = vmul.f32 0.7978846, %v8054_v25  ;;  %v8080_v3 = vmul.f32 0.7978846, %v8056_v1 }
 0xb21   : > { %10130 = vtanh.f32 %v8074_v0 }
 0xb22   : > { %10132 = vtanh.f32 %v8076_v61 }
 0xb23   : > { %10134 = vtanh.f32 %v8077_v21 }
 0xb24   : > { %10136 = vtanh.f32 %v8079_v28 }
 0xb25   : > { %10138 = vtanh.f32 %v8078_v6 }
 0xb26   : > { %10140 = vtanh.f32 %v8080_v3 }
 0xb29   : > { %v10127_v54 = vpop.eup %10126 }
 0xb2a   : > { %v10129_v2 = vpop.eup %10128  ;;  %v8121_v13 = vadd.f32 1.0, %v10127_v54 }
 0xb2b   : > { %v10131_v38 = vpop.eup %10130  ;;  %v8123_v50 = vadd.f32 1.0, %v10129_v2 }
 0xb2c   : > { %v10133_v10 = vpop.eup %10132  ;;  %v8122_v55 = vadd.f32 1.0, %v10131_v38  ;;  %v8145_v39 = vmul.f32 0.5, %v8121_v13 }
 0xb2d   : > { %v10135_v24 = vpop.eup %10134  ;;  %v8124_v12 = vadd.f32 1.0, %v10133_v10  ;;  %v8147_v22 = vmul.f32 0.5, %v8123_v50 }
 0xb2e   : > { %v10137_v63 = vpop.eup %10136  ;;  %v8125_v62 = vadd.f32 1.0, %v10135_v24  ;;  %v8146_v15 = vmul.f32 0.5, %v8122_v55  ;;  %v8169_v4 = vmul.f32 %v8145_v39, %v13140_v11 }
 0xb2f   : > { %v10139_v41 = vpop.eup %10138  ;;  %v8127_v32 = vadd.f32 1.0, %v10137_v63  ;;  %v8148_v59 = vmul.f32 0.5, %v8124_v12  ;;  %v8171_v47 = vmul.f32 %v8147_v22, %v13143_v60 }
 0xb30   : > { %v10141_v57 = vpop.eup %10140  ;;  %v8126_v34 = vadd.f32 1.0, %v10139_v41  ;;  %v8149_v37 = vmul.f32 0.5, %v8125_v62  ;;  %v8170_v8 = vmul.f32 %v8146_v15, %v13146_v26  ;;  %v9115_v26 = vld [vmem:[%s810_s7] ss:$0 sm:$0xff] }
 0xb31   : > { %v8128_v58 = vadd.f32 1.0, %v10141_v57  ;;  %v8151_v30 = vmul.f32 0.5, %v8127_v32  ;;  %v8172_v46 = vmul.f32 %v8148_v59, %v13149_v42 }
 0xb32   : > { %v8150_v23 = vmul.f32 0.5, %v8126_v34  ;;  %v8173_v16 = vmul.f32 %v8149_v37, %v13156_v44 }
 0xb33   : > { %v8152_v19 = vmul.f32 0.5, %v8128_v58  ;;  %v8175_v53 = vmul.f32 %v8151_v30, %v13159_v49 }
 0xb34   : > { %v8174_v29 = vmul.f32 %v8150_v23, %v13166_v45  ;;  %v8185_v43 = vpack.c.bf16 %v8173_v16, %v8169_v4 }
 0xb35   : > { %v8176_v7 = vmul.f32 %v8152_v19, %v13169_v27  ;;  %v8187_v51 = vpack.c.bf16 %v8175_v53, %v8171_v47 }
 0xb36   : > { %v8186_v48 = vpack.c.bf16 %v8174_v29, %v8170_v8 }
 0xb37   : > { %v8188_v11 = vpack.c.bf16 %v8176_v7, %v8172_v46 }
 0xb38   : > { %8500 = vmatprep.mubr.bf16.mxu1 %v8186_v48 }
 0xb39   : > { %8557 = vmatprep.mubr.bf16.mxu0 %v8188_v11  ;;  %8501 = vmatmul.mubr.bf16.gmra.mrb[136].mxu1 %v8185_v43 }
 0xb3a   : > { %8558 = vmatmul.mubr.bf16.gmra.mrb[132].mxu0 %v8187_v51 }
 0xb85   : > { %v9292_v60 = vpop.f32.mrb[128].mxu1 }
 0xb86   : > { %v9326_v44 = vpop.f32.mrb[124].mxu0  ;;  %v9293_v49 = vpop.f32.mrb[129].mxu1 }
 0xb87   : > { %v9294_v45 = vadd.f32 %v9293_v49, %v9292_v60  ;;  %v9327_v33 = vpop.f32.mrb[125].mxu0  ;;  %v9295_v42 = vpop.f32.mrb[130].mxu1 }
 0xb88   : > { %v9328_v18 = vadd.f32 %v9327_v33, %v9326_v44  ;;  %v9329_v27 = vpop.f32.mrb[126].mxu0  ;;  %v9296_v40 = vpop.f32.mrb[131].mxu1 }
 0xb89   : > { %v8487_v20 = vadd.f32 %v9294_v45, %v9115_v26  ;;  %v9297_v5 = vadd.f32 %v9296_v40, %v9295_v42  ;;  %v9330_v56 = vpop.f32.mrb[127].mxu0 }
 0xb8a   : > { %v9331_v9 = vadd.f32 %v9330_v56, %v9329_v27 }
 0xb8b   : > { %v8544_v0 = vadd.f32 %v9328_v18, %v8487_v20  ;;  %v8490_v61 = vadd.f32 %v9297_v5, %v9115_v26 }
 0xb8d   : > { %v8566_v25 = vadd.f32 %v8544_v0, %v12857_v17  ;;  %v8547_v1 = vadd.f32 %v9331_v9, %v8490_v61 }
 0xb8f   : > { %8572 = vst [vmem:[#allocation2] sm:$0xff] %v8566_v25  ;;  %v8567_v21 = vadd.f32 %v8547_v1, %v12859_v14  ;;  %8584 = vadd.xlane.f32.xlu0 (!%p9148_p8), %v8566_v25 }
 0xb91   : > { %8573 = vst [vmem:[#allocation2 + $0x8] sm:$0xff] %v8567_v21 }
 0xb93   : > { %8586 = vadd.xlane.f32.xlu0 (!%p9148_p8), %v8567_v21 }
 0xbd0   : > { %v9298_v28 = vpop.f32.mrb[132].mxu1 }
 0xbd1   : > { %v9332_v6 = vpop.f32.mrb[128].mxu0  ;;  %v9299_v3 = vpop.f32.mrb[133].mxu1 }
 0xbd2   : > { %v9300_v54 = vadd.f32 %v9299_v3, %v9298_v28  ;;  %v9333_v2 = vpop.f32.mrb[129].mxu0  ;;  %v9301_v13 = vpop.f32.mrb[134].mxu1 }
 0xbd3   : > { %v9334_v38 = vadd.f32 %v9333_v2, %v9332_v6  ;;  %v9335_v50 = vpop.f32.mrb[130].mxu0  ;;  %v9302_v10 = vpop.f32.mrb[135].mxu1 }
 0xbd4   : > { %v8495_v55 = vadd.f32 %v9300_v54, %v9115_v26  ;;  %v9303_v24 = vadd.f32 %v9302_v10, %v9301_v13  ;;  %v9336_v12 = vpop.f32.mrb[131].mxu0 }
 0xbd5   : > { %v9337_v63 = vadd.f32 %v9336_v12, %v9335_v50 }
 0xbd6   : > { %v8552_v62 = vadd.f32 %v9334_v38, %v8495_v55  ;;  %v8498_v17 = vadd.f32 %v9303_v24, %v9115_v26 }
 0xbd8   : > { %v8568_v39 = vadd.f32 %v8552_v62, %v12863_v36  ;;  %v8555_v41 = vadd.f32 %v9337_v63, %v8498_v17  ;;  %v9149_v17 = vld [vmem:[%s13368_s27] ss:$0 sm:$0xff] (!%p9148_p8) }
 0xbda   : > { %8574 = vst [vmem:[#allocation2 + $0x10] sm:$0xff] %v8568_v39  ;;  %v8569_v14 = vadd.f32 %v8555_v41, %v12866_v31  ;;  %8588 = vadd.xlane.f32.xlu1 (!%p9148_p8), %v8568_v39 }
 0xbdc   : > { %8575 = vst [vmem:[#allocation2 + $0x18] sm:$0xff] %v8569_v14 }
 0xbde   : > { %8590 = vadd.xlane.f32.xlu1 (!%p9148_p8), %v8569_v14 }
 0xc0c   : > { %v9304_v32 = vpop.f32.mrb[136].mxu1 }
 0xc0d   : > { %v9338_v22 = vpop.f32.mrb[132].mxu0  ;;  %v9305_v57 = vpop.f32.mrb[137].mxu1 }
 0xc0e   : > { %v9306_v34 = vadd.f32 %v9305_v57, %v9304_v32  ;;  %v9339_v15 = vpop.f32.mrb[133].mxu0  ;;  %v9307_v37 = vpop.f32.mrb[138].mxu1 }
 0xc0f   : > { %v9340_v58 = vadd.f32 %v9339_v15, %v9338_v22  ;;  %v9341_v59 = vpop.f32.mrb[134].mxu0  ;;  %v9308_v30 = vpop.f32.mrb[139].mxu1 }
 0xc10   : > { %v8503_v23 = vadd.f32 %v9306_v34, %v9115_v26  ;;  %v9309_v4 = vadd.f32 %v9308_v30, %v9307_v37  ;;  %v9342_v16 = vpop.f32.mrb[135].mxu0 }
 0xc11   : > { %v9343_v19 = vadd.f32 %v9342_v16, %v9341_v59 }
 0xc12   : > { %v8560_v47 = vadd.f32 %v9340_v58, %v8503_v23  ;;  %v8506_v36 = vadd.f32 %v9309_v4, %v9115_v26  ;;  %8581 = sbr.rel (%p9148_p8) target bundleno = 3408 (0xd50), region = 116 }
 0xc14   : > { %v8570_v53 = vadd.f32 %v8560_v47, %v12869_v52  ;;  %v8563_v8 = vadd.f32 %v9343_v19, %v8506_v36 }
 0xc16   : > { %8576 = vst [vmem:[#allocation2 + $0x20] sm:$0xff] %v8570_v53  ;;  %v8571_v31 = vadd.f32 %v8563_v8, %v12871_v35  ;;  %8592 = vadd.xlane.f32.xlu0 (!%p9148_p8), %v8570_v53 }
 0xc18   : > { %8577 = vst [vmem:[#allocation2 + $0x28] sm:$0xff] %v8571_v31  ;;  %8594 = vadd.xlane.f32.xlu1 (!%p9148_p8), %v8571_v31 }
 0xc1c   : > { %v8585_v29 = vpop.xlane.xlu0 %8584 }
 0xc1d   : > { %v8596_v46 = vmul.f32 0.0078125, %v8585_v29 }
 0xc1f   : > { %v8602_v51 = vsub.f32 %v8566_v25, %v8596_v46 }
 0xc20   : > { %v8587_v48 = vpop.xlane.xlu0 %8586 }
 0xc21   : > { %v8597_v60 = vmul.f32 0.0078125, %v8587_v48  ;;  %v8608_v35 = vmul.f32 %v8602_v51, %v8602_v51 }
 0xc23   : > { %v8603_v26 = vsub.f32 %v8567_v21, %v8597_v60  ;;  %8614 = vadd.xlane.f32.xlu0 %v8608_v35 }
 0xc25   : > { %v8609_v27 = vmul.f32 %v8603_v26, %v8603_v26 }
 0xc27   : > { %8616 = vadd.xlane.f32.xlu1 %v8609_v27 }
 0xc67   : > { %v8589_v43 = vpop.xlane.xlu1 %8588 }
 0xc68   : > { %v8598_v7 = vmul.f32 0.0078125, %v8589_v43 }
 0xc6a   : > { %v8604_v52 = vsub.f32 %v8568_v39, %v8598_v7 }
 0xc6b   : > { %v8591_v11 = vpop.xlane.xlu1 %8590 }
 0xc6c   : > { %v8599_v44 = vmul.f32 0.0078125, %v8591_v11  ;;  %v8610_v45 = vmul.f32 %v8604_v52, %v8604_v52 }
 0xc6e   : > { %v8605_v49 = vsub.f32 %v8569_v14, %v8599_v44  ;;  %8618 = vadd.xlane.f32.xlu0 %v8610_v45  ;;  %v9150_v14 = vld [vmem:[%s13369_s14] ss:$0 sm:$0xff] }
 0xc70   : > { %v8611_v56 = vmul.f32 %v8605_v49, %v8605_v49 }
 0xc72   : > { %8620 = vadd.xlane.f32.xlu1 %v8611_v56 }
 0xca3   : > { %v8593_v33 = vpop.xlane.xlu0 %8592 }
 0xca4   : > { %v8600_v18 = vmul.f32 0.0078125, %v8593_v33 }
 0xca5   : > { %v8595_v42 = vpop.xlane.xlu1 %8594 }
 0xca6   : > { %v8601_v40 = vmul.f32 0.0078125, %v8595_v42  ;;  %v8606_v20 = vsub.f32 %v8570_v53, %v8600_v18 }
 0xca8   : > { %v8607_v5 = vsub.f32 %v8571_v31, %v8601_v40  ;;  %v8612_v9 = vmul.f32 %v8606_v20, %v8606_v20 }
 0xcaa   : > { %8622 = vadd.xlane.f32.xlu0 %v8612_v9  ;;  %v8613_v0 = vmul.f32 %v8607_v5, %v8607_v5 }
 0xcac   : > { %8624 = vadd.xlane.f32.xlu1 %v8613_v0 }
 0xcb0   : > { %v8615_v61 = vpop.xlane.xlu0 %8614 }
 0xcb1   : > { %v8626_v25 = vmul.f32 0.0078125, %v8615_v61 }
 0xcb3   : > { %v8632_v1 = vadd.f32 1e-05, %v8626_v25 }
 0xcb4   : > { %v8617_v21 = vpop.xlane.xlu1 %8616 }
 0xcb5   : > { %10148 = vrsqrt.f32 %v8632_v1  ;;  %v8627_v6 = vmul.f32 0.0078125, %v8617_v21 }
 0xcb7   : > { %v8633_v54 = vadd.f32 1e-05, %v8627_v6 }
 0xcb9   : > { %10150 = vrsqrt.f32 %v8633_v54 }
 0xcbf   : > { %v10149_v62 = vpop.eup %10148 }
 0xcc0   : > { %v8644_v41 = vmul.f32 %v10149_v62, %v8602_v51 }
 0xcc2   : > { %v8656_v32 = vmul.f32 %v9149_v17, %v8644_v41 }
 0xcc3   : > { %v10151_v22 = vpop.eup %10150 }
 0xcc4   : > { %v8668_v34 = vadd.f32 %v9150_v14, %v8656_v32  ;;  %v8645_v15 = vmul.f32 %v10151_v22, %v8603_v26 }
 0xcc6   : > { %8674 = vst [vmem:[#allocation15] sm:$0xff] %v8668_v34  ;;  %v8657_v58 = vmul.f32 %v9149_v17, %v8645_v15 }
 0xcc8   : > { %v8669_v4 = vadd.f32 %v9150_v14, %v8657_v58 }
 0xcca   : > { %8675 = vst [vmem:[#allocation15 + $0x8] sm:$0xff] %v8669_v4 }
 0xcfb   : > { %v8619_v28 = vpop.xlane.xlu0 %8618 }
 0xcfc   : > { %v8628_v3 = vmul.f32 0.0078125, %v8619_v28 }
 0xcfe   : > { %v8634_v2 = vadd.f32 1e-05, %v8628_v3 }
 0xcff   : > { %v8621_v13 = vpop.xlane.xlu1 %8620 }
 0xd00   : > { %v8629_v50 = vmul.f32 0.0078125, %v8621_v13  ;;  %10152 = vrsqrt.f32 %v8634_v2 }
 0xd02   : > { %v8635_v55 = vadd.f32 1e-05, %v8629_v50 }
 0xd04   : > { %10154 = vrsqrt.f32 %v8635_v55 }
 0xd0a   : > { %v10153_v57 = vpop.eup %10152 }
 0xd0b   : > { %v8646_v37 = vmul.f32 %v10153_v57, %v8604_v52 }
 0xd0d   : > { %v8658_v30 = vmul.f32 %v9149_v17, %v8646_v37 }
 0xd0e   : > { %v10155_v59 = vpop.eup %10154 }
 0xd0f   : > { %v8647_v16 = vmul.f32 %v10155_v59, %v8605_v49  ;;  %v8670_v19 = vadd.f32 %v9150_v14, %v8658_v30 }
 0xd11   : > { %v8659_v36 = vmul.f32 %v9149_v17, %v8647_v16  ;;  %8676 = vst [vmem:[#allocation15 + $0x10] sm:$0xff] %v8670_v19 }
 0xd13   : > { %v8671_v31 = vadd.f32 %v9150_v14, %v8659_v36 }
 0xd15   : > { %8677 = vst [vmem:[#allocation15 + $0x18] sm:$0xff] %v8671_v31 }
 0xd37   : > { %v8623_v38 = vpop.xlane.xlu0 %8622 }
 0xd38   : > { %v8630_v10 = vmul.f32 0.0078125, %v8623_v38 }
 0xd39   : > { %v8625_v12 = vpop.xlane.xlu1 %8624 }
 0xd3a   : > { %v8636_v24 = vadd.f32 1e-05, %v8630_v10  ;;  %v8631_v63 = vmul.f32 0.0078125, %v8625_v12 }
 0xd3c   : > { %10156 = vrsqrt.f32 %v8636_v24  ;;  %v8637_v39 = vadd.f32 1e-05, %v8631_v63 }
 0xd3e   : > { %10158 = vrsqrt.f32 %v8637_v39 }
 0xd46   : > { %v10157_v23 = vpop.eup %10156 }
 0xd47   : > { %v8648_v47 = vmul.f32 %v10157_v23, %v8606_v20 }
 0xd48   : > { %v10159_v53 = vpop.eup %10158 }
 0xd49   : > { %v8660_v8 = vmul.f32 %v9149_v17, %v8648_v47  ;;  %v8649_v29 = vmul.f32 %v10159_v53, %v8607_v5 }
 0xd4b   : > { %v8672_v43 = vadd.f32 %v9150_v14, %v8660_v8  ;;  %v8661_v46 = vmul.f32 %v9149_v17, %v8649_v29 }
 0xd4d   : > { %8678 = vst [vmem:[#allocation15 + $0x20] sm:$0xff] %v8672_v43  ;;  %v8673_v7 = vadd.f32 %v9150_v14, %v8661_v46 }
 0xd4f   : > { %8679 = vst [vmem:[#allocation15 + $0x28] sm:$0xff] %v8673_v7 }
 0xd50 PF: > { %p9738_p9 = scmp.eq.s32.totalorder %s10748_s26, 1  ;;  %s10486_s30 = smov [#allocation15]  }
 0xd51   : > { %s8689_s1 = sshll.u32 %s10486_s30, 4  ;;  %s8690_s1 = int_to_ptr.vmem [resolvable:$true] %s8689_s1 }
 0xd52   : > { %s10368_s25 = scalar_lea.vmem %s8690_s1, 768  ;;  %p10375_p2 = scmp.lt.s32.totalorder %s8690_s1, %s8690_s1 }
 0xd53   : > { %p10369_p7 = scmp.ne.s32.totalorder %s8690_s1, %s10368_s25  ;;  %p10376_p12 = scmp.lt.s32.totalorder %s10368_s25, %s10368_s25 }
 0xd55   : > { %p10370_p4 = pnand %p10369_p7, %p9738_p9  ;;  %p10377_p1 = por %p10376_p12, %p10375_p2 }
 0xd57   : > { %p10371_p13 = pneg %p10370_p4 }
 0xd59   : > { %p10378_p3 = pnand %p10377_p1, %p10371_p13 }
 0xd5b   : > { %10381 = shalt.err (!%p10378_p3)
}
 0xd5c   : > { %s13370_s0 = sld [smem:[#allocation40_spill]] }
 0xd62   : > { %s10382_s2 = scalar_lea.hbm %s13370_s0, 768 }
 0xd63   : > { %p10383_p11 = scmp.ne.s32.totalorder %s13370_s0, %s10382_s2  ;;  %p10388_p10 = scmp.lt.u32.totalorder %s10382_s2, %s13370_s0 }
 0xd65   : > { %p10384_p0 = pnand %p10383_p11, %p9738_p9 }
 0xd67   : > { %p10385_p5 = pneg %p10384_p0 }
 0xd69   : > { %p10390_p6 = pnand %p10388_p10, %p10385_p5 }
 0xd6b   : > { %10393 = shalt.err (!%p10390_p6)
}
 0xd6c   : > { %s10487_s29 = smov 128   ;;  %s10488_s16 = smov 8  }
 0xd6d   : > { %9709 = dma.vmem_to_hbm [thread:$0]  (%p9738_p9), %s8690_s1, 768, %s13370_s0, [#allocation5], %s10487_s29, %s10487_s29, %s10488_s16  }
 0xd6e   : > { %10435 = dma.done.wait (%p9738_p9), [#allocation5], 768  }
 0xd6f   : > { %10437 = vsyncadd (%p9738_p9), [#allocation5], 4294966528 }
 0xd70 PF: > { %s13371_s28 = sld [smem:[#allocation23_spill]]  ;;  %s13372_s3 = sld [smem:[#allocation21_spill]] }
 0xd71   : > { %s13373_s20 = sld [smem:[#allocation25_spill]]  ;;  %s13374_s21 = sld [smem:[#allocation22_spill]] }
 0xd72   : > { %s13375_s22 = sld [smem:[#allocation24_spill]]  ;;  %s13376_s18 = smov %s10444_s19 }
 0xd76   : > { %s36_s23 = sadd.s32 1, %s13371_s28   ;;  %s13377_s19 = smov %s13372_s3 }
 0xd77   : > { %p33_p8 = scmp.ge.s32.totalorder %s36_s23, 4  }
 0xd79   :  { %35 = sbr.rel (!%p33_p8) target bundleno = 26 (0x1a), region = 209 }
 0xd80   :  { %8705 = vsyncpa [#allocation4], 1 }
 0xd81   :  { %8707 = vsyncpa [#allocation4 + $0x1], 1 }
 0xd82   :  { %8708 = vsyncpa [#allocation7], 1 }
 0xd83   :  { %8710 = vsyncpa [#allocation7 + $0x1], 1 }
 0xd84   :  { %8711 = vsyncpa [#allocation10], 1 }
 0xd85   :  { %8713 = vsyncpa [#allocation10 + $0x1], 1 }
 0xd86   :  { %8714 = vsyncpa [#allocation13], 1 }
 0xd87   :  { %8716 = vsyncpa [#allocation13 + $0x1], 1 }
 0xd88   :  { %8717 = vsyncpa [#allocation5], 1 }
 0xd89   :  { %8719 = vsyncpa [#allocation5 + $0x1], 1 }

</bundles_post_ra>
